<compile_context>
chip_gen: v6e
topology: v6e:2x2x1
jax: 0.10.0
libtpu: 0.0.40
codegen_flags: <defaults>
</compile_context>

<pallas_src>
import math
from functools import partial

import jax
import jax.numpy as jnp
from jax.experimental import pallas as pl
from jax.experimental.pallas import tpu as pltpu

EPS = 1e-5          # torch.nn.LayerNorm default
S_PAD = 128         # lane-dense padding of the key / attention axis


# ----------------------------- in-kernel helpers -----------------------------

def _layernorm(x, gamma, beta):
    mu = jnp.mean(x, axis=-1, keepdims=True)
    xc = x - mu
    var = jnp.mean(xc * xc, axis=-1, keepdims=True)
    inv = jax.lax.rsqrt(var + EPS)
    return xc * inv * gamma + beta


def _erf(x):
    # Abramowitz & Stegun 7.1.26 rational approximation, |err| <= 1.5e-7.
    a1, a2, a3, a4, a5 = 0.254829592, -0.284496736, 1.421413741, -1.453152027, 1.061405429
    p = 0.3275911
    s = jnp.where(x >= 0.0, 1.0, -1.0)
    ax = jnp.abs(x)
    t = 1.0 / (1.0 + p * ax)
    poly = ((((a5 * t + a4) * t + a3) * t + a2) * t + a1) * t
    return s * (1.0 - poly * jnp.exp(-ax * ax))


def _gelu(x):
    # ESM's gelu: x * 0.5 * (1 + erf(x / sqrt(2)))  (exact-erf form)
    return x * 0.5 * (1.0 + _erf(x * (1.0 / math.sqrt(2.0))))


# ------------------------------- fused kernel --------------------------------

def fused_layer_kernel(x_ref, g1_ref, b1_ref, wqkv_ref, bqkv_ref,
                       biask_ref, biasv_ref, wo_ref, bo_ref,
                       g2_ref, b2_ref, w1_ref, b1f_ref, w2_ref, b2f_ref,
                       y_ref, attn_ref,
                       q_scr, k_scr, v_scr, o_scr,
                       *, B, T, E, H, D):
    x = x_ref[...]                                   # (B, T, E)
    xf = x.reshape(B * T, E)                         # fold batch into sublane rows

    # ---- LN1 + fused QKV projection: one (B*T, E) x (E, 3E) matmul ----
    ln1 = _layernorm(xf, g1_ref[...], b1_ref[...])
    qkv = jnp.dot(ln1, wqkv_ref[...], preferred_element_type=jnp.float32) + bqkv_ref[...]
    scaling = D ** -0.5

    # ---- pack heads-as-batch into tile-aligned VMEM scratch (no 9-row concat) ----
    k_scr[...] = jnp.zeros_like(k_scr)               # padded rows must stay finite
    v_scr[...] = jnp.zeros_like(v_scr)
    for b in range(B):                               # static unroll: B*H small copies
        rows = slice(b * T, (b + 1) * T)
        for h in range(H):
            i = b * H + h
            cq = slice(h * D, (h + 1) * D)
            ck = slice(E + h * D, E + (h + 1) * D)
            cv = slice(2 * E + h * D, 2 * E + (h + 1) * D)
            q_scr[i, :, :] = qkv[rows, cq] * scaling
            k_scr[i, :T, :] = qkv[rows, ck]
            v_scr[i, :T, :] = qkv[rows, cv]
            # add_bias_kv=True: one learned key/value appended at position T
            k_scr[i, T:T + 1, :] = biask_ref[:, h * D:(h + 1) * D]
            v_scr[i, T:T + 1, :] = biasv_ref[:, h * D:(h + 1) * D]

    # ---- batched attention over all (batch, head) pairs at once ----
    qh = q_scr[...]                                              # (BH, T, D)
    s = jnp.einsum('btd,bsd->bts', qh, k_scr[...],
                   preferred_element_type=jnp.float32)           # (BH, T, S_PAD)
    col = jax.lax.broadcasted_iota(jnp.int32, s.shape, 2)
    s = jnp.where(col < T + 1, s, -1e30)                         # mask padded keys
    m = jnp.max(s, axis=-1, keepdims=True)
    p = jnp.exp(s - m)
    denom = jnp.sum(p, axis=-1, keepdims=True)
    probs = p * pl.reciprocal(denom, approx=True)                # (BH, T, S_PAD)
    pv = jnp.einsum('bts,bsd->btd', probs, v_scr[...],
                    preferred_element_type=jnp.float32)          # (BH, T, D)

    # head-averaged attention weights, lane-dense store (B, T, S_PAD)
    attn_ref[...] = probs.reshape(B, H, T, S_PAD).sum(axis=1) * (1.0 / H)

    # ---- merge heads + output projection + residual ----
    for b in range(B):
        for h in range(H):
            o_scr[b * T:(b + 1) * T, h * D:(h + 1) * D] = pv[b * H + h]
    o = jnp.dot(o_scr[...], wo_ref[...], preferred_element_type=jnp.float32) + bo_ref[...]
    x1 = xf + o

    # ---- LN2 + FFN (exact-erf GELU) + residual ----
    ln2 = _layernorm(x1, g2_ref[...], b2_ref[...])
    hact = _gelu(jnp.dot(ln2, w1_ref[...], preferred_element_type=jnp.float32) + b1f_ref[...])
    f = jnp.dot(hact, w2_ref[...], preferred_element_type=jnp.float32) + b2f_ref[...]
    y_ref[...] = (x1 + f).reshape(B, T, E)


# --------------------------------- wrapper ------------------------------------

def transformer_layer_forward(x_tbe, params, num_heads):
    T, B, E = x_tbe.shape
    H = num_heads
    D = E // H
    F = params["w1_t"].shape[1]

    x = jnp.transpose(x_tbe, (1, 0, 2))              # (B, T, E)
    # fuse Q/K/V weights into one (E, 3E) matmul (wrapper-side, free)
    wqkv = jnp.concatenate([params["wq_t"], params["wk_t"], params["wv_t"]], axis=1)
    bqkv = jnp.concatenate([params["bq"], params["bk"], params["bv"]], axis=1)

    def spec(shape):
        n = len(shape)
        return pl.BlockSpec(shape, lambda i, n=n: (0,) * n)

    y, attn_pad = pl.pallas_call(
        partial(fused_layer_kernel, B=B, T=T, E=E, H=H, D=D),
        grid=(1,),                                   # single step: everything resident
        in_specs=[
            spec((B, T, E)),
            spec((1, E)), spec((1, E)),              # ln1 gamma/beta
            spec((E, 3 * E)), spec((1, 3 * E)),      # fused qkv proj + bias
            spec((1, E)), spec((1, E)),              # bias_k, bias_v
            spec((E, E)), spec((1, E)),              # out proj + bias
            spec((1, E)), spec((1, E)),              # ln2 gamma/beta
            spec((E, F)), spec((1, F)),              # fc1
            spec((F, E)), spec((1, E)),              # fc2
        ],
        out_specs=[
            spec((B, T, E)),
            spec((B, T, S_PAD)),                     # lane-dense attention slab
        ],
        out_shape=[
            jax.ShapeDtypeStruct((B, T, E), jnp.float32),
            jax.ShapeDtypeStruct((B, T, S_PAD), jnp.float32),
        ],
        scratch_shapes=[
            pltpu.VMEM((B * H, T, D), jnp.float32),        # q, heads-as-batch
            pltpu.VMEM((B * H, S_PAD, D), jnp.float32),    # k, padded key axis
            pltpu.VMEM((B * H, S_PAD, D), jnp.float32),    # v, padded key axis
            pltpu.VMEM((B * T, E), jnp.float32),           # merged head outputs
        ],
        compiler_params=pltpu.CompilerParams(dimension_semantics=("arbitrary",)),
    )(x, params["ln1_g"], params["ln1_b"], wqkv, bqkv,
      params["bias_k"], params["bias_v"], params["wo_t"], params["bo"],
      params["ln2_g"], params["ln2_b"],
      params["w1_t"], params["b1"], params["w2_t"], params["b2"])

    attn = attn_pad[:, :, :T + 1]                    # slice back to real T+1 keys
    return jnp.transpose(y, (1, 0, 2)), attn         # (T, B, E), (B, T, T+1)


# ------------------------------ pure-JAX reference ----------------------------

def reference(x_tbe, p, H):
    T, B, E = x_tbe.shape
    D = E // H
    x = jnp.transpose(x_tbe, (1, 0, 2))

    def ln(z, g, b):
        mu = z.mean(-1, keepdims=True)
        var = ((z - mu) ** 2).mean(-1, keepdims=True)
        return (z - mu) / jnp.sqrt(var + EPS) * g + b

    h1 = ln(x, p["ln1_g"], p["ln1_b"])
    q = (h1 @ p["wq_t"] + p["bq"]) * (D ** -0.5)
    k = h1 @ p["wk_t"] + p["bk"]
    v = h1 @ p["wv_t"] + p["bv"]
    k = jnp.concatenate([k, jnp.broadcast_to(p["bias_k"][None], (B, 1, E))], axis=1)
    v = jnp.concatenate([v, jnp.broadcast_to(p["bias_v"][None], (B, 1, E))], axis=1)
    qh = q.reshape(B, T, H, D).transpose(0, 2, 1, 3)
    kh = k.reshape(B, T + 1, H, D).transpose(0, 2, 1, 3)
    vh = v.reshape(B, T + 1, H, D).transpose(0, 2, 1, 3)
    s = jnp.einsum("bhtd,bhsd->bhts", qh, kh)
    pr = jax.nn.softmax(s, axis=-1)
    o = jnp.einsum("bhts,bhsd->bhtd", pr, vh).transpose(0, 2, 1, 3).reshape(B, T, E)
    o = o @ p["wo_t"] + p["bo"]
    x1 = x + o
    attn = pr.mean(axis=1)
    h2 = ln(x1, p["ln2_g"], p["ln2_b"])
    f = jax.nn.gelu(h2 @ p["w1_t"] + p["b1"], approximate=False)
    f = f @ p["w2_t"] + p["b2"]
    return jnp.transpose(x1 + f, (1, 0, 2)), attn


# ----------------------------------- main -------------------------------------

if __name__ == "__main__":
    T, B, E, H, F = 8, 2, 32, 4, 64      # seq, batch, embed, heads, ffn_embed
    key = jax.random.PRNGKey(0)
    ks = jax.random.split(key, 16)

    def w(k, shape, scale=0.02):
        return (scale * jax.random.normal(k, shape)).astype(jnp.float32)

    params = {
        "ln1_g": jnp.ones((1, E), jnp.float32), "ln1_b": jnp.zeros((1, E), jnp.float32),
        "wq_t": w(ks[0], (E, E)), "bq": w(ks[1], (1, E)),
        "wk_t": w(ks[2], (E, E)), "bk": w(ks[3], (1, E)),
        "wv_t": w(ks[4], (E, E)), "bv": w(ks[5], (1, E)),
        "bias_k": w(ks[6], (1, E)), "bias_v": w(ks[7], (1, E)),
        "wo_t": w(ks[8], (E, E)), "bo": w(ks[9], (1, E)),
        "ln2_g": jnp.ones((1, E), jnp.float32), "ln2_b": jnp.zeros((1, E), jnp.float32),
        "w1_t": w(ks[10], (E, F)), "b1": w(ks[11], (1, F)),
        "w2_t": w(ks[12], (F, E)), "b2": w(ks[13], (1, E)),
    }

    x = jax.random.normal(ks[14], (T, B, E), jnp.float32)   # layout: (T, B, E)

    y, attn = jax.jit(partial(transformer_layer_forward, num_heads=H))(x, params)
    y = jax.block_until_ready(y)
    attn = jax.block_until_ready(attn)

    y_ref, attn_ref = reference(x, params, H)
    assert y.shape == (T, B, E) and attn.shape == (B, T, T + 1)
    assert jnp.allclose(y, y_ref, atol=2e-3, rtol=2e-3)
    assert jnp.allclose(attn, attn_ref, atol=2e-3, rtol=2e-3)

    # TODO(synk): attn_mask / key_padding_mask / rotary embeddings are None/False
    # in this config and are not implemented in the kernel.
    print("KERNEL_OK")
</pallas_src>

<mosaic_0001>
module attributes {stable_mosaic.version = 11 : i64} {
  func.func @fused_layer_kernel(%arg0: i32, %arg1: memref<2x8x32xf32, #tpu.memory_space<vmem>>, %arg2: memref<1x32xf32, #tpu.memory_space<vmem>>, %arg3: memref<1x32xf32, #tpu.memory_space<vmem>>, %arg4: memref<32x96xf32, #tpu.memory_space<vmem>>, %arg5: memref<1x96xf32, #tpu.memory_space<vmem>>, %arg6: memref<1x32xf32, #tpu.memory_space<vmem>>, %arg7: memref<1x32xf32, #tpu.memory_space<vmem>>, %arg8: memref<32x32xf32, #tpu.memory_space<vmem>>, %arg9: memref<1x32xf32, #tpu.memory_space<vmem>>, %arg10: memref<1x32xf32, #tpu.memory_space<vmem>>, %arg11: memref<1x32xf32, #tpu.memory_space<vmem>>, %arg12: memref<32x64xf32, #tpu.memory_space<vmem>>, %arg13: memref<1x64xf32, #tpu.memory_space<vmem>>, %arg14: memref<64x32xf32, #tpu.memory_space<vmem>>, %arg15: memref<1x32xf32, #tpu.memory_space<vmem>>, %arg16: memref<2x8x32xf32, #tpu.memory_space<vmem>>, %arg17: memref<2x8x128xf32, #tpu.memory_space<vmem>>, %arg18: memref<8x8x8xf32, #tpu.memory_space<vmem>>, %arg19: memref<8x128x8xf32, #tpu.memory_space<vmem>>, %arg20: memref<8x128x8xf32, #tpu.memory_space<vmem>>, %arg21: memref<16x32xf32, #tpu.memory_space<vmem>>) attributes {dimension_semantics = [#tpu.dimension_semantics<arbitrary>], iteration_bounds = array<i64: 1>, scalar_prefetch = 0 : i64, scratch_operands = 4 : i64, tpu.core_type = #tpu.core_type<tc>, window_params = [{pipeline_mode = #tpu.pipeline_mode<synchronous>, transform_indices = @transform_0, window_bounds = array<i64: 2, 8, 32>}, {pipeline_mode = #tpu.pipeline_mode<synchronous>, transform_indices = @transform_1, window_bounds = array<i64: 1, 32>}, {pipeline_mode = #tpu.pipeline_mode<synchronous>, transform_indices = @transform_2, window_bounds = array<i64: 1, 32>}, {pipeline_mode = #tpu.pipeline_mode<synchronous>, transform_indices = @transform_3, window_bounds = array<i64: 32, 96>}, {pipeline_mode = #tpu.pipeline_mode<synchronous>, transform_indices = @transform_4, window_bounds = array<i64: 1, 96>}, {pipeline_mode = #tpu.pipeline_mode<synchronous>, transform_indices = @transform_5, window_bounds = array<i64: 1, 32>}, {pipeline_mode = #tpu.pipeline_mode<synchronous>, transform_indices = @transform_6, window_bounds = array<i64: 1, 32>}, {pipeline_mode = #tpu.pipeline_mode<synchronous>, transform_indices = @transform_7, window_bounds = array<i64: 32, 32>}, {pipeline_mode = #tpu.pipeline_mode<synchronous>, transform_indices = @transform_8, window_bounds = array<i64: 1, 32>}, {pipeline_mode = #tpu.pipeline_mode<synchronous>, transform_indices = @transform_9, window_bounds = array<i64: 1, 32>}, {pipeline_mode = #tpu.pipeline_mode<synchronous>, transform_indices = @transform_10, window_bounds = array<i64: 1, 32>}, {pipeline_mode = #tpu.pipeline_mode<synchronous>, transform_indices = @transform_11, window_bounds = array<i64: 32, 64>}, {pipeline_mode = #tpu.pipeline_mode<synchronous>, transform_indices = @transform_12, window_bounds = array<i64: 1, 64>}, {pipeline_mode = #tpu.pipeline_mode<synchronous>, transform_indices = @transform_13, window_bounds = array<i64: 64, 32>}, {pipeline_mode = #tpu.pipeline_mode<synchronous>, transform_indices = @transform_14, window_bounds = array<i64: 1, 32>}, {pipeline_mode = #tpu.pipeline_mode<synchronous>, transform_indices = @transform_15, window_bounds = array<i64: 2, 8, 32>}, {pipeline_mode = #tpu.pipeline_mode<synchronous>, transform_indices = @transform_16, window_bounds = array<i64: 2, 8, 128>}]} {
    %c0 = arith.constant 0 : index
    %c0_0 = arith.constant 0 : index
    %c0_1 = arith.constant 0 : index
    %0 = vector.load %arg1[%c0, %c0_0, %c0_1] : memref<2x8x32xf32, #tpu.memory_space<vmem>>, vector<2x8x32xf32>
    %1 = vector.shape_cast %0 : vector<2x8x32xf32> to vector<16x32xf32>
    %c0_2 = arith.constant 0 : index
    %c0_3 = arith.constant 0 : index
    %2 = vector.load %arg2[%c0_2, %c0_3] : memref<1x32xf32, #tpu.memory_space<vmem>>, vector<1x32xf32>
    %c0_4 = arith.constant 0 : index
    %c0_5 = arith.constant 0 : index
    %3 = vector.load %arg3[%c0_4, %c0_5] : memref<1x32xf32, #tpu.memory_space<vmem>>, vector<1x32xf32>
    %cst = arith.constant dense<0.000000e+00> : vector<16xf32>
    %4 = vector.multi_reduction <add>, %1, %cst [1] : vector<16x32xf32> to vector<16xf32>
    %5 = vector.shape_cast %4 : vector<16xf32> to vector<16x1xf32>
    %cst_6 = arith.constant 3.200000e+01 : f32
    %6 = vector.broadcast %cst_6 : f32 to vector<16x1xf32>
    %7 = arith.divf %5, %6 : vector<16x1xf32>
    %8 = vector.broadcast %7 : vector<16x1xf32> to vector<16x32xf32>
    %9 = arith.subf %1, %8 : vector<16x32xf32>
    %10 = arith.mulf %9, %9 : vector<16x32xf32>
    %cst_7 = arith.constant dense<0.000000e+00> : vector<16xf32>
    %11 = vector.multi_reduction <add>, %10, %cst_7 [1] : vector<16x32xf32> to vector<16xf32>
    %12 = vector.shape_cast %11 : vector<16xf32> to vector<16x1xf32>
    %cst_8 = arith.constant 3.200000e+01 : f32
    %13 = vector.broadcast %cst_8 : f32 to vector<16x1xf32>
    %14 = arith.divf %12, %13 : vector<16x1xf32>
    %cst_9 = arith.constant 9.99999974E-6 : f32
    %15 = vector.broadcast %cst_9 : f32 to vector<16x1xf32>
    %16 = arith.addf %14, %15 : vector<16x1xf32>
    %17 = math.rsqrt %16 : vector<16x1xf32>
    %18 = vector.broadcast %17 : vector<16x1xf32> to vector<16x32xf32>
    %19 = arith.mulf %9, %18 : vector<16x32xf32>
    %20 = vector.broadcast %2 : vector<1x32xf32> to vector<16x32xf32>
    %21 = arith.mulf %19, %20 : vector<16x32xf32>
    %22 = vector.broadcast %3 : vector<1x32xf32> to vector<16x32xf32>
    %23 = arith.addf %21, %22 : vector<16x32xf32>
    %c0_10 = arith.constant 0 : index
    %c0_11 = arith.constant 0 : index
    %24 = vector.load %arg4[%c0_10, %c0_11] : memref<32x96xf32, #tpu.memory_space<vmem>>, vector<32x96xf32>
    %cst_12 = arith.constant dense<0.000000e+00> : vector<16x96xf32>
    %25 = tpu.matmul %23, %24, %cst_12 {dimension_numbers = #tpu.dot_dimension_numbers<[1], [0], [0], [1], [0, 0, 1, 1], [], []>} : vector<16x32xf32>, vector<32x96xf32>, vector<16x96xf32> -> vector<16x96xf32>
    %c0_13 = arith.constant 0 : index
    %c0_14 = arith.constant 0 : index
    %26 = vector.load %arg5[%c0_13, %c0_14] : memref<1x96xf32, #tpu.memory_space<vmem>>, vector<1x96xf32>
    %27 = vector.broadcast %26 : vector<1x96xf32> to vector<16x96xf32>
    %28 = arith.addf %25, %27 : vector<16x96xf32>
    %cst_15 = arith.constant 0.000000e+00 : f32
    %29 = vector.broadcast %cst_15 : f32 to vector<8x128x8xf32>
    %c0_16 = arith.constant 0 : index
    %c0_17 = arith.constant 0 : index
    %c0_18 = arith.constant 0 : index
    %30 = vector.load %arg19[%c0_16, %c0_17, %c0_18] : memref<8x128x8xf32, #tpu.memory_space<vmem>>, vector<8x128x8xf32>
    tpu.vector_store %arg19[%c0_16, %c0_17, %c0_18], %29 {strides = array<i32>} : memref<8x128x8xf32, #tpu.memory_space<vmem>>, vector<8x128x8xf32>,
    %cst_19 = arith.constant 0.000000e+00 : f32
    %31 = vector.broadcast %cst_19 : f32 to vector<8x128x8xf32>
    %c0_20 = arith.constant 0 : index
    %c0_21 = arith.constant 0 : index
    %c0_22 = arith.constant 0 : index
    %32 = vector.load %arg20[%c0_20, %c0_21, %c0_22] : memref<8x128x8xf32, #tpu.memory_space<vmem>>, vector<8x128x8xf32>
    tpu.vector_store %arg20[%c0_20, %c0_21, %c0_22], %31 {strides = array<i32>} : memref<8x128x8xf32, #tpu.memory_space<vmem>>, vector<8x128x8xf32>,
    %33 = vector.extract_strided_slice %28 {offsets = [0, 0], sizes = [8, 8], strides = [1, 1]} : vector<16x96xf32> to vector<8x8xf32>
    %cst_23 = arith.constant 0.353553385 : f32
    %34 = vector.broadcast %cst_23 : f32 to vector<8x8xf32>
    %35 = arith.mulf %33, %34 : vector<8x8xf32>
    %c0_24 = arith.constant 0 : index
    %c0_25 = arith.constant 0 : index
    %c0_26 = arith.constant 0 : index
    %36 = vector.load %arg18[%c0_24, %c0_25, %c0_26] : memref<8x8x8xf32, #tpu.memory_space<vmem>>, vector<1x8x8xf32>
    %37 = vector.shape_cast %36 : vector<1x8x8xf32> to vector<8x8xf32>
    %38 = vector.shape_cast %35 : vector<8x8xf32> to vector<1x8x8xf32>
    tpu.vector_store %arg18[%c0_24, %c0_25, %c0_26], %38 {strides = array<i32>} : memref<8x8x8xf32, #tpu.memory_space<vmem>>, vector<1x8x8xf32>,
    %39 = vector.extract_strided_slice %28 {offsets = [0, 32], sizes = [8, 8], strides = [1, 1]} : vector<16x96xf32> to vector<8x8xf32>
    %c0_27 = arith.constant 0 : index
    %c0_28 = arith.constant 0 : index
    %c0_29 = arith.constant 0 : index
    %40 = vector.load %arg19[%c0_27, %c0_28, %c0_29] : memref<8x128x8xf32, #tpu.memory_space<vmem>>, vector<1x8x8xf32>
    %41 = vector.shape_cast %40 : vector<1x8x8xf32> to vector<8x8xf32>
    %42 = vector.shape_cast %39 : vector<8x8xf32> to vector<1x8x8xf32>
    tpu.vector_store %arg19[%c0_27, %c0_28, %c0_29], %42 {strides = array<i32>} : memref<8x128x8xf32, #tpu.memory_space<vmem>>, vector<1x8x8xf32>,
    %43 = vector.extract_strided_slice %28 {offsets = [0, 64], sizes = [8, 8], strides = [1, 1]} : vector<16x96xf32> to vector<8x8xf32>
    %c0_30 = arith.constant 0 : index
    %c0_31 = arith.constant 0 : index
    %c0_32 = arith.constant 0 : index
    %44 = vector.load %arg20[%c0_30, %c0_31, %c0_32] : memref<8x128x8xf32, #tpu.memory_space<vmem>>, vector<1x8x8xf32>
    %45 = vector.shape_cast %44 : vector<1x8x8xf32> to vector<8x8xf32>
    %46 = vector.shape_cast %43 : vector<8x8xf32> to vector<1x8x8xf32>
    tpu.vector_store %arg20[%c0_30, %c0_31, %c0_32], %46 {strides = array<i32>} : memref<8x128x8xf32, #tpu.memory_space<vmem>>, vector<1x8x8xf32>,
    %c0_33 = arith.constant 0 : index
    %c0_34 = arith.constant 0 : index
    %47 = vector.load %arg6[%c0_33, %c0_34] : memref<1x32xf32, #tpu.memory_space<vmem>>, vector<1x8xf32>
    %c0_35 = arith.constant 0 : index
    %c8 = arith.constant 8 : index
    %c0_36 = arith.constant 0 : index
    %48 = vector.load %arg19[%c0_35, %c8, %c0_36] : memref<8x128x8xf32, #tpu.memory_space<vmem>>, vector<1x1x8xf32>
    %49 = vector.shape_cast %48 : vector<1x1x8xf32> to vector<1x8xf32>
    %50 = vector.shape_cast %47 : vector<1x8xf32> to vector<1x1x8xf32>
    tpu.vector_store %arg19[%c0_35, %c8, %c0_36], %50 {strides = array<i32>} : memref<8x128x8xf32, #tpu.memory_space<vmem>>, vector<1x1x8xf32>,
    %c0_37 = arith.constant 0 : index
    %c0_38 = arith.constant 0 : index
    %51 = vector.load %arg7[%c0_37, %c0_38] : memref<1x32xf32, #tpu.memory_space<vmem>>, vector<1x8xf32>
    %c0_39 = arith.constant 0 : index
    %c8_40 = arith.constant 8 : index
    %c0_41 = arith.constant 0 : index
    %52 = vector.load %arg20[%c0_39, %c8_40, %c0_41] : memref<8x128x8xf32, #tpu.memory_space<vmem>>, vector<1x1x8xf32>
    %53 = vector.shape_cast %52 : vector<1x1x8xf32> to vector<1x8xf32>
    %54 = vector.shape_cast %51 : vector<1x8xf32> to vector<1x1x8xf32>
    tpu.vector_store %arg20[%c0_39, %c8_40, %c0_41], %54 {strides = array<i32>} : memref<8x128x8xf32, #tpu.memory_space<vmem>>, vector<1x1x8xf32>,
    %55 = vector.extract_strided_slice %28 {offsets = [0, 8], sizes = [8, 8], strides = [1, 1]} : vector<16x96xf32> to vector<8x8xf32>
    %cst_42 = arith.constant 0.353553385 : f32
    %56 = vector.broadcast %cst_42 : f32 to vector<8x8xf32>
    %57 = arith.mulf %55, %56 : vector<8x8xf32>
    %c1 = arith.constant 1 : index
    %c0_43 = arith.constant 0 : index
    %c0_44 = arith.constant 0 : index
    %58 = vector.load %arg18[%c1, %c0_43, %c0_44] : memref<8x8x8xf32, #tpu.memory_space<vmem>>, vector<1x8x8xf32>
    %59 = vector.shape_cast %58 : vector<1x8x8xf32> to vector<8x8xf32>
    %60 = vector.shape_cast %57 : vector<8x8xf32> to vector<1x8x8xf32>
    tpu.vector_store %arg18[%c1, %c0_43, %c0_44], %60 {strides = array<i32>} : memref<8x8x8xf32, #tpu.memory_space<vmem>>, vector<1x8x8xf32>,
    %61 = vector.extract_strided_slice %28 {offsets = [0, 40], sizes = [8, 8], strides = [1, 1]} : vector<16x96xf32> to vector<8x8xf32>
    %c1_45 = arith.constant 1 : index
    %c0_46 = arith.constant 0 : index
    %c0_47 = arith.constant 0 : index
    %62 = vector.load %arg19[%c1_45, %c0_46, %c0_47] : memref<8x128x8xf32, #tpu.memory_space<vmem>>, vector<1x8x8xf32>
    %63 = vector.shape_cast %62 : vector<1x8x8xf32> to vector<8x8xf32>
    %64 = vector.shape_cast %61 : vector<8x8xf32> to vector<1x8x8xf32>
    tpu.vector_store %arg19[%c1_45, %c0_46, %c0_47], %64 {strides = array<i32>} : memref<8x128x8xf32, #tpu.memory_space<vmem>>, vector<1x8x8xf32>,
    %65 = vector.extract_strided_slice %28 {offsets = [0, 72], sizes = [8, 8], strides = [1, 1]} : vector<16x96xf32> to vector<8x8xf32>
    %c1_48 = arith.constant 1 : index
    %c0_49 = arith.constant 0 : index
    %c0_50 = arith.constant 0 : index
    %66 = vector.load %arg20[%c1_48, %c0_49, %c0_50] : memref<8x128x8xf32, #tpu.memory_space<vmem>>, vector<1x8x8xf32>
    %67 = vector.shape_cast %66 : vector<1x8x8xf32> to vector<8x8xf32>
    %68 = vector.shape_cast %65 : vector<8x8xf32> to vector<1x8x8xf32>
    tpu.vector_store %arg20[%c1_48, %c0_49, %c0_50], %68 {strides = array<i32>} : memref<8x128x8xf32, #tpu.memory_space<vmem>>, vector<1x8x8xf32>,
    %c0_51 = arith.constant 0 : index
    %c8_52 = arith.constant 8 : index
    %69 = vector.load %arg6[%c0_51, %c8_52] : memref<1x32xf32, #tpu.memory_space<vmem>>, vector<1x8xf32>
    %c1_53 = arith.constant 1 : index
    %c8_54 = arith.constant 8 : index
    %c0_55 = arith.constant 0 : index
    %70 = vector.load %arg19[%c1_53, %c8_54, %c0_55] : memref<8x128x8xf32, #tpu.memory_space<vmem>>, vector<1x1x8xf32>
    %71 = vector.shape_cast %70 : vector<1x1x8xf32> to vector<1x8xf32>
    %72 = vector.shape_cast %69 : vector<1x8xf32> to vector<1x1x8xf32>
    tpu.vector_store %arg19[%c1_53, %c8_54, %c0_55], %72 {strides = array<i32>} : memref<8x128x8xf32, #tpu.memory_space<vmem>>, vector<1x1x8xf32>,
    %c0_56 = arith.constant 0 : index
    %c8_57 = arith.constant 8 : index
    %73 = vector.load %arg7[%c0_56, %c8_57] : memref<1x32xf32, #tpu.memory_space<vmem>>, vector<1x8xf32>
    %c1_58 = arith.constant 1 : index
    %c8_59 = arith.constant 8 : index
    %c0_60 = arith.constant 0 : index
    %74 = vector.load %arg20[%c1_58, %c8_59, %c0_60] : memref<8x128x8xf32, #tpu.memory_space<vmem>>, vector<1x1x8xf32>
    %75 = vector.shape_cast %74 : vector<1x1x8xf32> to vector<1x8xf32>
    %76 = vector.shape_cast %73 : vector<1x8xf32> to vector<1x1x8xf32>
    tpu.vector_store %arg20[%c1_58, %c8_59, %c0_60], %76 {strides = array<i32>} : memref<8x128x8xf32, #tpu.memory_space<vmem>>, vector<1x1x8xf32>,
    %77 = vector.extract_strided_slice %28 {offsets = [0, 16], sizes = [8, 8], strides = [1, 1]} : vector<16x96xf32> to vector<8x8xf32>
    %cst_61 = arith.constant 0.353553385 : f32
    %78 = vector.broadcast %cst_61 : f32 to vector<8x8xf32>
    %79 = arith.mulf %77, %78 : vector<8x8xf32>
    %c2 = arith.constant 2 : index
    %c0_62 = arith.constant 0 : index
    %c0_63 = arith.constant 0 : index
    %80 = vector.load %arg18[%c2, %c0_62, %c0_63] : memref<8x8x8xf32, #tpu.memory_space<vmem>>, vector<1x8x8xf32>
    %81 = vector.shape_cast %80 : vector<1x8x8xf32> to vector<8x8xf32>
    %82 = vector.shape_cast %79 : vector<8x8xf32> to vector<1x8x8xf32>
    tpu.vector_store %arg18[%c2, %c0_62, %c0_63], %82 {strides = array<i32>} : memref<8x8x8xf32, #tpu.memory_space<vmem>>, vector<1x8x8xf32>,
    %83 = vector.extract_strided_slice %28 {offsets = [0, 48], sizes = [8, 8], strides = [1, 1]} : vector<16x96xf32> to vector<8x8xf32>
    %c2_64 = arith.constant 2 : index
    %c0_65 = arith.constant 0 : index
    %c0_66 = arith.constant 0 : index
    %84 = vector.load %arg19[%c2_64, %c0_65, %c0_66] : memref<8x128x8xf32, #tpu.memory_space<vmem>>, vector<1x8x8xf32>
    %85 = vector.shape_cast %84 : vector<1x8x8xf32> to vector<8x8xf32>
    %86 = vector.shape_cast %83 : vector<8x8xf32> to vector<1x8x8xf32>
    tpu.vector_store %arg19[%c2_64, %c0_65, %c0_66], %86 {strides = array<i32>} : memref<8x128x8xf32, #tpu.memory_space<vmem>>, vector<1x8x8xf32>,
    %87 = vector.extract_strided_slice %28 {offsets = [0, 80], sizes = [8, 8], strides = [1, 1]} : vector<16x96xf32> to vector<8x8xf32>
    %c2_67 = arith.constant 2 : index
    %c0_68 = arith.constant 0 : index
    %c0_69 = arith.constant 0 : index
    %88 = vector.load %arg20[%c2_67, %c0_68, %c0_69] : memref<8x128x8xf32, #tpu.memory_space<vmem>>, vector<1x8x8xf32>
    %89 = vector.shape_cast %88 : vector<1x8x8xf32> to vector<8x8xf32>
    %90 = vector.shape_cast %87 : vector<8x8xf32> to vector<1x8x8xf32>
    tpu.vector_store %arg20[%c2_67, %c0_68, %c0_69], %90 {strides = array<i32>} : memref<8x128x8xf32, #tpu.memory_space<vmem>>, vector<1x8x8xf32>,
    %c0_70 = arith.constant 0 : index
    %c16 = arith.constant 16 : index
    %91 = vector.load %arg6[%c0_70, %c16] : memref<1x32xf32, #tpu.memory_space<vmem>>, vector<1x8xf32>
    %c2_71 = arith.constant 2 : index
    %c8_72 = arith.constant 8 : index
    %c0_73 = arith.constant 0 : index
    %92 = vector.load %arg19[%c2_71, %c8_72, %c0_73] : memref<8x128x8xf32, #tpu.memory_space<vmem>>, vector<1x1x8xf32>
    %93 = vector.shape_cast %92 : vector<1x1x8xf32> to vector<1x8xf32>
    %94 = vector.shape_cast %91 : vector<1x8xf32> to vector<1x1x8xf32>
    tpu.vector_store %arg19[%c2_71, %c8_72, %c0_73], %94 {strides = array<i32>} : memref<8x128x8xf32, #tpu.memory_space<vmem>>, vector<1x1x8xf32>,
    %c0_74 = arith.constant 0 : index
    %c16_75 = arith.constant 16 : index
    %95 = vector.load %arg7[%c0_74, %c16_75] : memref<1x32xf32, #tpu.memory_space<vmem>>, vector<1x8xf32>
    %c2_76 = arith.constant 2 : index
    %c8_77 = arith.constant 8 : index
    %c0_78 = arith.constant 0 : index
    %96 = vector.load %arg20[%c2_76, %c8_77, %c0_78] : memref<8x128x8xf32, #tpu.memory_space<vmem>>, vector<1x1x8xf32>
    %97 = vector.shape_cast %96 : vector<1x1x8xf32> to vector<1x8xf32>
    %98 = vector.shape_cast %95 : vector<1x8xf32> to vector<1x1x8xf32>
    tpu.vector_store %arg20[%c2_76, %c8_77, %c0_78], %98 {strides = array<i32>} : memref<8x128x8xf32, #tpu.memory_space<vmem>>, vector<1x1x8xf32>,
    %99 = vector.extract_strided_slice %28 {offsets = [0, 24], sizes = [8, 8], strides = [1, 1]} : vector<16x96xf32> to vector<8x8xf32>
    %cst_79 = arith.constant 0.353553385 : f32
    %100 = vector.broadcast %cst_79 : f32 to vector<8x8xf32>
    %101 = arith.mulf %99, %100 : vector<8x8xf32>
    %c3 = arith.constant 3 : index
    %c0_80 = arith.constant 0 : index
    %c0_81 = arith.constant 0 : index
    %102 = vector.load %arg18[%c3, %c0_80, %c0_81] : memref<8x8x8xf32, #tpu.memory_space<vmem>>, vector<1x8x8xf32>
    %103 = vector.shape_cast %102 : vector<1x8x8xf32> to vector<8x8xf32>
    %104 = vector.shape_cast %101 : vector<8x8xf32> to vector<1x8x8xf32>
    tpu.vector_store %arg18[%c3, %c0_80, %c0_81], %104 {strides = array<i32>} : memref<8x8x8xf32, #tpu.memory_space<vmem>>, vector<1x8x8xf32>,
    %105 = vector.extract_strided_slice %28 {offsets = [0, 56], sizes = [8, 8], strides = [1, 1]} : vector<16x96xf32> to vector<8x8xf32>
    %c3_82 = arith.constant 3 : index
    %c0_83 = arith.constant 0 : index
    %c0_84 = arith.constant 0 : index
    %106 = vector.load %arg19[%c3_82, %c0_83, %c0_84] : memref<8x128x8xf32, #tpu.memory_space<vmem>>, vector<1x8x8xf32>
    %107 = vector.shape_cast %106 : vector<1x8x8xf32> to vector<8x8xf32>
    %108 = vector.shape_cast %105 : vector<8x8xf32> to vector<1x8x8xf32>
    tpu.vector_store %arg19[%c3_82, %c0_83, %c0_84], %108 {strides = array<i32>} : memref<8x128x8xf32, #tpu.memory_space<vmem>>, vector<1x8x8xf32>,
    %109 = vector.extract_strided_slice %28 {offsets = [0, 88], sizes = [8, 8], strides = [1, 1]} : vector<16x96xf32> to vector<8x8xf32>
    %c3_85 = arith.constant 3 : index
    %c0_86 = arith.constant 0 : index
    %c0_87 = arith.constant 0 : index
    %110 = vector.load %arg20[%c3_85, %c0_86, %c0_87] : memref<8x128x8xf32, #tpu.memory_space<vmem>>, vector<1x8x8xf32>
    %111 = vector.shape_cast %110 : vector<1x8x8xf32> to vector<8x8xf32>
    %112 = vector.shape_cast %109 : vector<8x8xf32> to vector<1x8x8xf32>
    tpu.vector_store %arg20[%c3_85, %c0_86, %c0_87], %112 {strides = array<i32>} : memref<8x128x8xf32, #tpu.memory_space<vmem>>, vector<1x8x8xf32>,
    %c0_88 = arith.constant 0 : index
    %c24 = arith.constant 24 : index
    %113 = vector.load %arg6[%c0_88, %c24] : memref<1x32xf32, #tpu.memory_space<vmem>>, vector<1x8xf32>
    %c3_89 = arith.constant 3 : index
    %c8_90 = arith.constant 8 : index
    %c0_91 = arith.constant 0 : index
    %114 = vector.load %arg19[%c3_89, %c8_90, %c0_91] : memref<8x128x8xf32, #tpu.memory_space<vmem>>, vector<1x1x8xf32>
    %115 = vector.shape_cast %114 : vector<1x1x8xf32> to vector<1x8xf32>
    %116 = vector.shape_cast %113 : vector<1x8xf32> to vector<1x1x8xf32>
    tpu.vector_store %arg19[%c3_89, %c8_90, %c0_91], %116 {strides = array<i32>} : memref<8x128x8xf32, #tpu.memory_space<vmem>>, vector<1x1x8xf32>,
    %c0_92 = arith.constant 0 : index
    %c24_93 = arith.constant 24 : index
    %117 = vector.load %arg7[%c0_92, %c24_93] : memref<1x32xf32, #tpu.memory_space<vmem>>, vector<1x8xf32>
    %c3_94 = arith.constant 3 : index
    %c8_95 = arith.constant 8 : index
    %c0_96 = arith.constant 0 : index
    %118 = vector.load %arg20[%c3_94, %c8_95, %c0_96] : memref<8x128x8xf32, #tpu.memory_space<vmem>>, vector<1x1x8xf32>
    %119 = vector.shape_cast %118 : vector<1x1x8xf32> to vector<1x8xf32>
    %120 = vector.shape_cast %117 : vector<1x8xf32> to vector<1x1x8xf32>
    tpu.vector_store %arg20[%c3_94, %c8_95, %c0_96], %120 {strides = array<i32>} : memref<8x128x8xf32, #tpu.memory_space<vmem>>, vector<1x1x8xf32>,
    %121 = vector.extract_strided_slice %28 {offsets = [8, 0], sizes = [8, 8], strides = [1, 1]} : vector<16x96xf32> to vector<8x8xf32>
    %cst_97 = arith.constant 0.353553385 : f32
    %122 = vector.broadcast %cst_97 : f32 to vector<8x8xf32>
    %123 = arith.mulf %121, %122 : vector<8x8xf32>
    %c4 = arith.constant 4 : index
    %c0_98 = arith.constant 0 : index
    %c0_99 = arith.constant 0 : index
    %124 = vector.load %arg18[%c4, %c0_98, %c0_99] : memref<8x8x8xf32, #tpu.memory_space<vmem>>, vector<1x8x8xf32>
    %125 = vector.shape_cast %124 : vector<1x8x8xf32> to vector<8x8xf32>
    %126 = vector.shape_cast %123 : vector<8x8xf32> to vector<1x8x8xf32>
    tpu.vector_store %arg18[%c4, %c0_98, %c0_99], %126 {strides = array<i32>} : memref<8x8x8xf32, #tpu.memory_space<vmem>>, vector<1x8x8xf32>,
    %127 = vector.extract_strided_slice %28 {offsets = [8, 32], sizes = [8, 8], strides = [1, 1]} : vector<16x96xf32> to vector<8x8xf32>
    %c4_100 = arith.constant 4 : index
    %c0_101 = arith.constant 0 : index
    %c0_102 = arith.constant 0 : index
    %128 = vector.load %arg19[%c4_100, %c0_101, %c0_102] : memref<8x128x8xf32, #tpu.memory_space<vmem>>, vector<1x8x8xf32>
    %129 = vector.shape_cast %128 : vector<1x8x8xf32> to vector<8x8xf32>
    %130 = vector.shape_cast %127 : vector<8x8xf32> to vector<1x8x8xf32>
    tpu.vector_store %arg19[%c4_100, %c0_101, %c0_102], %130 {strides = array<i32>} : memref<8x128x8xf32, #tpu.memory_space<vmem>>, vector<1x8x8xf32>,
    %131 = vector.extract_strided_slice %28 {offsets = [8, 64], sizes = [8, 8], strides = [1, 1]} : vector<16x96xf32> to vector<8x8xf32>
    %c4_103 = arith.constant 4 : index
    %c0_104 = arith.constant 0 : index
    %c0_105 = arith.constant 0 : index
    %132 = vector.load %arg20[%c4_103, %c0_104, %c0_105] : memref<8x128x8xf32, #tpu.memory_space<vmem>>, vector<1x8x8xf32>
    %133 = vector.shape_cast %132 : vector<1x8x8xf32> to vector<8x8xf32>
    %134 = vector.shape_cast %131 : vector<8x8xf32> to vector<1x8x8xf32>
    tpu.vector_store %arg20[%c4_103, %c0_104, %c0_105], %134 {strides = array<i32>} : memref<8x128x8xf32, #tpu.memory_space<vmem>>, vector<1x8x8xf32>,
    %c0_106 = arith.constant 0 : index
    %c0_107 = arith.constant 0 : index
    %135 = vector.load %arg6[%c0_106, %c0_107] : memref<1x32xf32, #tpu.memory_space<vmem>>, vector<1x8xf32>
    %c4_108 = arith.constant 4 : index
    %c8_109 = arith.constant 8 : index
    %c0_110 = arith.constant 0 : index
    %136 = vector.load %arg19[%c4_108, %c8_109, %c0_110] : memref<8x128x8xf32, #tpu.memory_space<vmem>>, vector<1x1x8xf32>
    %137 = vector.shape_cast %136 : vector<1x1x8xf32> to vector<1x8xf32>
    %138 = vector.shape_cast %135 : vector<1x8xf32> to vector<1x1x8xf32>
    tpu.vector_store %arg19[%c4_108, %c8_109, %c0_110], %138 {strides = array<i32>} : memref<8x128x8xf32, #tpu.memory_space<vmem>>, vector<1x1x8xf32>,
    %c0_111 = arith.constant 0 : index
    %c0_112 = arith.constant 0 : index
    %139 = vector.load %arg7[%c0_111, %c0_112] : memref<1x32xf32, #tpu.memory_space<vmem>>, vector<1x8xf32>
    %c4_113 = arith.constant 4 : index
    %c8_114 = arith.constant 8 : index
    %c0_115 = arith.constant 0 : index
    %140 = vector.load %arg20[%c4_113, %c8_114, %c0_115] : memref<8x128x8xf32, #tpu.memory_space<vmem>>, vector<1x1x8xf32>
    %141 = vector.shape_cast %140 : vector<1x1x8xf32> to vector<1x8xf32>
    %142 = vector.shape_cast %139 : vector<1x8xf32> to vector<1x1x8xf32>
    tpu.vector_store %arg20[%c4_113, %c8_114, %c0_115], %142 {strides = array<i32>} : memref<8x128x8xf32, #tpu.memory_space<vmem>>, vector<1x1x8xf32>,
    %143 = vector.extract_strided_slice %28 {offsets = [8, 8], sizes = [8, 8], strides = [1, 1]} : vector<16x96xf32> to vector<8x8xf32>
    %cst_116 = arith.constant 0.353553385 : f32
    %144 = vector.broadcast %cst_116 : f32 to vector<8x8xf32>
    %145 = arith.mulf %143, %144 : vector<8x8xf32>
    %c5 = arith.constant 5 : index
    %c0_117 = arith.constant 0 : index
    %c0_118 = arith.constant 0 : index
    %146 = vector.load %arg18[%c5, %c0_117, %c0_118] : memref<8x8x8xf32, #tpu.memory_space<vmem>>, vector<1x8x8xf32>
    %147 = vector.shape_cast %146 : vector<1x8x8xf32> to vector<8x8xf32>
    %148 = vector.shape_cast %145 : vector<8x8xf32> to vector<1x8x8xf32>
    tpu.vector_store %arg18[%c5, %c0_117, %c0_118], %148 {strides = array<i32>} : memref<8x8x8xf32, #tpu.memory_space<vmem>>, vector<1x8x8xf32>,
    %149 = vector.extract_strided_slice %28 {offsets = [8, 40], sizes = [8, 8], strides = [1, 1]} : vector<16x96xf32> to vector<8x8xf32>
    %c5_119 = arith.constant 5 : index
    %c0_120 = arith.constant 0 : index
    %c0_121 = arith.constant 0 : index
    %150 = vector.load %arg19[%c5_119, %c0_120, %c0_121] : memref<8x128x8xf32, #tpu.memory_space<vmem>>, vector<1x8x8xf32>
    %151 = vector.shape_cast %150 : vector<1x8x8xf32> to vector<8x8xf32>
    %152 = vector.shape_cast %149 : vector<8x8xf32> to vector<1x8x8xf32>
    tpu.vector_store %arg19[%c5_119, %c0_120, %c0_121], %152 {strides = array<i32>} : memref<8x128x8xf32, #tpu.memory_space<vmem>>, vector<1x8x8xf32>,
    %153 = vector.extract_strided_slice %28 {offsets = [8, 72], sizes = [8, 8], strides = [1, 1]} : vector<16x96xf32> to vector<8x8xf32>
    %c5_122 = arith.constant 5 : index
    %c0_123 = arith.constant 0 : index
    %c0_124 = arith.constant 0 : index
    %154 = vector.load %arg20[%c5_122, %c0_123, %c0_124] : memref<8x128x8xf32, #tpu.memory_space<vmem>>, vector<1x8x8xf32>
    %155 = vector.shape_cast %154 : vector<1x8x8xf32> to vector<8x8xf32>
    %156 = vector.shape_cast %153 : vector<8x8xf32> to vector<1x8x8xf32>
    tpu.vector_store %arg20[%c5_122, %c0_123, %c0_124], %156 {strides = array<i32>} : memref<8x128x8xf32, #tpu.memory_space<vmem>>, vector<1x8x8xf32>,
    %c0_125 = arith.constant 0 : index
    %c8_126 = arith.constant 8 : index
    %157 = vector.load %arg6[%c0_125, %c8_126] : memref<1x32xf32, #tpu.memory_space<vmem>>, vector<1x8xf32>
    %c5_127 = arith.constant 5 : index
    %c8_128 = arith.constant 8 : index
    %c0_129 = arith.constant 0 : index
    %158 = vector.load %arg19[%c5_127, %c8_128, %c0_129] : memref<8x128x8xf32, #tpu.memory_space<vmem>>, vector<1x1x8xf32>
    %159 = vector.shape_cast %158 : vector<1x1x8xf32> to vector<1x8xf32>
    %160 = vector.shape_cast %157 : vector<1x8xf32> to vector<1x1x8xf32>
    tpu.vector_store %arg19[%c5_127, %c8_128, %c0_129], %160 {strides = array<i32>} : memref<8x128x8xf32, #tpu.memory_space<vmem>>, vector<1x1x8xf32>,
    %c0_130 = arith.constant 0 : index
    %c8_131 = arith.constant 8 : index
    %161 = vector.load %arg7[%c0_130, %c8_131] : memref<1x32xf32, #tpu.memory_space<vmem>>, vector<1x8xf32>
    %c5_132 = arith.constant 5 : index
    %c8_133 = arith.constant 8 : index
    %c0_134 = arith.constant 0 : index
    %162 = vector.load %arg20[%c5_132, %c8_133, %c0_134] : memref<8x128x8xf32, #tpu.memory_space<vmem>>, vector<1x1x8xf32>
    %163 = vector.shape_cast %162 : vector<1x1x8xf32> to vector<1x8xf32>
    %164 = vector.shape_cast %161 : vector<1x8xf32> to vector<1x1x8xf32>
    tpu.vector_store %arg20[%c5_132, %c8_133, %c0_134], %164 {strides = array<i32>} : memref<8x128x8xf32, #tpu.memory_space<vmem>>, vector<1x1x8xf32>,
    %165 = vector.extract_strided_slice %28 {offsets = [8, 16], sizes = [8, 8], strides = [1, 1]} : vector<16x96xf32> to vector<8x8xf32>
    %cst_135 = arith.constant 0.353553385 : f32
    %166 = vector.broadcast %cst_135 : f32 to vector<8x8xf32>
    %167 = arith.mulf %165, %166 : vector<8x8xf32>
    %c6 = arith.constant 6 : index
    %c0_136 = arith.constant 0 : index
    %c0_137 = arith.constant 0 : index
    %168 = vector.load %arg18[%c6, %c0_136, %c0_137] : memref<8x8x8xf32, #tpu.memory_space<vmem>>, vector<1x8x8xf32>
    %169 = vector.shape_cast %168 : vector<1x8x8xf32> to vector<8x8xf32>
    %170 = vector.shape_cast %167 : vector<8x8xf32> to vector<1x8x8xf32>
    tpu.vector_store %arg18[%c6, %c0_136, %c0_137], %170 {strides = array<i32>} : memref<8x8x8xf32, #tpu.memory_space<vmem>>, vector<1x8x8xf32>,
    %171 = vector.extract_strided_slice %28 {offsets = [8, 48], sizes = [8, 8], strides = [1, 1]} : vector<16x96xf32> to vector<8x8xf32>
    %c6_138 = arith.constant 6 : index
    %c0_139 = arith.constant 0 : index
    %c0_140 = arith.constant 0 : index
    %172 = vector.load %arg19[%c6_138, %c0_139, %c0_140] : memref<8x128x8xf32, #tpu.memory_space<vmem>>, vector<1x8x8xf32>
    %173 = vector.shape_cast %172 : vector<1x8x8xf32> to vector<8x8xf32>
    %174 = vector.shape_cast %171 : vector<8x8xf32> to vector<1x8x8xf32>
    tpu.vector_store %arg19[%c6_138, %c0_139, %c0_140], %174 {strides = array<i32>} : memref<8x128x8xf32, #tpu.memory_space<vmem>>, vector<1x8x8xf32>,
    %175 = vector.extract_strided_slice %28 {offsets = [8, 80], sizes = [8, 8], strides = [1, 1]} : vector<16x96xf32> to vector<8x8xf32>
    %c6_141 = arith.constant 6 : index
    %c0_142 = arith.constant 0 : index
    %c0_143 = arith.constant 0 : index
    %176 = vector.load %arg20[%c6_141, %c0_142, %c0_143] : memref<8x128x8xf32, #tpu.memory_space<vmem>>, vector<1x8x8xf32>
    %177 = vector.shape_cast %176 : vector<1x8x8xf32> to vector<8x8xf32>
    %178 = vector.shape_cast %175 : vector<8x8xf32> to vector<1x8x8xf32>
    tpu.vector_store %arg20[%c6_141, %c0_142, %c0_143], %178 {strides = array<i32>} : memref<8x128x8xf32, #tpu.memory_space<vmem>>, vector<1x8x8xf32>,
    %c0_144 = arith.constant 0 : index
    %c16_145 = arith.constant 16 : index
    %179 = vector.load %arg6[%c0_144, %c16_145] : memref<1x32xf32, #tpu.memory_space<vmem>>, vector<1x8xf32>
    %c6_146 = arith.constant 6 : index
    %c8_147 = arith.constant 8 : index
    %c0_148 = arith.constant 0 : index
    %180 = vector.load %arg19[%c6_146, %c8_147, %c0_148] : memref<8x128x8xf32, #tpu.memory_space<vmem>>, vector<1x1x8xf32>
    %181 = vector.shape_cast %180 : vector<1x1x8xf32> to vector<1x8xf32>
    %182 = vector.shape_cast %179 : vector<1x8xf32> to vector<1x1x8xf32>
    tpu.vector_store %arg19[%c6_146, %c8_147, %c0_148], %182 {strides = array<i32>} : memref<8x128x8xf32, #tpu.memory_space<vmem>>, vector<1x1x8xf32>,
    %c0_149 = arith.constant 0 : index
    %c16_150 = arith.constant 16 : index
    %183 = vector.load %arg7[%c0_149, %c16_150] : memref<1x32xf32, #tpu.memory_space<vmem>>, vector<1x8xf32>
    %c6_151 = arith.constant 6 : index
    %c8_152 = arith.constant 8 : index
    %c0_153 = arith.constant 0 : index
    %184 = vector.load %arg20[%c6_151, %c8_152, %c0_153] : memref<8x128x8xf32, #tpu.memory_space<vmem>>, vector<1x1x8xf32>
    %185 = vector.shape_cast %184 : vector<1x1x8xf32> to vector<1x8xf32>
    %186 = vector.shape_cast %183 : vector<1x8xf32> to vector<1x1x8xf32>
    tpu.vector_store %arg20[%c6_151, %c8_152, %c0_153], %186 {strides = array<i32>} : memref<8x128x8xf32, #tpu.memory_space<vmem>>, vector<1x1x8xf32>,
    %187 = vector.extract_strided_slice %28 {offsets = [8, 24], sizes = [8, 8], strides = [1, 1]} : vector<16x96xf32> to vector<8x8xf32>
    %cst_154 = arith.constant 0.353553385 : f32
    %188 = vector.broadcast %cst_154 : f32 to vector<8x8xf32>
    %189 = arith.mulf %187, %188 : vector<8x8xf32>
    %c7 = arith.constant 7 : index
    %c0_155 = arith.constant 0 : index
    %c0_156 = arith.constant 0 : index
    %190 = vector.load %arg18[%c7, %c0_155, %c0_156] : memref<8x8x8xf32, #tpu.memory_space<vmem>>, vector<1x8x8xf32>
    %191 = vector.shape_cast %190 : vector<1x8x8xf32> to vector<8x8xf32>
    %192 = vector.shape_cast %189 : vector<8x8xf32> to vector<1x8x8xf32>
    tpu.vector_store %arg18[%c7, %c0_155, %c0_156], %192 {strides = array<i32>} : memref<8x8x8xf32, #tpu.memory_space<vmem>>, vector<1x8x8xf32>,
    %193 = vector.extract_strided_slice %28 {offsets = [8, 56], sizes = [8, 8], strides = [1, 1]} : vector<16x96xf32> to vector<8x8xf32>
    %c7_157 = arith.constant 7 : index
    %c0_158 = arith.constant 0 : index
    %c0_159 = arith.constant 0 : index
    %194 = vector.load %arg19[%c7_157, %c0_158, %c0_159] : memref<8x128x8xf32, #tpu.memory_space<vmem>>, vector<1x8x8xf32>
    %195 = vector.shape_cast %194 : vector<1x8x8xf32> to vector<8x8xf32>
    %196 = vector.shape_cast %193 : vector<8x8xf32> to vector<1x8x8xf32>
    tpu.vector_store %arg19[%c7_157, %c0_158, %c0_159], %196 {strides = array<i32>} : memref<8x128x8xf32, #tpu.memory_space<vmem>>, vector<1x8x8xf32>,
    %197 = vector.extract_strided_slice %28 {offsets = [8, 88], sizes = [8, 8], strides = [1, 1]} : vector<16x96xf32> to vector<8x8xf32>
    %c7_160 = arith.constant 7 : index
    %c0_161 = arith.constant 0 : index
    %c0_162 = arith.constant 0 : index
    %198 = vector.load %arg20[%c7_160, %c0_161, %c0_162] : memref<8x128x8xf32, #tpu.memory_space<vmem>>, vector<1x8x8xf32>
    %199 = vector.shape_cast %198 : vector<1x8x8xf32> to vector<8x8xf32>
    %200 = vector.shape_cast %197 : vector<8x8xf32> to vector<1x8x8xf32>
    tpu.vector_store %arg20[%c7_160, %c0_161, %c0_162], %200 {strides = array<i32>} : memref<8x128x8xf32, #tpu.memory_space<vmem>>, vector<1x8x8xf32>,
    %c0_163 = arith.constant 0 : index
    %c24_164 = arith.constant 24 : index
    %201 = vector.load %arg6[%c0_163, %c24_164] : memref<1x32xf32, #tpu.memory_space<vmem>>, vector<1x8xf32>
    %c7_165 = arith.constant 7 : index
    %c8_166 = arith.constant 8 : index
    %c0_167 = arith.constant 0 : index
    %202 = vector.load %arg19[%c7_165, %c8_166, %c0_167] : memref<8x128x8xf32, #tpu.memory_space<vmem>>, vector<1x1x8xf32>
    %203 = vector.shape_cast %202 : vector<1x1x8xf32> to vector<1x8xf32>
    %204 = vector.shape_cast %201 : vector<1x8xf32> to vector<1x1x8xf32>
    tpu.vector_store %arg19[%c7_165, %c8_166, %c0_167], %204 {strides = array<i32>} : memref<8x128x8xf32, #tpu.memory_space<vmem>>, vector<1x1x8xf32>,
    %c0_168 = arith.constant 0 : index
    %c24_169 = arith.constant 24 : index
    %205 = vector.load %arg7[%c0_168, %c24_169] : memref<1x32xf32, #tpu.memory_space<vmem>>, vector<1x8xf32>
    %c7_170 = arith.constant 7 : index
    %c8_171 = arith.constant 8 : index
    %c0_172 = arith.constant 0 : index
    %206 = vector.load %arg20[%c7_170, %c8_171, %c0_172] : memref<8x128x8xf32, #tpu.memory_space<vmem>>, vector<1x1x8xf32>
    %207 = vector.shape_cast %206 : vector<1x1x8xf32> to vector<1x8xf32>
    %208 = vector.shape_cast %205 : vector<1x8xf32> to vector<1x1x8xf32>
    tpu.vector_store %arg20[%c7_170, %c8_171, %c0_172], %208 {strides = array<i32>} : memref<8x128x8xf32, #tpu.memory_space<vmem>>, vector<1x1x8xf32>,
    %c0_173 = arith.constant 0 : index
    %c0_174 = arith.constant 0 : index
    %c0_175 = arith.constant 0 : index
    %209 = vector.load %arg18[%c0_173, %c0_174, %c0_175] : memref<8x8x8xf32, #tpu.memory_space<vmem>>, vector<8x8x8xf32>
    %c0_176 = arith.constant 0 : index
    %c0_177 = arith.constant 0 : index
    %c0_178 = arith.constant 0 : index
    %210 = vector.load %arg19[%c0_176, %c0_177, %c0_178] : memref<8x128x8xf32, #tpu.memory_space<vmem>>, vector<8x128x8xf32>
    "tpu.trace_start"() <{level = 10 : i32, message = "btd,bsd->bts"}> : () -> ()
    %cst_179 = arith.constant dense<0.000000e+00> : vector<8x8x128xf32>
    %211 = tpu.matmul %209, %210, %cst_179 {dimension_numbers = #tpu.dot_dimension_numbers<[2], [2], [1], [1], [0, 0, 0, 1, 1, 1], [0], [0]>} : vector<8x8x8xf32>, vector<8x128x8xf32>, vector<8x8x128xf32> -> vector<8x8x128xf32>
    "tpu.trace_stop"() : () -> ()
    %212 = tpu.iota {dimensions = array<i32: 2>} : vector<8x8x128xi32>
    %c9_i32 = arith.constant 9 : i32
    %213 = vector.broadcast %c9_i32 : i32 to vector<8x8x128xi32>
    %214 = arith.cmpi slt, %212, %213 : vector<8x8x128xi32>
    %cst_180 = arith.constant -1.000000e+30 : f32
    %215 = vector.broadcast %cst_180 : f32 to vector<8x8x128xf32>
    %216 = arith.select %214, %211, %215 : vector<8x8x128xi1>, vector<8x8x128xf32>
    %cst_181 = arith.constant dense<0xFF800000> : vector<8x8xf32>
    %217 = vector.multi_reduction <maximumf>, %216, %cst_181 [2] : vector<8x8x128xf32> to vector<8x8xf32>
    %218 = vector.shape_cast %217 : vector<8x8xf32> to vector<8x8x1xf32>
    %219 = vector.broadcast %218 : vector<8x8x1xf32> to vector<8x8x128xf32>
    %220 = arith.subf %216, %219 : vector<8x8x128xf32>
    %221 = math.exp %220 : vector<8x8x128xf32>
    %cst_182 = arith.constant dense<0.000000e+00> : vector<8x8xf32>
    %222 = vector.multi_reduction <add>, %221, %cst_182 [2] : vector<8x8x128xf32> to vector<8x8xf32>
    %223 = vector.shape_cast %222 : vector<8x8xf32> to vector<8x8x1xf32>
    %224 = tpu.reciprocal %223 {approx = true} : vector<8x8x1xf32> -> vector<8x8x1xf32>
    %225 = vector.broadcast %224 : vector<8x8x1xf32> to vector<8x8x128xf32>
    %226 = arith.mulf %221, %225 : vector<8x8x128xf32>
    %c0_183 = arith.constant 0 : index
    %c0_184 = arith.constant 0 : index
    %c0_185 = arith.constant 0 : index
    %227 = vector.load %arg20[%c0_183, %c0_184, %c0_185] : memref<8x128x8xf32, #tpu.memory_space<vmem>>, vector<8x128x8xf32>
    "tpu.trace_start"() <{level = 10 : i32, message = "bts,bsd->btd"}> : () -> ()
    %cst_186 = arith.constant dense<0.000000e+00> : vector<8x8x8xf32>
    %228 = tpu.matmul %226, %227, %cst_186 {dimension_numbers = #tpu.dot_dimension_numbers<[2], [1], [1], [2], [0, 0, 0, 1, 1, 2], [0], [0]>} : vector<8x8x128xf32>, vector<8x128x8xf32>, vector<8x8x8xf32> -> vector<8x8x8xf32>
    "tpu.trace_stop"() : () -> ()
    %229 = vector.shape_cast %226 : vector<8x8x128xf32> to vector<2x4x8x128xf32>
    %cst_187 = arith.constant dense<0.000000e+00> : vector<2x8x128xf32>
    %230 = vector.multi_reduction <add>, %229, %cst_187 [1] : vector<2x4x8x128xf32> to vector<2x8x128xf32>
    %cst_188 = arith.constant 2.500000e-01 : f32
    %231 = vector.broadcast %cst_188 : f32 to vector<2x8x128xf32>
    %232 = arith.mulf %230, %231 : vector<2x8x128xf32>
    %c0_189 = arith.constant 0 : index
    %c0_190 = arith.constant 0 : index
    %c0_191 = arith.constant 0 : index
    %233 = vector.load %arg17[%c0_189, %c0_190, %c0_191] : memref<2x8x128xf32, #tpu.memory_space<vmem>>, vector<2x8x128xf32>
    tpu.vector_store %arg17[%c0_189, %c0_190, %c0_191], %232 {strides = array<i32>} : memref<2x8x128xf32, #tpu.memory_space<vmem>>, vector<2x8x128xf32>,
    %234 = vector.extract_strided_slice %228 {offsets = [0, 0, 0], sizes = [1, 8, 8], strides = [1, 1, 1]} : vector<8x8x8xf32> to vector<1x8x8xf32>
    %235 = vector.shape_cast %234 : vector<1x8x8xf32> to vector<8x8xf32>
    %c0_192 = arith.constant 0 : index
    %c0_193 = arith.constant 0 : index
    %236 = vector.load %arg21[%c0_192, %c0_193] : memref<16x32xf32, #tpu.memory_space<vmem>>, vector<8x8xf32>
    tpu.vector_store %arg21[%c0_192, %c0_193], %235 {strides = array<i32>} : memref<16x32xf32, #tpu.memory_space<vmem>>, vector<8x8xf32>,
    %237 = vector.extract_strided_slice %228 {offsets = [1, 0, 0], sizes = [1, 8, 8], strides = [1, 1, 1]} : vector<8x8x8xf32> to vector<1x8x8xf32>
    %238 = vector.shape_cast %237 : vector<1x8x8xf32> to vector<8x8xf32>
    %c0_194 = arith.constant 0 : index
    %c8_195 = arith.constant 8 : index
    %239 = vector.load %arg21[%c0_194, %c8_195] : memref<16x32xf32, #tpu.memory_space<vmem>>, vector<8x8xf32>
    tpu.vector_store %arg21[%c0_194, %c8_195], %238 {strides = array<i32>} : memref<16x32xf32, #tpu.memory_space<vmem>>, vector<8x8xf32>,
    %240 = vector.extract_strided_slice %228 {offsets = [2, 0, 0], sizes = [1, 8, 8], strides = [1, 1, 1]} : vector<8x8x8xf32> to vector<1x8x8xf32>
    %241 = vector.shape_cast %240 : vector<1x8x8xf32> to vector<8x8xf32>
    %c0_196 = arith.constant 0 : index
    %c16_197 = arith.constant 16 : index
    %242 = vector.load %arg21[%c0_196, %c16_197] : memref<16x32xf32, #tpu.memory_space<vmem>>, vector<8x8xf32>
    tpu.vector_store %arg21[%c0_196, %c16_197], %241 {strides = array<i32>} : memref<16x32xf32, #tpu.memory_space<vmem>>, vector<8x8xf32>,
    %243 = vector.extract_strided_slice %228 {offsets = [3, 0, 0], sizes = [1, 8, 8], strides = [1, 1, 1]} : vector<8x8x8xf32> to vector<1x8x8xf32>
    %244 = vector.shape_cast %243 : vector<1x8x8xf32> to vector<8x8xf32>
    %c0_198 = arith.constant 0 : index
    %c24_199 = arith.constant 24 : index
    %245 = vector.load %arg21[%c0_198, %c24_199] : memref<16x32xf32, #tpu.memory_space<vmem>>, vector<8x8xf32>
    tpu.vector_store %arg21[%c0_198, %c24_199], %244 {strides = array<i32>} : memref<16x32xf32, #tpu.memory_space<vmem>>, vector<8x8xf32>,
    %246 = vector.extract_strided_slice %228 {offsets = [4, 0, 0], sizes = [1, 8, 8], strides = [1, 1, 1]} : vector<8x8x8xf32> to vector<1x8x8xf32>
    %247 = vector.shape_cast %246 : vector<1x8x8xf32> to vector<8x8xf32>
    %c8_200 = arith.constant 8 : index
    %c0_201 = arith.constant 0 : index
    %248 = vector.load %arg21[%c8_200, %c0_201] : memref<16x32xf32, #tpu.memory_space<vmem>>, vector<8x8xf32>
    tpu.vector_store %arg21[%c8_200, %c0_201], %247 {strides = array<i32>} : memref<16x32xf32, #tpu.memory_space<vmem>>, vector<8x8xf32>,
    %249 = vector.extract_strided_slice %228 {offsets = [5, 0, 0], sizes = [1, 8, 8], strides = [1, 1, 1]} : vector<8x8x8xf32> to vector<1x8x8xf32>
    %250 = vector.shape_cast %249 : vector<1x8x8xf32> to vector<8x8xf32>
    %c8_202 = arith.constant 8 : index
    %c8_203 = arith.constant 8 : index
    %251 = vector.load %arg21[%c8_202, %c8_203] : memref<16x32xf32, #tpu.memory_space<vmem>>, vector<8x8xf32>
    tpu.vector_store %arg21[%c8_202, %c8_203], %250 {strides = array<i32>} : memref<16x32xf32, #tpu.memory_space<vmem>>, vector<8x8xf32>,
    %252 = vector.extract_strided_slice %228 {offsets = [6, 0, 0], sizes = [1, 8, 8], strides = [1, 1, 1]} : vector<8x8x8xf32> to vector<1x8x8xf32>
    %253 = vector.shape_cast %252 : vector<1x8x8xf32> to vector<8x8xf32>
    %c8_204 = arith.constant 8 : index
    %c16_205 = arith.constant 16 : index
    %254 = vector.load %arg21[%c8_204, %c16_205] : memref<16x32xf32, #tpu.memory_space<vmem>>, vector<8x8xf32>
    tpu.vector_store %arg21[%c8_204, %c16_205], %253 {strides = array<i32>} : memref<16x32xf32, #tpu.memory_space<vmem>>, vector<8x8xf32>,
    %255 = vector.extract_strided_slice %228 {offsets = [7, 0, 0], sizes = [1, 8, 8], strides = [1, 1, 1]} : vector<8x8x8xf32> to vector<1x8x8xf32>
    %256 = vector.shape_cast %255 : vector<1x8x8xf32> to vector<8x8xf32>
    %c8_206 = arith.constant 8 : index
    %c24_207 = arith.constant 24 : index
    %257 = vector.load %arg21[%c8_206, %c24_207] : memref<16x32xf32, #tpu.memory_space<vmem>>, vector<8x8xf32>
    tpu.vector_store %arg21[%c8_206, %c24_207], %256 {strides = array<i32>} : memref<16x32xf32, #tpu.memory_space<vmem>>, vector<8x8xf32>,
    %c0_208 = arith.constant 0 : index
    %c0_209 = arith.constant 0 : index
    %258 = vector.load %arg21[%c0_208, %c0_209] : memref<16x32xf32, #tpu.memory_space<vmem>>, vector<16x32xf32>
    %c0_210 = arith.constant 0 : index
    %c0_211 = arith.constant 0 : index
    %259 = vector.load %arg8[%c0_210, %c0_211] : memref<32x32xf32, #tpu.memory_space<vmem>>, vector<32x32xf32>
    %cst_212 = arith.constant dense<0.000000e+00> : vector<16x32xf32>
    %260 = tpu.matmul %258, %259, %cst_212 {dimension_numbers = #tpu.dot_dimension_numbers<[1], [0], [0], [1], [0, 0, 1, 1], [], []>} : vector<16x32xf32>, vector<32x32xf32>, vector<16x32xf32> -> vector<16x32xf32>
    %c0_213 = arith.constant 0 : index
    %c0_214 = arith.constant 0 : index
    %261 = vector.load %arg9[%c0_213, %c0_214] : memref<1x32xf32, #tpu.memory_space<vmem>>, vector<1x32xf32>
    %262 = vector.broadcast %261 : vector<1x32xf32> to vector<16x32xf32>
    %263 = arith.addf %260, %262 : vector<16x32xf32>
    %264 = arith.addf %1, %263 : vector<16x32xf32>
    %c0_215 = arith.constant 0 : index
    %c0_216 = arith.constant 0 : index
    %265 = vector.load %arg10[%c0_215, %c0_216] : memref<1x32xf32, #tpu.memory_space<vmem>>, vector<1x32xf32>
    %c0_217 = arith.constant 0 : index
    %c0_218 = arith.constant 0 : index
    %266 = vector.load %arg11[%c0_217, %c0_218] : memref<1x32xf32, #tpu.memory_space<vmem>>, vector<1x32xf32>
    %cst_219 = arith.constant dense<0.000000e+00> : vector<16xf32>
    %267 = vector.multi_reduction <add>, %264, %cst_219 [1] : vector<16x32xf32> to vector<16xf32>
    %268 = vector.shape_cast %267 : vector<16xf32> to vector<16x1xf32>
    %cst_220 = arith.constant 3.200000e+01 : f32
    %269 = vector.broadcast %cst_220 : f32 to vector<16x1xf32>
    %270 = arith.divf %268, %269 : vector<16x1xf32>
    %271 = vector.broadcast %270 : vector<16x1xf32> to vector<16x32xf32>
    %272 = arith.subf %264, %271 : vector<16x32xf32>
    %273 = arith.mulf %272, %272 : vector<16x32xf32>
    %cst_221 = arith.constant dense<0.000000e+00> : vector<16xf32>
    %274 = vector.multi_reduction <add>, %273, %cst_221 [1] : vector<16x32xf32> to vector<16xf32>
    %275 = vector.shape_cast %274 : vector<16xf32> to vector<16x1xf32>
    %cst_222 = arith.constant 3.200000e+01 : f32
    %276 = vector.broadcast %cst_222 : f32 to vector<16x1xf32>
    %277 = arith.divf %275, %276 : vector<16x1xf32>
    %cst_223 = arith.constant 9.99999974E-6 : f32
    %278 = vector.broadcast %cst_223 : f32 to vector<16x1xf32>
    %279 = arith.addf %277, %278 : vector<16x1xf32>
    %280 = math.rsqrt %279 : vector<16x1xf32>
    %281 = vector.broadcast %280 : vector<16x1xf32> to vector<16x32xf32>
    %282 = arith.mulf %272, %281 : vector<16x32xf32>
    %283 = vector.broadcast %265 : vector<1x32xf32> to vector<16x32xf32>
    %284 = arith.mulf %282, %283 : vector<16x32xf32>
    %285 = vector.broadcast %266 : vector<1x32xf32> to vector<16x32xf32>
    %286 = arith.addf %284, %285 : vector<16x32xf32>
    %c0_224 = arith.constant 0 : index
    %c0_225 = arith.constant 0 : index
    %287 = vector.load %arg12[%c0_224, %c0_225] : memref<32x64xf32, #tpu.memory_space<vmem>>, vector<32x64xf32>
    %cst_226 = arith.constant dense<0.000000e+00> : vector<16x64xf32>
    %288 = tpu.matmul %286, %287, %cst_226 {dimension_numbers = #tpu.dot_dimension_numbers<[1], [0], [0], [1], [0, 0, 1, 1], [], []>} : vector<16x32xf32>, vector<32x64xf32>, vector<16x64xf32> -> vector<16x64xf32>
    %c0_227 = arith.constant 0 : index
    %c0_228 = arith.constant 0 : index
    %289 = vector.load %arg13[%c0_227, %c0_228] : memref<1x64xf32, #tpu.memory_space<vmem>>, vector<1x64xf32>
    %290 = vector.broadcast %289 : vector<1x64xf32> to vector<16x64xf32>
    %291 = arith.addf %288, %290 : vector<16x64xf32>
    %cst_229 = arith.constant 5.000000e-01 : f32
    %292 = vector.broadcast %cst_229 : f32 to vector<16x64xf32>
    %293 = arith.mulf %291, %292 : vector<16x64xf32>
    %cst_230 = arith.constant 0.707106769 : f32
    %294 = vector.broadcast %cst_230 : f32 to vector<16x64xf32>
    %295 = arith.mulf %291, %294 : vector<16x64xf32>
    %cst_231 = arith.constant 0.000000e+00 : f32
    %296 = vector.broadcast %cst_231 : f32 to vector<16x64xf32>
    %297 = arith.cmpf oge, %295, %296 : vector<16x64xf32>
    %cst_232 = arith.constant 1.000000e+00 : f32
    %cst_233 = arith.constant -1.000000e+00 : f32
    %298 = vector.broadcast %cst_232 : f32 to vector<16x64xf32>
    %299 = vector.broadcast %cst_233 : f32 to vector<16x64xf32>
    %300 = arith.select %297, %298, %299 : vector<16x64xi1>, vector<16x64xf32>
    %301 = math.absf %295 : vector<16x64xf32>
    %cst_234 = arith.constant 0.327591091 : f32
    %302 = vector.broadcast %cst_234 : f32 to vector<16x64xf32>
    %303 = arith.mulf %302, %301 : vector<16x64xf32>
    %cst_235 = arith.constant 1.000000e+00 : f32
    %304 = vector.broadcast %cst_235 : f32 to vector<16x64xf32>
    %305 = arith.addf %304, %303 : vector<16x64xf32>
    %cst_236 = arith.constant 1.000000e+00 : f32
    %306 = vector.broadcast %cst_236 : f32 to vector<16x64xf32>
    %307 = arith.divf %306, %305 : vector<16x64xf32>
    %cst_237 = arith.constant 1.06140542 : f32
    %308 = vector.broadcast %cst_237 : f32 to vector<16x64xf32>
    %309 = arith.mulf %308, %307 : vector<16x64xf32>
    %cst_238 = arith.constant -1.45315206 : f32
    %310 = vector.broadcast %cst_238 : f32 to vector<16x64xf32>
    %311 = arith.addf %309, %310 : vector<16x64xf32>
    %312 = arith.mulf %311, %307 : vector<16x64xf32>
    %cst_239 = arith.constant 1.42141378 : f32
    %313 = vector.broadcast %cst_239 : f32 to vector<16x64xf32>
    %314 = arith.addf %312, %313 : vector<16x64xf32>
    %315 = arith.mulf %314, %307 : vector<16x64xf32>
    %cst_240 = arith.constant -0.284496725 : f32
    %316 = vector.broadcast %cst_240 : f32 to vector<16x64xf32>
    %317 = arith.addf %315, %316 : vector<16x64xf32>
    %318 = arith.mulf %317, %307 : vector<16x64xf32>
    %cst_241 = arith.constant 0.254829586 : f32
    %319 = vector.broadcast %cst_241 : f32 to vector<16x64xf32>
    %320 = arith.addf %318, %319 : vector<16x64xf32>
    %321 = arith.mulf %320, %307 : vector<16x64xf32>
    %cst_242 = arith.constant 0.000000e+00 : f32
    %322 = vector.broadcast %cst_242 : f32 to vector<16x64xf32>
    %323 = arith.subf %322, %301 : vector<16x64xf32>
    %324 = arith.mulf %323, %301 : vector<16x64xf32>
    %325 = math.exp %324 : vector<16x64xf32>
    %326 = arith.mulf %321, %325 : vector<16x64xf32>
    %cst_243 = arith.constant 1.000000e+00 : f32
    %327 = vector.broadcast %cst_243 : f32 to vector<16x64xf32>
    %328 = arith.subf %327, %326 : vector<16x64xf32>
    %329 = arith.mulf %300, %328 : vector<16x64xf32>
    %cst_244 = arith.constant 1.000000e+00 : f32
    %330 = vector.broadcast %cst_244 : f32 to vector<16x64xf32>
    %331 = arith.addf %330, %329 : vector<16x64xf32>
    %332 = arith.mulf %293, %331 : vector<16x64xf32>
    %c0_245 = arith.constant 0 : index
    %c0_246 = arith.constant 0 : index
    %333 = vector.load %arg14[%c0_245, %c0_246] : memref<64x32xf32, #tpu.memory_space<vmem>>, vector<64x32xf32>
    %cst_247 = arith.constant dense<0.000000e+00> : vector<16x32xf32>
    %334 = tpu.matmul %332, %333, %cst_247 {dimension_numbers = #tpu.dot_dimension_numbers<[1], [0], [0], [1], [0, 0, 1, 1], [], []>} : vector<16x64xf32>, vector<64x32xf32>, vector<16x32xf32> -> vector<16x32xf32>
    %c0_248 = arith.constant 0 : index
    %c0_249 = arith.constant 0 : index
    %335 = vector.load %arg15[%c0_248, %c0_249] : memref<1x32xf32, #tpu.memory_space<vmem>>, vector<1x32xf32>
    %336 = vector.broadcast %335 : vector<1x32xf32> to vector<16x32xf32>
    %337 = arith.addf %334, %336 : vector<16x32xf32>
    %338 = arith.addf %264, %337 : vector<16x32xf32>
    %339 = vector.shape_cast %338 : vector<16x32xf32> to vector<2x8x32xf32>
    %c0_250 = arith.constant 0 : index
    %c0_251 = arith.constant 0 : index
    %c0_252 = arith.constant 0 : index
    %340 = vector.load %arg16[%c0_250, %c0_251, %c0_252] : memref<2x8x32xf32, #tpu.memory_space<vmem>>, vector<2x8x32xf32>
    tpu.vector_store %arg16[%c0_250, %c0_251, %c0_252], %339 {strides = array<i32>} : memref<2x8x32xf32, #tpu.memory_space<vmem>>, vector<2x8x32xf32>,
    return
  }
  func.func @transform_0(%arg0: i32) -> (i32, i32, i32) {
    %c0_i32 = arith.constant 0 : i32
    %c0_i32_0 = arith.constant 0 : i32
    %c0_i32_1 = arith.constant 0 : i32
    %c0_i32_2 = arith.constant 0 : i32
    return %c0_i32, %c0_i32_0, %c0_i32_1 : i32, i32, i32
  }
  func.func @transform_1(%arg0: i32) -> (i32, i32) {
    %c0_i32 = arith.constant 0 : i32
    %c0_i32_0 = arith.constant 0 : i32
    %c0_i32_1 = arith.constant 0 : i32
    return %c0_i32, %c0_i32_0 : i32, i32
  }
  func.func @transform_2(%arg0: i32) -> (i32, i32) {
    %c0_i32 = arith.constant 0 : i32
    %c0_i32_0 = arith.constant 0 : i32
    %c0_i32_1 = arith.constant 0 : i32
    return %c0_i32, %c0_i32_0 : i32, i32
  }
  func.func @transform_3(%arg0: i32) -> (i32, i32) {
    %c0_i32 = arith.constant 0 : i32
    %c0_i32_0 = arith.constant 0 : i32
    %c0_i32_1 = arith.constant 0 : i32
    return %c0_i32, %c0_i32_0 : i32, i32
  }
  func.func @transform_4(%arg0: i32) -> (i32, i32) {
    %c0_i32 = arith.constant 0 : i32
    %c0_i32_0 = arith.constant 0 : i32
    %c0_i32_1 = arith.constant 0 : i32
    return %c0_i32, %c0_i32_0 : i32, i32
  }
  func.func @transform_5(%arg0: i32) -> (i32, i32) {
    %c0_i32 = arith.constant 0 : i32
    %c0_i32_0 = arith.constant 0 : i32
    %c0_i32_1 = arith.constant 0 : i32
    return %c0_i32, %c0_i32_0 : i32, i32
  }
  func.func @transform_6(%arg0: i32) -> (i32, i32) {
    %c0_i32 = arith.constant 0 : i32
    %c0_i32_0 = arith.constant 0 : i32
    %c0_i32_1 = arith.constant 0 : i32
    return %c0_i32, %c0_i32_0 : i32, i32
  }
  func.func @transform_7(%arg0: i32) -> (i32, i32) {
    %c0_i32 = arith.constant 0 : i32
    %c0_i32_0 = arith.constant 0 : i32
    %c0_i32_1 = arith.constant 0 : i32
    return %c0_i32, %c0_i32_0 : i32, i32
  }
  func.func @transform_8(%arg0: i32) -> (i32, i32) {
    %c0_i32 = arith.constant 0 : i32
    %c0_i32_0 = arith.constant 0 : i32
    %c0_i32_1 = arith.constant 0 : i32
    return %c0_i32, %c0_i32_0 : i32, i32
  }
  func.func @transform_9(%arg0: i32) -> (i32, i32) {
    %c0_i32 = arith.constant 0 : i32
    %c0_i32_0 = arith.constant 0 : i32
    %c0_i32_1 = arith.constant 0 : i32
    return %c0_i32, %c0_i32_0 : i32, i32
  }
  func.func @transform_10(%arg0: i32) -> (i32, i32) {
    %c0_i32 = arith.constant 0 : i32
    %c0_i32_0 = arith.constant 0 : i32
    %c0_i32_1 = arith.constant 0 : i32
    return %c0_i32, %c0_i32_0 : i32, i32
  }
  func.func @transform_11(%arg0: i32) -> (i32, i32) {
    %c0_i32 = arith.constant 0 : i32
    %c0_i32_0 = arith.constant 0 : i32
    %c0_i32_1 = arith.constant 0 : i32
    return %c0_i32, %c0_i32_0 : i32, i32
  }
  func.func @transform_12(%arg0: i32) -> (i32, i32) {
    %c0_i32 = arith.constant 0 : i32
    %c0_i32_0 = arith.constant 0 : i32
    %c0_i32_1 = arith.constant 0 : i32
    return %c0_i32, %c0_i32_0 : i32, i32
  }
  func.func @transform_13(%arg0: i32) -> (i32, i32) {
    %c0_i32 = arith.constant 0 : i32
    %c0_i32_0 = arith.constant 0 : i32
    %c0_i32_1 = arith.constant 0 : i32
    return %c0_i32, %c0_i32_0 : i32, i32
  }
  func.func @transform_14(%arg0: i32) -> (i32, i32) {
    %c0_i32 = arith.constant 0 : i32
    %c0_i32_0 = arith.constant 0 : i32
    %c0_i32_1 = arith.constant 0 : i32
    return %c0_i32, %c0_i32_0 : i32, i32
  }
  func.func @transform_15(%arg0: i32) -> (i32, i32, i32) {
    %c0_i32 = arith.constant 0 : i32
    %c0_i32_0 = arith.constant 0 : i32
    %c0_i32_1 = arith.constant 0 : i32
    %c0_i32_2 = arith.constant 0 : i32
    return %c0_i32, %c0_i32_0, %c0_i32_1 : i32, i32, i32
  }
  func.func @transform_16(%arg0: i32) -> (i32, i32, i32) {
    %c0_i32 = arith.constant 0 : i32
    %c0_i32_0 = arith.constant 0 : i32
    %c0_i32_1 = arith.constant 0 : i32
    %c0_i32_2 = arith.constant 0 : i32
    return %c0_i32, %c0_i32_0, %c0_i32_1 : i32, i32, i32
  }
}

</mosaic_0001>

<bundles_post_ra>
// kernel: transformer_layer_forward.1
= control target key start
LH: loop header
LB: loop body
LE: loop exit
PB: predicated region body
PF: predicated region fallthrough
CT: control target
= control target key end

     0   :  { %s5554_s0 = inlined_call_operand.vmem [shape: f32[2,8,32], index: 0, kind: input, shape index: {}]   ;;  %s5555_s1 = inlined_call_operand.vmem [shape: f32[1,32], index: 1, kind: input, shape index: {}]   ;;  %s5556_s2 = inlined_call_operand.vmem [shape: f32[1,32], index: 2, kind: input, shape index: {}]   ;;  %s5557_s3 = inlined_call_operand.vmem [shape: f32[32,96], index: 3, kind: input, shape index: {}]   ;;  %s5558_s4 = inlined_call_operand.vmem [shape: f32[1,96], index: 4, kind: input, shape index: {}]   ;;  %s5559_s5 = inlined_call_operand.vmem [shape: f32[1,32], index: 5, kind: input, shape index: {}]   ;;  %s5560_s6 = inlined_call_operand.vmem [shape: f32[1,32], index: 6, kind: input, shape index: {}]   ;;  %s5561_s7 = inlined_call_operand.vmem [shape: f32[32,32], index: 7, kind: input, shape index: {}]   ;;  %s5562_s8 = inlined_call_operand.vmem [shape: f32[1,32], index: 8, kind: input, shape index: {}]   ;;  %s5563_s9 = inlined_call_operand.vmem [shape: f32[1,32], index: 9, kind: input, shape index: {}]   ;;  %s5564_s10 = inlined_call_operand.vmem [shape: f32[1,32], index: 10, kind: input, shape index: {}]   ;;  %s5565_s11 = inlined_call_operand.vmem [shape: f32[32,64], index: 11, kind: input, shape index: {}]   ;;  %s5566_s12 = inlined_call_operand.vmem [shape: f32[1,64], index: 12, kind: input, shape index: {}]   ;;  %s5567_s13 = inlined_call_operand.vmem [shape: f32[64,32], index: 13, kind: input, shape index: {}]   ;;  %s5568_s14 = inlined_call_operand.vmem [shape: f32[1,32], index: 14, kind: input, shape index: {}]   ;;  %s5569_s15 = inlined_call_operand.vmem [shape: f32[2,8,32], index: 15, kind: output, shape index: {0}]   ;;  %s5570_s16 = inlined_call_operand.hbm [shape: f32[2,8,128], index: 16, kind: output, shape index: {1}]  }
   0x1   :  { %5572 = sst [smem:[#allocation9_spill]] %s5554_s0 }
   0x2   :  { %s5573_s23 = sld [smem:[#allocation9_spill]]  ;;  %vm57_vm0 = vcmask 261120  }
   0x8   :  { %v53_v0 = vld [vmem:[%s5573_s23] sm:$0xff]  ;;  %v54_v1 = vld [vmem:[%s5573_s23 + $0x8] sm:$0xff] }
   0x9   :  { %22 = vsyncpa [#allocation7], 0  ;;  %v58_v2 = vsel %vm57_vm0, %v53_v0, 0.0  ;;  %v61_v3 = vsel %vm57_vm0, %v54_v1, 0.0  ;;  %v104_v14 = vld [vmem:[%s5557_s3 + $0x18] sm:$0xff]  ;;  %v103_v15 = vld [vmem:[%s5557_s3 + $0x10] sm:$0xff] }
   0xa   :  { %59 = vadd.xlane.f32.xlu0 %v58_v2  ;;  %3487 = vmatprep.subr.mxu0 %v104_v14  ;;  %v102_v16 = vld [vmem:[%s5557_s3 + $0x8] sm:$0xff]  ;;  %v101_v17 = vld [vmem:[%s5557_s3] sm:$0xff]  ;;  %s4191_s21 = smov 120   ;;  %s4192_s26 = smov 112   ;;  %vm193_vm1 = vcmask 64512   ;;  %v4193_v35 = vmov 0.0  }
   0xb   :  { %3488 = vmatpush3.msra.mxu0 %v104_v14  ;;  %v4320_v18 = vld [vmem:[%s5559_s5] ss:$0 sm:$0xff]  ;;  %3498 = vmatprep.subr.mxu1 %v4193_v35  ;;  %194 = vst.msk [vmem:[#allocation3] sm:$0xff] %vm193_vm1, %v4193_v35  ;;  %195 = vst.msk [vmem:[#allocation3 + $0x8] sm:$0xff] %vm193_vm1, %v4193_v35  ;;  %vm462_vm2 = vcmask 57344   ;;  %vm4194_vm3 = vmmov 0  }
   0xc   :  { %3489 = vmatprep.subr.mxu0 %v103_v15  ;;  %v3023_v26 = vld [vmem:[%s5555_s1] ss:$0 sm:$0xff]  ;;  %196 = vst.msk [vmem:[#allocation3 + $0x10] sm:$0xff] %vm193_vm1, %v4193_v35  ;;  %197 = vst.msk [vmem:[#allocation3 + $0x18] sm:$0xff] %vm193_vm1, %v4193_v35  ;;  %3530 = vmatprep.mubr.msk.f32.mxu1 %vm4194_vm3, %v4193_v35  ;;  %s4196_s29 = smov 96   ;;  %s4197_s30 = smov 88  }
   0xd   :  { %3490 = vmatpush3.msra.mxu0 %v103_v15  ;;  %v3024_v28 = vld [vmem:[%s5556_s2] ss:$0 sm:$0xff]  ;;  %198 = vst.msk [vmem:[#allocation3 + $0x20] sm:$0xff] %vm193_vm1, %v4193_v35  ;;  %199 = vst.msk [vmem:[#allocation3 + $0x28] sm:$0xff] %vm193_vm1, %v4193_v35  ;;  %s4198_s0 = smov 104   ;;  %s4199_s17 = smov 72  }
   0xe   :  { %62 = vadd.xlane.f32.xlu0 %v61_v3  ;;  %3491 = vmatprep.subr.mxu0 %v102_v16  ;;  %200 = vst.msk [vmem:[#allocation3 + $0x30] sm:$0xff] %vm193_vm1, %v4193_v35  ;;  %201 = vst.msk [vmem:[#allocation3 + $0x38] sm:$0xff] %vm193_vm1, %v4193_v35  ;;  %v461_v63 = vld [vmem:[%s5559_s5] sm:$0x1]  ;;  %s4200_s18 = smov 64   ;;  %s4201_s19 = smov 56  }
   0xf   :  { %3492 = vmatpush3.msra.mxu0 %v102_v16  ;;  %202 = vst.msk [vmem:[#allocation3 + $0x40] sm:$0xff] %vm193_vm1, %v4193_v35  ;;  %203 = vst.msk [vmem:[#allocation3 + $0x48] sm:$0xff] %vm193_vm1, %v4193_v35  ;;  %s4202_s22 = smov 48   ;;  %v586_v14 = vld [vmem:[%s5559_s5] sm:$0x1]  ;;  %s4203_s28 = smov 40  }
  0x10   :  { %3493 = vmatprep.subr.mxu0 %v101_v17  ;;  %204 = vst.msk [vmem:[#allocation3 + $0x50] sm:$0xff] %vm193_vm1, %v4193_v35  ;;  %205 = vst.msk [vmem:[#allocation3 + $0x58] sm:$0xff] %vm193_vm1, %v4193_v35  ;;  %vm2586_vm5 = vcmask 130112   ;;  %vm2592_vm6 = vcmask 195712   ;;  %vm2598_vm7 = vcmask 261312   ;;  %vm2917_vm10 = vcmask 523264  }
  0x11   :  { %3494 = vmatpush3.msra.mxu0 %v101_v17  ;;  %206 = vst.msk [vmem:[#allocation3 + $0x60] sm:$0xff] %vm193_vm1, %v4193_v35  ;;  %207 = vst.msk [vmem:[#allocation3 + $0x68] sm:$0xff] %vm193_vm1, %v4193_v35 }
  0x12   :  { %208 = vst.msk [vmem:[#allocation3 + $0x70] sm:$0xff] %vm193_vm1, %v4193_v35  ;;  %209 = vst.msk [vmem:[#allocation3 + $0x78] sm:$0xff] %vm193_vm1, %v4193_v35  ;;  %3533 = vmatprep.subr.mxu0 %v4193_v35 }
  0x13   :  { %210 = vst.msk [vmem:[#allocation3 + $0x80] sm:$0xff] %vm193_vm1, %v4193_v35  ;;  %211 = vst.msk [vmem:[#allocation3 + $0x88] sm:$0xff] %vm193_vm1, %v4193_v35  ;;  %v707_v61 = vld [vmem:[#allocation3 + $0x18] sm:$0xff] }
  0x14   :  { %212 = vst.msk [vmem:[#allocation3 + $0x90] sm:$0xff] %vm193_vm1, %v4193_v35  ;;  %213 = vst.msk [vmem:[#allocation3 + $0x98] sm:$0xff] %vm193_vm1, %v4193_v35  ;;  %v709_v57 = vld [vmem:[#allocation3 + $0x28] sm:$0xff]  ;;  %v708_v59 = vld [vmem:[#allocation3 + $0x20] sm:$0xff] }
  0x15   :  { %214 = vst.msk [vmem:[#allocation3 + $0xa0] sm:$0xff] %vm193_vm1, %v4193_v35  ;;  %215 = vst.msk [vmem:[#allocation3 + $0xa8] sm:$0xff] %vm193_vm1, %v4193_v35  ;;  %v711_v53 = vld [vmem:[#allocation3 + $0x38] sm:$0xff]  ;;  %v710_v55 = vld [vmem:[#allocation3 + $0x30] sm:$0xff] }
  0x16   :  { %216 = vst.msk [vmem:[#allocation3 + $0xb0] sm:$0xff] %vm193_vm1, %v4193_v35  ;;  %217 = vst.msk [vmem:[#allocation3 + $0xb8] sm:$0xff] %vm193_vm1, %v4193_v35  ;;  %v713_v49 = vld [vmem:[#allocation3 + $0x48] sm:$0xff]  ;;  %v712_v51 = vld [vmem:[#allocation3 + $0x40] sm:$0xff] }
  0x17   :  { %218 = vst.msk [vmem:[#allocation3 + $0xc0] sm:$0xff] %vm193_vm1, %v4193_v35  ;;  %219 = vst.msk [vmem:[#allocation3 + $0xc8] sm:$0xff] %vm193_vm1, %v4193_v35  ;;  %v715_v45 = vld [vmem:[#allocation3 + $0x58] sm:$0xff]  ;;  %v714_v47 = vld [vmem:[#allocation3 + $0x50] sm:$0xff] }
  0x18   :  { %220 = vst.msk [vmem:[#allocation3 + $0xd0] sm:$0xff] %vm193_vm1, %v4193_v35  ;;  %221 = vst.msk [vmem:[#allocation3 + $0xd8] sm:$0xff] %vm193_vm1, %v4193_v35  ;;  %v717_v41 = vld [vmem:[#allocation3 + $0x68] sm:$0xff]  ;;  %v716_v43 = vld [vmem:[#allocation3 + $0x60] sm:$0xff] }
  0x19   :  { %222 = vst.msk [vmem:[#allocation3 + $0xe0] sm:$0xff] %vm193_vm1, %v4193_v35  ;;  %223 = vst.msk [vmem:[#allocation3 + $0xe8] sm:$0xff] %vm193_vm1, %v4193_v35  ;;  %v719_v37 = vld [vmem:[#allocation3 + $0x78] sm:$0xff]  ;;  %v718_v39 = vld [vmem:[#allocation3 + $0x70] sm:$0xff] }
  0x1a   :  { %224 = vst.msk [vmem:[#allocation3 + $0xf0] sm:$0xff] %vm193_vm1, %v4193_v35  ;;  %225 = vst.msk [vmem:[#allocation3 + $0xf8] sm:$0xff] %vm193_vm1, %v4193_v35  ;;  %3499 = vmatpush3.xpose.msk.msra.mxu1 %vm193_vm1, %v719_v37 }
  0x1b   :  { %226 = vst.msk [vmem:[#allocation3 + $0x100] sm:$0xff] %vm193_vm1, %v4193_v35  ;;  %227 = vst.msk [vmem:[#allocation3 + $0x108] sm:$0xff] %vm193_vm1, %v4193_v35  ;;  %3500 = vmatprep.subr.mxu1 %v4193_v35  ;;  %v722_v3 = vld [vmem:[#allocation3 + $0x90] sm:$0xff] }
  0x1c   :  { %228 = vst.msk [vmem:[#allocation3 + $0x110] sm:$0xff] %vm193_vm1, %v4193_v35  ;;  %229 = vst.msk [vmem:[#allocation3 + $0x118] sm:$0xff] %vm193_vm1, %v4193_v35  ;;  %v725_v58 = vld [vmem:[#allocation3 + $0xa8] sm:$0xff]  ;;  %v724_v60 = vld [vmem:[#allocation3 + $0xa0] sm:$0xff] }
  0x1d   :  { %230 = vst.msk [vmem:[#allocation3 + $0x120] sm:$0xff] %vm193_vm1, %v4193_v35  ;;  %231 = vst.msk [vmem:[#allocation3 + $0x128] sm:$0xff] %vm193_vm1, %v4193_v35  ;;  %v727_v54 = vld [vmem:[#allocation3 + $0xb8] sm:$0xff]  ;;  %v726_v56 = vld [vmem:[#allocation3 + $0xb0] sm:$0xff] }
  0x1e   :  { %232 = vst.msk [vmem:[#allocation3 + $0x130] sm:$0xff] %vm193_vm1, %v4193_v35  ;;  %233 = vst.msk [vmem:[#allocation3 + $0x138] sm:$0xff] %vm193_vm1, %v4193_v35  ;;  %3501 = vmatpush3.xpose.msk.msra.mxu1 %vm193_vm1, %v718_v39  ;;  %v729_v50 = vld [vmem:[#allocation3 + $0xc8] sm:$0xff]  ;;  %v728_v52 = vld [vmem:[#allocation3 + $0xc0] sm:$0xff] }
  0x1f   :  { %234 = vst.msk [vmem:[#allocation3 + $0x140] sm:$0xff] %vm193_vm1, %v4193_v35  ;;  %235 = vst.msk [vmem:[#allocation3 + $0x148] sm:$0xff] %vm193_vm1, %v4193_v35  ;;  %3502 = vmatprep.subr.mxu1 %v4193_v35  ;;  %v731_v46 = vld [vmem:[#allocation3 + $0xd8] sm:$0xff]  ;;  %v730_v48 = vld [vmem:[#allocation3 + $0xd0] sm:$0xff] }
  0x20   :  { %236 = vst.msk [vmem:[#allocation3 + $0x150] sm:$0xff] %vm193_vm1, %v4193_v35  ;;  %237 = vst.msk [vmem:[#allocation3 + $0x158] sm:$0xff] %vm193_vm1, %v4193_v35  ;;  %v733_v42 = vld [vmem:[#allocation3 + $0xe8] sm:$0xff]  ;;  %v732_v44 = vld [vmem:[#allocation3 + $0xe0] sm:$0xff] }
  0x21   :  { %238 = vst.msk [vmem:[#allocation3 + $0x160] sm:$0xff] %vm193_vm1, %v4193_v35  ;;  %239 = vst.msk [vmem:[#allocation3 + $0x168] sm:$0xff] %vm193_vm1, %v4193_v35  ;;  %v735_v38 = vld [vmem:[#allocation3 + $0xf8] sm:$0xff]  ;;  %v734_v40 = vld [vmem:[#allocation3 + $0xf0] sm:$0xff] }
  0x22   :  { %240 = vst.msk [vmem:[#allocation3 + $0x170] sm:$0xff] %vm193_vm1, %v4193_v35  ;;  %241 = vst.msk [vmem:[#allocation3 + $0x178] sm:$0xff] %vm193_vm1, %v4193_v35  ;;  %3503 = vmatpush3.xpose.msk.msra.mxu1 %vm193_vm1, %v717_v41 }
  0x23   :  { %242 = vst.msk [vmem:[#allocation3 + $0x180] sm:$0xff] %vm193_vm1, %v4193_v35  ;;  %243 = vst.msk [vmem:[#allocation3 + $0x188] sm:$0xff] %vm193_vm1, %v4193_v35  ;;  %3504 = vmatprep.subr.mxu1 %v4193_v35 }
  0x24   :  { %488 = vrot.lane.b32.xlu0 %v4320_v18, %s4191_s21  ;;  %244 = vst.msk [vmem:[#allocation3 + $0x190] sm:$0xff] %vm193_vm1, %v4193_v35  ;;  %245 = vst.msk [vmem:[#allocation3 + $0x198] sm:$0xff] %vm193_vm1, %v4193_v35 }
  0x25   :  { %246 = vst.msk [vmem:[#allocation3 + $0x1a0] sm:$0xff] %vm193_vm1, %v4193_v35  ;;  %247 = vst.msk [vmem:[#allocation3 + $0x1a8] sm:$0xff] %vm193_vm1, %v4193_v35 }
  0x26   :  { %248 = vst.msk [vmem:[#allocation3 + $0x1b0] sm:$0xff] %vm193_vm1, %v4193_v35  ;;  %249 = vst.msk [vmem:[#allocation3 + $0x1b8] sm:$0xff] %vm193_vm1, %v4193_v35  ;;  %3505 = vmatpush3.xpose.msk.msra.mxu1 %vm193_vm1, %v716_v43 }
  0x27   :  { %250 = vst.msk [vmem:[#allocation3 + $0x1c0] sm:$0xff] %vm193_vm1, %v4193_v35  ;;  %251 = vst.msk [vmem:[#allocation3 + $0x1c8] sm:$0xff] %vm193_vm1, %v4193_v35  ;;  %3506 = vmatprep.subr.mxu1 %v4193_v35  ;;  %v747_v41 = vld [vmem:[#allocation3 + $0x158] sm:$0xff] }
  0x28   :  { %523 = vrot.lane.b32.xlu0 %v4320_v18, %s4192_s26  ;;  %252 = vst.msk [vmem:[#allocation3 + $0x1d0] sm:$0xff] %vm193_vm1, %v4193_v35  ;;  %253 = vst.msk [vmem:[#allocation3 + $0x1d8] sm:$0xff] %vm193_vm1, %v4193_v35  ;;  %v748_v37 = vld [vmem:[#allocation3 + $0x160] sm:$0xff] }
  0x29   :  { %254 = vst.msk [vmem:[#allocation3 + $0x1e0] sm:$0xff] %vm193_vm1, %v4193_v35  ;;  %255 = vst.msk [vmem:[#allocation3 + $0x1e8] sm:$0xff] %vm193_vm1, %v4193_v35 }
  0x2a   :  { %256 = vst.msk [vmem:[#allocation3 + $0x1f0] sm:$0xff] %vm193_vm1, %v4193_v35  ;;  %257 = vst.msk [vmem:[#allocation3 + $0x1f8] sm:$0xff] %vm193_vm1, %v4193_v35  ;;  %3507 = vmatpush3.xpose.msk.msra.mxu1 %vm193_vm1, %v715_v45 }
  0x2b   :  { %258 = vst.msk [vmem:[#allocation3 + $0x200] sm:$0xff] %vm193_vm1, %v4193_v35  ;;  %259 = vst.msk [vmem:[#allocation3 + $0x208] sm:$0xff] %vm193_vm1, %v4193_v35  ;;  %3508 = vmatprep.subr.mxu1 %v4193_v35 }
  0x2c   :  { %260 = vst.msk [vmem:[#allocation3 + $0x210] sm:$0xff] %vm193_vm1, %v4193_v35  ;;  %261 = vst.msk [vmem:[#allocation3 + $0x218] sm:$0xff] %vm193_vm1, %v4193_v35 }
  0x2d   :  { %262 = vst.msk [vmem:[#allocation3 + $0x220] sm:$0xff] %vm193_vm1, %v4193_v35  ;;  %263 = vst.msk [vmem:[#allocation3 + $0x228] sm:$0xff] %vm193_vm1, %v4193_v35 }
  0x2e   :  { %264 = vst.msk [vmem:[#allocation3 + $0x230] sm:$0xff] %vm193_vm1, %v4193_v35  ;;  %265 = vst.msk [vmem:[#allocation3 + $0x238] sm:$0xff] %vm193_vm1, %v4193_v35  ;;  %3509 = vmatpush3.xpose.msk.msra.mxu1 %vm193_vm1, %v714_v47  ;;  %v745_v47 = vld [vmem:[#allocation3 + $0x148] sm:$0xff] }
  0x2f   :  { %266 = vst.msk [vmem:[#allocation3 + $0x240] sm:$0xff] %vm193_vm1, %v4193_v35  ;;  %267 = vst.msk [vmem:[#allocation3 + $0x248] sm:$0xff] %vm193_vm1, %v4193_v35  ;;  %3510 = vmatprep.subr.mxu1 %v4193_v35  ;;  %v763_v45 = vld [vmem:[#allocation3 + $0x1d8] sm:$0xff] }
  0x30   :  { %268 = vst.msk [vmem:[#allocation3 + $0x250] sm:$0xff] %vm193_vm1, %v4193_v35  ;;  %269 = vst.msk [vmem:[#allocation3 + $0x258] sm:$0xff] %vm193_vm1, %v4193_v35 }
  0x31   :  { %270 = vst.msk [vmem:[#allocation3 + $0x260] sm:$0xff] %vm193_vm1, %v4193_v35  ;;  %271 = vst.msk [vmem:[#allocation3 + $0x268] sm:$0xff] %vm193_vm1, %v4193_v35 }
  0x32   :  { %272 = vst.msk [vmem:[#allocation3 + $0x270] sm:$0xff] %vm193_vm1, %v4193_v35  ;;  %273 = vst.msk [vmem:[#allocation3 + $0x278] sm:$0xff] %vm193_vm1, %v4193_v35  ;;  %3511 = vmatpush3.xpose.msk.msra.mxu1 %vm193_vm1, %v713_v49 }
  0x33   :  { %274 = vst.msk [vmem:[#allocation3 + $0x280] sm:$0xff] %vm193_vm1, %v4193_v35  ;;  %275 = vst.msk [vmem:[#allocation3 + $0x288] sm:$0xff] %vm193_vm1, %v4193_v35  ;;  %3512 = vmatprep.subr.mxu1 %v4193_v35 }
  0x34   :  { %276 = vst.msk [vmem:[#allocation3 + $0x290] sm:$0xff] %vm193_vm1, %v4193_v35  ;;  %277 = vst.msk [vmem:[#allocation3 + $0x298] sm:$0xff] %vm193_vm1, %v4193_v35 }
  0x35   :  { %278 = vst.msk [vmem:[#allocation3 + $0x2a0] sm:$0xff] %vm193_vm1, %v4193_v35  ;;  %279 = vst.msk [vmem:[#allocation3 + $0x2a8] sm:$0xff] %vm193_vm1, %v4193_v35 }
  0x36   :  { %280 = vst.msk [vmem:[#allocation3 + $0x2b0] sm:$0xff] %vm193_vm1, %v4193_v35  ;;  %281 = vst.msk [vmem:[#allocation3 + $0x2b8] sm:$0xff] %vm193_vm1, %v4193_v35  ;;  %3513 = vmatpush3.xpose.msk.msra.mxu1 %vm193_vm1, %v712_v51  ;;  %v761_v51 = vld [vmem:[#allocation3 + $0x1c8] sm:$0xff] }
  0x37   :  { %282 = vst.msk [vmem:[#allocation3 + $0x2c0] sm:$0xff] %vm193_vm1, %v4193_v35  ;;  %283 = vst.msk [vmem:[#allocation3 + $0x2c8] sm:$0xff] %vm193_vm1, %v4193_v35  ;;  %3514 = vmatprep.subr.mxu1 %v4193_v35 }
  0x38   :  { %284 = vst.msk [vmem:[#allocation3 + $0x2d0] sm:$0xff] %vm193_vm1, %v4193_v35  ;;  %285 = vst.msk [vmem:[#allocation3 + $0x2d8] sm:$0xff] %vm193_vm1, %v4193_v35 }
  0x39   :  { %286 = vst.msk [vmem:[#allocation3 + $0x2e0] sm:$0xff] %vm193_vm1, %v4193_v35  ;;  %287 = vst.msk [vmem:[#allocation3 + $0x2e8] sm:$0xff] %vm193_vm1, %v4193_v35 }
  0x3a   :  { %288 = vst.msk [vmem:[#allocation3 + $0x2f0] sm:$0xff] %vm193_vm1, %v4193_v35  ;;  %289 = vst.msk [vmem:[#allocation3 + $0x2f8] sm:$0xff] %vm193_vm1, %v4193_v35  ;;  %3515 = vmatpush3.xpose.msk.msra.mxu1 %vm193_vm1, %v711_v53  ;;  %v743_v53 = vld [vmem:[#allocation3 + $0x138] sm:$0xff] }
  0x3b   :  { %290 = vst.msk [vmem:[#allocation3 + $0x300] sm:$0xff] %vm193_vm1, %v4193_v35  ;;  %291 = vst.msk [vmem:[#allocation3 + $0x308] sm:$0xff] %vm193_vm1, %v4193_v35  ;;  %3516 = vmatprep.subr.mxu1 %v4193_v35 }
  0x3c   :  { %292 = vst.msk [vmem:[#allocation3 + $0x310] sm:$0xff] %vm193_vm1, %v4193_v35  ;;  %293 = vst.msk [vmem:[#allocation3 + $0x318] sm:$0xff] %vm193_vm1, %v4193_v35 }
  0x3d   :  { %294 = vst.msk [vmem:[#allocation3 + $0x320] sm:$0xff] %vm193_vm1, %v4193_v35  ;;  %295 = vst.msk [vmem:[#allocation3 + $0x328] sm:$0xff] %vm193_vm1, %v4193_v35 }
  0x3e   :  { %296 = vst.msk [vmem:[#allocation3 + $0x330] sm:$0xff] %vm193_vm1, %v4193_v35  ;;  %297 = vst.msk [vmem:[#allocation3 + $0x338] sm:$0xff] %vm193_vm1, %v4193_v35  ;;  %3517 = vmatpush3.xpose.msk.msra.mxu1 %vm193_vm1, %v710_v55 }
  0x3f   :  { %298 = vst.msk [vmem:[#allocation3 + $0x340] sm:$0xff] %vm193_vm1, %v4193_v35  ;;  %299 = vst.msk [vmem:[#allocation3 + $0x348] sm:$0xff] %vm193_vm1, %v4193_v35  ;;  %3518 = vmatprep.subr.mxu1 %v4193_v35 }
  0x40   :  { %300 = vst.msk [vmem:[#allocation3 + $0x350] sm:$0xff] %vm193_vm1, %v4193_v35  ;;  %301 = vst.msk [vmem:[#allocation3 + $0x358] sm:$0xff] %vm193_vm1, %v4193_v35 }
  0x41   :  { %302 = vst.msk [vmem:[#allocation3 + $0x360] sm:$0xff] %vm193_vm1, %v4193_v35  ;;  %303 = vst.msk [vmem:[#allocation3 + $0x368] sm:$0xff] %vm193_vm1, %v4193_v35 }
  0x42   :  { %304 = vst.msk [vmem:[#allocation3 + $0x370] sm:$0xff] %vm193_vm1, %v4193_v35  ;;  %305 = vst.msk [vmem:[#allocation3 + $0x378] sm:$0xff] %vm193_vm1, %v4193_v35  ;;  %3519 = vmatpush3.xpose.msk.msra.mxu1 %vm193_vm1, %v709_v57  ;;  %v759_v57 = vld [vmem:[#allocation3 + $0x1b8] sm:$0xff] }
  0x43   :  { %306 = vst.msk [vmem:[#allocation3 + $0x380] sm:$0xff] %vm193_vm1, %v4193_v35  ;;  %307 = vst.msk [vmem:[#allocation3 + $0x388] sm:$0xff] %vm193_vm1, %v4193_v35  ;;  %3520 = vmatprep.subr.mxu1 %v4193_v35 }
  0x44   :  { %308 = vst.msk [vmem:[#allocation3 + $0x390] sm:$0xff] %vm193_vm1, %v4193_v35  ;;  %309 = vst.msk [vmem:[#allocation3 + $0x398] sm:$0xff] %vm193_vm1, %v4193_v35 }
  0x45   :  { %310 = vst.msk [vmem:[#allocation3 + $0x3a0] sm:$0xff] %vm193_vm1, %v4193_v35  ;;  %311 = vst.msk [vmem:[#allocation3 + $0x3a8] sm:$0xff] %vm193_vm1, %v4193_v35 }
  0x46   :  { %312 = vst.msk [vmem:[#allocation3 + $0x3b0] sm:$0xff] %vm193_vm1, %v4193_v35  ;;  %313 = vst.msk [vmem:[#allocation3 + $0x3b8] sm:$0xff] %vm193_vm1, %v4193_v35  ;;  %3521 = vmatpush3.xpose.msk.msra.mxu1 %vm193_vm1, %v708_v59  ;;  %v741_v59 = vld [vmem:[#allocation3 + $0x128] sm:$0xff] }
  0x47   :  { %314 = vst.msk [vmem:[#allocation3 + $0x3c0] sm:$0xff] %vm193_vm1, %v4193_v35  ;;  %315 = vst.msk [vmem:[#allocation3 + $0x3c8] sm:$0xff] %vm193_vm1, %v4193_v35  ;;  %3522 = vmatprep.subr.mxu1 %v4193_v35 }
  0x48   :  { %316 = vst.msk [vmem:[#allocation3 + $0x3d0] sm:$0xff] %vm193_vm1, %v4193_v35  ;;  %317 = vst.msk [vmem:[#allocation3 + $0x3d8] sm:$0xff] %vm193_vm1, %v4193_v35 }
  0x49   :  { %318 = vst.msk [vmem:[#allocation3 + $0x3e0] sm:$0xff] %vm193_vm1, %v4193_v35  ;;  %319 = vst.msk [vmem:[#allocation3 + $0x3e8] sm:$0xff] %vm193_vm1, %v4193_v35 }
  0x4a   :  { %320 = vst.msk [vmem:[#allocation3 + $0x3f0] sm:$0xff] %vm193_vm1, %v4193_v35  ;;  %321 = vst.msk [vmem:[#allocation3 + $0x3f8] sm:$0xff] %vm193_vm1, %v4193_v35  ;;  %3523 = vmatpush3.xpose.msk.msra.mxu1 %vm193_vm1, %v707_v61 }
  0x4b   :  { %322 = vst.msk [vmem:[#allocation4] sm:$0xff] %vm193_vm1, %v4193_v35  ;;  %323 = vst.msk [vmem:[#allocation4 + $0x8] sm:$0xff] %vm193_vm1, %v4193_v35  ;;  %3524 = vmatprep.subr.mxu1 %v4193_v35 }
  0x4c   :  { %324 = vst.msk [vmem:[#allocation4 + $0x10] sm:$0xff] %vm193_vm1, %v4193_v35  ;;  %325 = vst.msk [vmem:[#allocation4 + $0x18] sm:$0xff] %vm193_vm1, %v4193_v35 }
  0x4d   :  { %326 = vst.msk [vmem:[#allocation4 + $0x20] sm:$0xff] %vm193_vm1, %v4193_v35  ;;  %327 = vst.msk [vmem:[#allocation4 + $0x28] sm:$0xff] %vm193_vm1, %v4193_v35 }
  0x4e   :  { %328 = vst.msk [vmem:[#allocation4 + $0x30] sm:$0xff] %vm193_vm1, %v4193_v35  ;;  %329 = vst.msk [vmem:[#allocation4 + $0x38] sm:$0xff] %vm193_vm1, %v4193_v35 }
  0x4f   :  { %330 = vst.msk [vmem:[#allocation4 + $0x40] sm:$0xff] %vm193_vm1, %v4193_v35  ;;  %331 = vst.msk [vmem:[#allocation4 + $0x48] sm:$0xff] %vm193_vm1, %v4193_v35 }
  0x50   :  { %332 = vst.msk [vmem:[#allocation4 + $0x50] sm:$0xff] %vm193_vm1, %v4193_v35  ;;  %333 = vst.msk [vmem:[#allocation4 + $0x58] sm:$0xff] %vm193_vm1, %v4193_v35 }
  0x51   :  { %334 = vst.msk [vmem:[#allocation4 + $0x60] sm:$0xff] %vm193_vm1, %v4193_v35  ;;  %335 = vst.msk [vmem:[#allocation4 + $0x68] sm:$0xff] %vm193_vm1, %v4193_v35 }
  0x52   :  { %336 = vst.msk [vmem:[#allocation4 + $0x70] sm:$0xff] %vm193_vm1, %v4193_v35  ;;  %337 = vst.msk [vmem:[#allocation4 + $0x78] sm:$0xff] %vm193_vm1, %v4193_v35 }
  0x53   :  { %338 = vst.msk [vmem:[#allocation4 + $0x80] sm:$0xff] %vm193_vm1, %v4193_v35  ;;  %339 = vst.msk [vmem:[#allocation4 + $0x88] sm:$0xff] %vm193_vm1, %v4193_v35 }
  0x54   :  { %340 = vst.msk [vmem:[#allocation4 + $0x90] sm:$0xff] %vm193_vm1, %v4193_v35  ;;  %341 = vst.msk [vmem:[#allocation4 + $0x98] sm:$0xff] %vm193_vm1, %v4193_v35 }
  0x55   :  { %342 = vst.msk [vmem:[#allocation4 + $0xa0] sm:$0xff] %vm193_vm1, %v4193_v35  ;;  %343 = vst.msk [vmem:[#allocation4 + $0xa8] sm:$0xff] %vm193_vm1, %v4193_v35 }
  0x56   :  { %344 = vst.msk [vmem:[#allocation4 + $0xb0] sm:$0xff] %vm193_vm1, %v4193_v35  ;;  %345 = vst.msk [vmem:[#allocation4 + $0xb8] sm:$0xff] %vm193_vm1, %v4193_v35 }
  0x57   :  { %346 = vst.msk [vmem:[#allocation4 + $0xc0] sm:$0xff] %vm193_vm1, %v4193_v35  ;;  %347 = vst.msk [vmem:[#allocation4 + $0xc8] sm:$0xff] %vm193_vm1, %v4193_v35 }
  0x58   :  { %348 = vst.msk [vmem:[#allocation4 + $0xd0] sm:$0xff] %vm193_vm1, %v4193_v35  ;;  %349 = vst.msk [vmem:[#allocation4 + $0xd8] sm:$0xff] %vm193_vm1, %v4193_v35 }
  0x59   :  { %350 = vst.msk [vmem:[#allocation4 + $0xe0] sm:$0xff] %vm193_vm1, %v4193_v35  ;;  %351 = vst.msk [vmem:[#allocation4 + $0xe8] sm:$0xff] %vm193_vm1, %v4193_v35 }
  0x5a   :  { %352 = vst.msk [vmem:[#allocation4 + $0xf0] sm:$0xff] %vm193_vm1, %v4193_v35  ;;  %353 = vst.msk [vmem:[#allocation4 + $0xf8] sm:$0xff] %vm193_vm1, %v4193_v35 }
  0x5b   :  { %354 = vst.msk [vmem:[#allocation4 + $0x100] sm:$0xff] %vm193_vm1, %v4193_v35  ;;  %355 = vst.msk [vmem:[#allocation4 + $0x108] sm:$0xff] %vm193_vm1, %v4193_v35 }
  0x5c   :  { %356 = vst.msk [vmem:[#allocation4 + $0x110] sm:$0xff] %vm193_vm1, %v4193_v35  ;;  %357 = vst.msk [vmem:[#allocation4 + $0x118] sm:$0xff] %vm193_vm1, %v4193_v35 }
  0x5d   :  { %358 = vst.msk [vmem:[#allocation4 + $0x120] sm:$0xff] %vm193_vm1, %v4193_v35  ;;  %359 = vst.msk [vmem:[#allocation4 + $0x128] sm:$0xff] %vm193_vm1, %v4193_v35 }
  0x5e   :  { %360 = vst.msk [vmem:[#allocation4 + $0x130] sm:$0xff] %vm193_vm1, %v4193_v35  ;;  %361 = vst.msk [vmem:[#allocation4 + $0x138] sm:$0xff] %vm193_vm1, %v4193_v35 }
  0x5f   :  { %362 = vst.msk [vmem:[#allocation4 + $0x140] sm:$0xff] %vm193_vm1, %v4193_v35  ;;  %363 = vst.msk [vmem:[#allocation4 + $0x148] sm:$0xff] %vm193_vm1, %v4193_v35 }
  0x60   :  { %364 = vst.msk [vmem:[#allocation4 + $0x150] sm:$0xff] %vm193_vm1, %v4193_v35  ;;  %365 = vst.msk [vmem:[#allocation4 + $0x158] sm:$0xff] %vm193_vm1, %v4193_v35 }
  0x61   :  { %366 = vst.msk [vmem:[#allocation4 + $0x160] sm:$0xff] %vm193_vm1, %v4193_v35  ;;  %367 = vst.msk [vmem:[#allocation4 + $0x168] sm:$0xff] %vm193_vm1, %v4193_v35 }
  0x62   :  { %368 = vst.msk [vmem:[#allocation4 + $0x170] sm:$0xff] %vm193_vm1, %v4193_v35  ;;  %369 = vst.msk [vmem:[#allocation4 + $0x178] sm:$0xff] %vm193_vm1, %v4193_v35 }
  0x63   :  { %370 = vst.msk [vmem:[#allocation4 + $0x180] sm:$0xff] %vm193_vm1, %v4193_v35  ;;  %371 = vst.msk [vmem:[#allocation4 + $0x188] sm:$0xff] %vm193_vm1, %v4193_v35 }
  0x64   :  { %372 = vst.msk [vmem:[#allocation4 + $0x190] sm:$0xff] %vm193_vm1, %v4193_v35  ;;  %373 = vst.msk [vmem:[#allocation4 + $0x198] sm:$0xff] %vm193_vm1, %v4193_v35 }
  0x65   :  { %374 = vst.msk [vmem:[#allocation4 + $0x1a0] sm:$0xff] %vm193_vm1, %v4193_v35  ;;  %375 = vst.msk [vmem:[#allocation4 + $0x1a8] sm:$0xff] %vm193_vm1, %v4193_v35 }
  0x66   :  { %376 = vst.msk [vmem:[#allocation4 + $0x1b0] sm:$0xff] %vm193_vm1, %v4193_v35  ;;  %377 = vst.msk [vmem:[#allocation4 + $0x1b8] sm:$0xff] %vm193_vm1, %v4193_v35 }
  0x67   :  { %378 = vst.msk [vmem:[#allocation4 + $0x1c0] sm:$0xff] %vm193_vm1, %v4193_v35  ;;  %379 = vst.msk [vmem:[#allocation4 + $0x1c8] sm:$0xff] %vm193_vm1, %v4193_v35 }
  0x68   :  { %380 = vst.msk [vmem:[#allocation4 + $0x1d0] sm:$0xff] %vm193_vm1, %v4193_v35  ;;  %381 = vst.msk [vmem:[#allocation4 + $0x1d8] sm:$0xff] %vm193_vm1, %v4193_v35 }
  0x69   :  { %382 = vst.msk [vmem:[#allocation4 + $0x1e0] sm:$0xff] %vm193_vm1, %v4193_v35  ;;  %383 = vst.msk [vmem:[#allocation4 + $0x1e8] sm:$0xff] %vm193_vm1, %v4193_v35 }
  0x6a   :  { %384 = vst.msk [vmem:[#allocation4 + $0x1f0] sm:$0xff] %vm193_vm1, %v4193_v35  ;;  %385 = vst.msk [vmem:[#allocation4 + $0x1f8] sm:$0xff] %vm193_vm1, %v4193_v35 }
  0x6b   :  { %386 = vst.msk [vmem:[#allocation4 + $0x200] sm:$0xff] %vm193_vm1, %v4193_v35  ;;  %387 = vst.msk [vmem:[#allocation4 + $0x208] sm:$0xff] %vm193_vm1, %v4193_v35 }
  0x6c   :  { %388 = vst.msk [vmem:[#allocation4 + $0x210] sm:$0xff] %vm193_vm1, %v4193_v35  ;;  %389 = vst.msk [vmem:[#allocation4 + $0x218] sm:$0xff] %vm193_vm1, %v4193_v35 }
  0x6d   :  { %390 = vst.msk [vmem:[#allocation4 + $0x220] sm:$0xff] %vm193_vm1, %v4193_v35  ;;  %391 = vst.msk [vmem:[#allocation4 + $0x228] sm:$0xff] %vm193_vm1, %v4193_v35 }
  0x6e   :  { %392 = vst.msk [vmem:[#allocation4 + $0x230] sm:$0xff] %vm193_vm1, %v4193_v35  ;;  %393 = vst.msk [vmem:[#allocation4 + $0x238] sm:$0xff] %vm193_vm1, %v4193_v35 }
  0x6f   :  { %394 = vst.msk [vmem:[#allocation4 + $0x240] sm:$0xff] %vm193_vm1, %v4193_v35  ;;  %395 = vst.msk [vmem:[#allocation4 + $0x248] sm:$0xff] %vm193_vm1, %v4193_v35 }
  0x70   :  { %396 = vst.msk [vmem:[#allocation4 + $0x250] sm:$0xff] %vm193_vm1, %v4193_v35  ;;  %397 = vst.msk [vmem:[#allocation4 + $0x258] sm:$0xff] %vm193_vm1, %v4193_v35 }
  0x71   :  { %398 = vst.msk [vmem:[#allocation4 + $0x260] sm:$0xff] %vm193_vm1, %v4193_v35  ;;  %399 = vst.msk [vmem:[#allocation4 + $0x268] sm:$0xff] %vm193_vm1, %v4193_v35 }
  0x72   :  { %400 = vst.msk [vmem:[#allocation4 + $0x270] sm:$0xff] %vm193_vm1, %v4193_v35  ;;  %401 = vst.msk [vmem:[#allocation4 + $0x278] sm:$0xff] %vm193_vm1, %v4193_v35 }
  0x73   :  { %402 = vst.msk [vmem:[#allocation4 + $0x280] sm:$0xff] %vm193_vm1, %v4193_v35  ;;  %403 = vst.msk [vmem:[#allocation4 + $0x288] sm:$0xff] %vm193_vm1, %v4193_v35 }
  0x74   :  { %404 = vst.msk [vmem:[#allocation4 + $0x290] sm:$0xff] %vm193_vm1, %v4193_v35  ;;  %405 = vst.msk [vmem:[#allocation4 + $0x298] sm:$0xff] %vm193_vm1, %v4193_v35 }
  0x75   :  { %406 = vst.msk [vmem:[#allocation4 + $0x2a0] sm:$0xff] %vm193_vm1, %v4193_v35  ;;  %407 = vst.msk [vmem:[#allocation4 + $0x2a8] sm:$0xff] %vm193_vm1, %v4193_v35 }
  0x76   :  { %408 = vst.msk [vmem:[#allocation4 + $0x2b0] sm:$0xff] %vm193_vm1, %v4193_v35  ;;  %409 = vst.msk [vmem:[#allocation4 + $0x2b8] sm:$0xff] %vm193_vm1, %v4193_v35 }
  0x77   :  { %410 = vst.msk [vmem:[#allocation4 + $0x2c0] sm:$0xff] %vm193_vm1, %v4193_v35  ;;  %411 = vst.msk [vmem:[#allocation4 + $0x2c8] sm:$0xff] %vm193_vm1, %v4193_v35 }
  0x78   :  { %412 = vst.msk [vmem:[#allocation4 + $0x2d0] sm:$0xff] %vm193_vm1, %v4193_v35  ;;  %413 = vst.msk [vmem:[#allocation4 + $0x2d8] sm:$0xff] %vm193_vm1, %v4193_v35 }
  0x79   :  { %414 = vst.msk [vmem:[#allocation4 + $0x2e0] sm:$0xff] %vm193_vm1, %v4193_v35  ;;  %415 = vst.msk [vmem:[#allocation4 + $0x2e8] sm:$0xff] %vm193_vm1, %v4193_v35 }
  0x7a   :  { %416 = vst.msk [vmem:[#allocation4 + $0x2f0] sm:$0xff] %vm193_vm1, %v4193_v35  ;;  %417 = vst.msk [vmem:[#allocation4 + $0x2f8] sm:$0xff] %vm193_vm1, %v4193_v35 }
  0x7b   :  { %418 = vst.msk [vmem:[#allocation4 + $0x300] sm:$0xff] %vm193_vm1, %v4193_v35  ;;  %419 = vst.msk [vmem:[#allocation4 + $0x308] sm:$0xff] %vm193_vm1, %v4193_v35 }
  0x7c   :  { %420 = vst.msk [vmem:[#allocation4 + $0x310] sm:$0xff] %vm193_vm1, %v4193_v35  ;;  %421 = vst.msk [vmem:[#allocation4 + $0x318] sm:$0xff] %vm193_vm1, %v4193_v35 }
  0x7d   :  { %422 = vst.msk [vmem:[#allocation4 + $0x320] sm:$0xff] %vm193_vm1, %v4193_v35  ;;  %423 = vst.msk [vmem:[#allocation4 + $0x328] sm:$0xff] %vm193_vm1, %v4193_v35 }
  0x7e   :  { %424 = vst.msk [vmem:[#allocation4 + $0x330] sm:$0xff] %vm193_vm1, %v4193_v35  ;;  %425 = vst.msk [vmem:[#allocation4 + $0x338] sm:$0xff] %vm193_vm1, %v4193_v35 }
  0x7f   :  { %426 = vst.msk [vmem:[#allocation4 + $0x340] sm:$0xff] %vm193_vm1, %v4193_v35  ;;  %427 = vst.msk [vmem:[#allocation4 + $0x348] sm:$0xff] %vm193_vm1, %v4193_v35 }
  0x80   :  { %428 = vst.msk [vmem:[#allocation4 + $0x350] sm:$0xff] %vm193_vm1, %v4193_v35  ;;  %429 = vst.msk [vmem:[#allocation4 + $0x358] sm:$0xff] %vm193_vm1, %v4193_v35 }
  0x81   :  { %430 = vst.msk [vmem:[#allocation4 + $0x360] sm:$0xff] %vm193_vm1, %v4193_v35  ;;  %431 = vst.msk [vmem:[#allocation4 + $0x368] sm:$0xff] %vm193_vm1, %v4193_v35 }
  0x82   :  { %432 = vst.msk [vmem:[#allocation4 + $0x370] sm:$0xff] %vm193_vm1, %v4193_v35  ;;  %433 = vst.msk [vmem:[#allocation4 + $0x378] sm:$0xff] %vm193_vm1, %v4193_v35 }
  0x83   :  { %434 = vst.msk [vmem:[#allocation4 + $0x380] sm:$0xff] %vm193_vm1, %v4193_v35  ;;  %435 = vst.msk [vmem:[#allocation4 + $0x388] sm:$0xff] %vm193_vm1, %v4193_v35 }
  0x84   :  { %436 = vst.msk [vmem:[#allocation4 + $0x390] sm:$0xff] %vm193_vm1, %v4193_v35  ;;  %437 = vst.msk [vmem:[#allocation4 + $0x398] sm:$0xff] %vm193_vm1, %v4193_v35 }
  0x85   :  { %438 = vst.msk [vmem:[#allocation4 + $0x3a0] sm:$0xff] %vm193_vm1, %v4193_v35  ;;  %439 = vst.msk [vmem:[#allocation4 + $0x3a8] sm:$0xff] %vm193_vm1, %v4193_v35 }
  0x86   :  { %440 = vst.msk [vmem:[#allocation4 + $0x3b0] sm:$0xff] %vm193_vm1, %v4193_v35  ;;  %441 = vst.msk [vmem:[#allocation4 + $0x3b8] sm:$0xff] %vm193_vm1, %v4193_v35 }
  0x87   :  { %442 = vst.msk [vmem:[#allocation4 + $0x3c0] sm:$0xff] %vm193_vm1, %v4193_v35  ;;  %443 = vst.msk [vmem:[#allocation4 + $0x3c8] sm:$0xff] %vm193_vm1, %v4193_v35 }
  0x88   :  { %444 = vst.msk [vmem:[#allocation4 + $0x3d0] sm:$0xff] %vm193_vm1, %v4193_v35  ;;  %445 = vst.msk [vmem:[#allocation4 + $0x3d8] sm:$0xff] %vm193_vm1, %v4193_v35 }
  0x89   :  { %446 = vst.msk [vmem:[#allocation4 + $0x3e0] sm:$0xff] %vm193_vm1, %v4193_v35  ;;  %447 = vst.msk [vmem:[#allocation4 + $0x3e8] sm:$0xff] %vm193_vm1, %v4193_v35 }
  0x8a   :  { %448 = vst.msk [vmem:[#allocation4 + $0x3f0] sm:$0xff] %vm193_vm1, %v4193_v35  ;;  %449 = vst.msk [vmem:[#allocation4 + $0x3f8] sm:$0xff] %vm193_vm1, %v4193_v35 }
  0x8b   :  { %463 = vst.msk [vmem:[#allocation3 + $0x8] sm:$0x1] %vm462_vm2, %v461_v63  ;;  %587 = vst.msk [vmem:[#allocation3 + $0x208] sm:$0x1] %vm462_vm2, %v586_v14  ;;  %v757_v63 = vld [vmem:[#allocation3 + $0x1a8] sm:$0xff]  ;;  %v782_v14 = vld [vmem:[#allocation3 + $0x270] sm:$0xff] }
  0x92   :  { %v705_v2 = vld [vmem:[#allocation3 + $0x8] sm:$0xff] }
  0x93   :  { %v60_v4 = vpop.xlane.xlu0 %59 }
  0x94   :  { %v65_v5 = vmul.f32 0.03125, %v60_v4  ;;  %v3025_v4 = vld [vmem:[%s5558_s4] ss:$0 sm:$0xff]  ;;  %s4195_s4 = smov 80  }
  0x96   :  { %v67_v6 = vsub.f32 %v53_v0, %v65_v5  ;;  %v706_v0 = vld [vmem:[#allocation3 + $0x10] sm:$0xff] }
  0x97   :  { %v63_v7 = vpop.xlane.xlu0 %62  ;;  %3525 = vmatpush3.xpose.msk.msra.mxu1 %vm193_vm1, %v706_v0 }
  0x98   :  { %v66_v8 = vmul.f32 0.03125, %v63_v7  ;;  %v69_v9 = vmul.f32 %v67_v6, %v67_v6  ;;  %3526 = vmatprep.subr.mxu1 %v4193_v35 }
  0x9a   :  { %v68_v10 = vsub.f32 %v54_v1, %v66_v8  ;;  %v71_v11 = vsel %vm57_vm0, %v69_v9, 0.0  ;;  %v723_v1 = vld [vmem:[#allocation3 + $0x98] sm:$0xff] }
  0x9b   :  { %72 = vadd.xlane.f32.xlu1 %v71_v11  ;;  %v489_v36 = vpop.permute.xlu0 %488  ;;  %3527 = vmatpush3.xpose.msk.msra.mxu1 %vm193_vm1, %v705_v2  ;;  %v756_v2 = vld [vmem:[#allocation3 + $0x1a0] sm:$0xff] }
  0x9c   :  { %v70_v12 = vmul.f32 %v68_v10, %v68_v10  ;;  %491 = vst.msk [vmem:[#allocation3 + $0x88] sm:$0x1] %vm462_vm2, %v489_v36  ;;  %3528 = vmatprep.subr.mxu1 %v4193_v35 }
  0x9e   :  { %v74_v13 = vsel %vm57_vm0, %v70_v12, 0.0  ;;  %v3033_v12 = vld [vmem:[%s5560_s6] ss:$0 sm:$0xff] }
  0x9f   :  { %75 = vadd.xlane.f32.xlu1 %v74_v13  ;;  %v524_v62 = vpop.permute.xlu0 %523  ;;  %v3029_v13 = vld [vmem:[%s5560_s6] ss:$0 sm:$0xff] }
  0xa0   :  { %526 = vst.msk [vmem:[#allocation3 + $0x108] sm:$0x1] %vm462_vm2, %v524_v62  ;;  %v740_v62 = vld [vmem:[#allocation3 + $0x120] sm:$0xff] }
  0xa3   :  { %v721_v5 = vld [vmem:[#allocation3 + $0x88] sm:$0xff] }
 0x124   :  { %v73_v19 = vpop.xlane.xlu1 %72 }
 0x125   :  { %v77_v20 = vmul.f32 0.03125, %v73_v19 }
 0x127   :  { %v79_v21 = vadd.f32 1e-05, %v77_v20 }
 0x128   :  { %v76_v22 = vpop.xlane.xlu1 %75 }
 0x129   :  { %4118 = vrsqrt.f32 %v79_v21  ;;  %v78_v23 = vmul.f32 0.03125, %v76_v22  ;;  %v751_v22 = vld [vmem:[#allocation3 + $0x178] sm:$0xff] }
 0x12b   :  { %v80_v24 = vadd.f32 1e-05, %v78_v23 }
 0x12d   :  { %4120 = vrsqrt.f32 %v80_v24 }
 0x136   :  { %v4119_v25 = vpop.eup %4118 }
 0x137   :  { %v83_v27 = vmul.f32 %v4119_v25, %v67_v6 }
 0x139   :  { %v91_v29 = vmul.f32 %v3023_v26, %v83_v27  ;;  %v750_v27 = vld [vmem:[#allocation3 + $0x170] sm:$0xff] }
 0x13a   :  { %v4121_v30 = vpop.eup %4120 }
 0x13b   :  { %v84_v31 = vmul.f32 %v4121_v30, %v68_v10  ;;  %v99_v32 = vadd.f32 %v3024_v28, %v91_v29 }
 0x13d   :  { %v92_v33 = vmul.f32 %v3023_v26, %v84_v31  ;;  %3495 = vmatprep.mubr.msk.f32.mxu0 %vm57_vm0, %v99_v32  ;;  %v749_v32 = vld [vmem:[#allocation3 + $0x168] sm:$0xff] }
 0x13f   :  { %v100_v34 = vadd.f32 %v3024_v28, %v92_v33  ;;  %v767_v28 = vld [vmem:[#allocation3 + $0x1f8] sm:$0xff]  ;;  %v766_v33 = vld [vmem:[#allocation3 + $0x1f0] sm:$0xff] }
 0x141   :  { %3496 = vmatmul.mubr.msk.f32.vlgmr.msra.gmra.mxu0 %vm57_vm0, %v100_v34 }
 0x142   :  { %3534 = vmatpush3.xpose.msk.msra.mxu0 %vm193_vm1, %v735_v38  ;;  %3565 = vmatprep.mubr.msk.f32.mxu0 %vm4194_vm3, %v4193_v35  ;;  %v765_v38 = vld [vmem:[#allocation3 + $0x1e8] sm:$0xff] }
 0x143   :  { %3535 = vmatprep.subr.mxu0 %v4193_v35 }
 0x146   :  { %3536 = vmatpush3.xpose.msk.msra.mxu0 %vm193_vm1, %v734_v40 }
 0x147   :  { %3537 = vmatprep.subr.mxu0 %v4193_v35 }
 0x14a   :  { %3538 = vmatpush3.xpose.msk.msra.mxu0 %vm193_vm1, %v733_v42  ;;  %v764_v42 = vld [vmem:[#allocation3 + $0x1e0] sm:$0xff] }
 0x14b   :  { %3539 = vmatprep.subr.mxu0 %v4193_v35 }
 0x14e   :  { %3540 = vmatpush3.xpose.msk.msra.mxu0 %vm193_vm1, %v732_v44  ;;  %v746_v44 = vld [vmem:[#allocation3 + $0x150] sm:$0xff] }
 0x14f   :  { %3541 = vmatprep.subr.mxu0 %v4193_v35 }
 0x152   :  { %3542 = vmatpush3.xpose.msk.msra.mxu0 %vm193_vm1, %v731_v46 }
 0x153   :  { %3543 = vmatprep.subr.mxu0 %v4193_v35 }
 0x156   :  { %3544 = vmatpush3.xpose.msk.msra.mxu0 %vm193_vm1, %v730_v48  ;;  %v762_v48 = vld [vmem:[#allocation3 + $0x1d0] sm:$0xff] }
 0x157   :  { %3545 = vmatprep.subr.mxu0 %v4193_v35 }
 0x15a   :  { %3546 = vmatpush3.xpose.msk.msra.mxu0 %vm193_vm1, %v729_v50  ;;  %v744_v50 = vld [vmem:[#allocation3 + $0x140] sm:$0xff] }
 0x15b   :  { %3547 = vmatprep.subr.mxu0 %v4193_v35 }
 0x15e   :  { %3548 = vmatpush3.xpose.msk.msra.mxu0 %vm193_vm1, %v728_v52 }
 0x15f   :  { %3549 = vmatprep.subr.mxu0 %v4193_v35 }
 0x162   :  { %3550 = vmatpush3.xpose.msk.msra.mxu0 %vm193_vm1, %v727_v54  ;;  %v760_v54 = vld [vmem:[#allocation3 + $0x1c0] sm:$0xff] }
 0x163   :  { %3551 = vmatprep.subr.mxu0 %v4193_v35 }
 0x166   :  { %3552 = vmatpush3.xpose.msk.msra.mxu0 %vm193_vm1, %v726_v56  ;;  %v742_v56 = vld [vmem:[#allocation3 + $0x130] sm:$0xff] }
 0x167   :  { %3553 = vmatprep.subr.mxu0 %v4193_v35 }
 0x16a   :  { %3554 = vmatpush3.xpose.msk.msra.mxu0 %vm193_vm1, %v725_v58 }
 0x16b   :  { %3555 = vmatprep.subr.mxu0 %v4193_v35 }
 0x16e   :  { %3556 = vmatpush3.xpose.msk.msra.mxu0 %vm193_vm1, %v724_v60  ;;  %v758_v60 = vld [vmem:[#allocation3 + $0x1b0] sm:$0xff] }
 0x16f   :  { %3557 = vmatprep.subr.mxu0 %v4193_v35 }
 0x172   :  { %3558 = vmatpush3.xpose.msk.msra.mxu0 %vm193_vm1, %v723_v1  ;;  %v739_v1 = vld [vmem:[#allocation3 + $0x118] sm:$0xff] }
 0x173   :  { %3559 = vmatprep.subr.mxu0 %v4193_v35 }
 0x176   :  { %3560 = vmatpush3.xpose.msk.msra.mxu0 %vm193_vm1, %v722_v3  ;;  %v738_v3 = vld [vmem:[#allocation3 + $0x110] sm:$0xff] }
 0x177   :  { %3561 = vmatprep.subr.mxu0 %v4193_v35 }
 0x17a   :  { %3562 = vmatpush3.xpose.msk.msra.mxu0 %vm193_vm1, %v721_v5  ;;  %v737_v5 = vld [vmem:[#allocation3 + $0x108] sm:$0xff] }
 0x17b   :  { %3563 = vmatprep.subr.mxu0 %v4193_v35 }
 0x201   :  { %v3497_v6 = vpop.f32.mrf.mxu0 }
 0x202   :  { %v4916_v7 = vadd.f32 %v3497_v6, %v3025_v4  ;;  %v754_v6 = vld [vmem:[#allocation3 + $0x190] sm:$0xff] }
 0x203   :  { %v184_v8 = vpop.f32.mrf.mxu0 }
 0x204   :  { %v4923_v9 = vadd.f32 %v3025_v4, %v184_v8  ;;  %v572_v10 = vmul.f32 0.35355338, %v4916_v7  ;;  %v755_v4 = vld [vmem:[#allocation3 + $0x198] sm:$0xff] }
 0x206   :  { %507 = vrot.lane.b32.xlu0 %v4923_v9, %s4195_s4  ;;  %453 = vrot.lane.b32.xlu1 %v4923_v9, %s4196_s29  ;;  %v450_v11 = vmul.f32 0.35355338, %v4923_v9  ;;  %574 = vst.msk [vmem:[#allocation2 + $0x20] sm:$0xff] %vm193_vm1, %v572_v10 }
 0x208   :  { %451 = vst.msk [vmem:[#allocation2] sm:$0xff] %vm193_vm1, %v450_v11 }
 0x20a   :  { %472 = vrot.lane.b32.xlu1 %v4923_v9, %s4197_s30  ;;  %502 = vrot.lane.b32.xlu0 %v450_v11, %s4192_s26 }
 0x20e   :  { %612 = vrot.lane.b32.xlu0 %v4320_v18, %s4191_s21  ;;  %467 = vrot.lane.b32.xlu1 %v450_v11, %s4191_s21 }
 0x20f   :  { %v696_v23 = vld [vmem:[#allocation2] sm:$0xff] }
 0x212   :  { %596 = vrot.lane.b32.xlu0 %v4916_v7, %s4197_s30  ;;  %558 = vrot.lane.b32.xlu1 %v4320_v18, %s4198_s0 }
 0x216   :  { %647 = vrot.lane.b32.xlu0 %v4320_v18, %s4192_s26  ;;  %542 = vrot.lane.b32.xlu1 %v4923_v9, %s4199_s17 }
 0x21a   :  { %631 = vrot.lane.b32.xlu0 %v4916_v7, %s4195_s4  ;;  %537 = vrot.lane.b32.xlu1 %v450_v11, %s4198_s0  ;;  %v783_v11 = vld [vmem:[#allocation3 + $0x278] sm:$0xff] }
 0x21e   :  { %626 = vrot.lane.b32.xlu0 %v572_v10, %s4192_s26  ;;  %576 = vrot.lane.b32.xlu1 %v4916_v7, %s4196_s29 }
 0x222   :  { %591 = vrot.lane.b32.xlu1 %v572_v10, %s4191_s21  ;;  %498 = vrot.lane.b32.xlu0 %v3029_v13, %s4191_s21 }
 0x226   :  { %682 = vrot.lane.b32.xlu1 %v4320_v18, %s4198_s0  ;;  %533 = vrot.lane.b32.xlu0 %v3029_v13, %s4192_s26 }
 0x22a   :  { %666 = vrot.lane.b32.xlu1 %v4916_v7, %s4199_s17 }
 0x22e   :  { %661 = vrot.lane.b32.xlu1 %v572_v10, %s4198_s0 }
 0x232   :  { %457 = vrot.lane.b32.xlu1 %v4923_v9, %s4200_s18 }
 0x236   :  { %477 = vrot.lane.b32.xlu1 %v4923_v9, %s4201_s19 }
 0x23a   :  { %568 = vrot.lane.b32.xlu1 %v3033_v12, %s4198_s0 }
 0x23e   :  { %512 = vrot.lane.b32.xlu1 %v4923_v9, %s4202_s22 }
 0x278   :  { %v454_v15 = vpop.permute.xlu1 %453  ;;  %v508_v16 = vpop.permute.xlu0 %507 }
 0x279   :  { %456 = vst.msk [vmem:[#allocation3] sm:$0xff] %vm193_vm1, %v454_v15  ;;  %511 = vst.msk [vmem:[#allocation3 + $0x100] sm:$0xff] %vm193_vm1, %v508_v16  ;;  %v799_v15 = vld [vmem:[#allocation3 + $0x2f8] sm:$0xff] }
 0x27c   :  { %v473_v17 = vpop.permute.xlu1 %472  ;;  %v503_v18 = vpop.permute.xlu0 %502 }
 0x27d   :  { %476 = vst.msk [vmem:[#allocation3 + $0x80] sm:$0xff] %vm193_vm1, %v473_v17  ;;  %506 = vst.msk [vmem:[#allocation2 + $0x10] sm:$0xff] %vm193_vm1, %v503_v18  ;;  %v781_v17 = vld [vmem:[#allocation3 + $0x268] sm:$0xff]  ;;  %v798_v18 = vld [vmem:[#allocation3 + $0x2f0] sm:$0xff] }
 0x280   :  { %v468_v19 = vpop.permute.xlu1 %467  ;;  %v613_v20 = vpop.permute.xlu0 %612  ;;  %v704_v21 = vld [vmem:[#allocation3] sm:$0xff] }
 0x281   :  { %471 = vst.msk [vmem:[#allocation2 + $0x8] sm:$0xff] %vm193_vm1, %v468_v19  ;;  %3529 = vmatpush3.xpose.msk.msra.mxu1 %vm193_vm1, %v704_v21  ;;  %v736_v10 = vld [vmem:[#allocation3 + $0x100] sm:$0xff]  ;;  %v779_v21 = vld [vmem:[#allocation3 + $0x258] sm:$0xff] }
 0x282   :  { %615 = vst.msk [vmem:[#allocation3 + $0x288] sm:$0x1] %vm462_vm2, %v613_v20  ;;  %3568 = vmatprep.subr.mxu1 %v4193_v35  ;;  %v780_v19 = vld [vmem:[#allocation3 + $0x260] sm:$0xff]  ;;  %v797_v20 = vld [vmem:[#allocation3 + $0x2e8] sm:$0xff] }
 0x284   :  { %v559_v24 = vpop.permute.xlu1 %558  ;;  %3531 = vmatmul.mubr.msk.f32.vlgmr.msra.gmra.mxu1 %vm193_vm1, %v696_v23  ;;  %v597_v25 = vpop.permute.xlu0 %596  ;;  %v720_v26 = vld [vmem:[#allocation3 + $0x80] sm:$0xff]  ;;  %v698_v12 = vld [vmem:[#allocation2 + $0x10] sm:$0xff] }
 0x285   :  { %561 = vst.msk [vmem:[#allocation3 + $0x188] sm:$0x1] %vm462_vm2, %v559_v24  ;;  %3564 = vmatpush3.xpose.msk.msra.mxu0 %vm193_vm1, %v720_v26  ;;  %3569 = vmatpush3.xpose.msk.msra.mxu1 %vm193_vm1, %v751_v22  ;;  %v796_v22 = vld [vmem:[#allocation3 + $0x2e0] sm:$0xff]  ;;  %v778_v23 = vld [vmem:[#allocation3 + $0x250] sm:$0xff]  ;;  %v795_v24 = vld [vmem:[#allocation3 + $0x2d8] sm:$0xff] }
 0x286   :  { %600 = vst.msk [vmem:[#allocation3 + $0x280] sm:$0xff] %vm193_vm1, %v597_v25  ;;  %3570 = vmatprep.subr.mxu1 %v4193_v35  ;;  %3603 = vmatprep.subr.mxu0 %v4193_v35  ;;  %v777_v25 = vld [vmem:[#allocation3 + $0x248] sm:$0xff]  ;;  %v464_v26 = vld [vmem:[%s5560_s6] sm:$0x1] }
 0x287   :  { %3600 = vmatprep.mubr.msk.f32.mxu1 %vm4194_vm3, %v4193_v35  ;;  %465 = vst.msk [vmem:[#allocation4 + $0x8] sm:$0x1] %vm462_vm2, %v464_v26 }
 0x288   :  { %v543_v29 = vpop.permute.xlu1 %542  ;;  %v648_v30 = vpop.permute.xlu0 %647  ;;  %v697_v31 = vld [vmem:[#allocation2 + $0x8] sm:$0xff] }
 0x289   :  { %546 = vst.msk [vmem:[#allocation3 + $0x180] sm:$0xff] %vm193_vm1, %v543_v29  ;;  %3566 = vmatmul.mubr.msk.f32.vlgmr.msra.gmra.mxu0 %vm193_vm1, %v697_v31  ;;  %3571 = vmatpush3.xpose.msk.msra.mxu1 %vm193_vm1, %v750_v27  ;;  %v794_v27 = vld [vmem:[#allocation3 + $0x2d0] sm:$0xff]  ;;  %v775_v31 = vld [vmem:[#allocation3 + $0x238] sm:$0xff] }
 0x28a   :  { %650 = vst.msk [vmem:[#allocation3 + $0x308] sm:$0x1] %vm462_vm2, %v648_v30  ;;  %3604 = vmatpush3.xpose.msk.msra.mxu0 %vm193_vm1, %v767_v28  ;;  %3572 = vmatprep.subr.mxu1 %v4193_v35  ;;  %v776_v28 = vld [vmem:[#allocation3 + $0x240] sm:$0xff]  ;;  %v793_v30 = vld [vmem:[#allocation3 + $0x2c8] sm:$0xff] }
 0x28b   :  { %3605 = vmatprep.subr.mxu0 %v4193_v35  ;;  %3635 = vmatprep.mubr.msk.f32.mxu0 %vm4194_vm3, %v4193_v35 }
 0x28c   :  { %v538_v34 = vpop.permute.xlu1 %537  ;;  %v632_v36 = vpop.permute.xlu0 %631  ;;  %v753_v8 = vld [vmem:[#allocation3 + $0x188] sm:$0xff] }
 0x28d   :  { %541 = vst.msk [vmem:[#allocation2 + $0x18] sm:$0xff] %vm193_vm1, %v538_v34  ;;  %635 = vst.msk [vmem:[#allocation3 + $0x300] sm:$0xff] %vm193_vm1, %v632_v36  ;;  %3573 = vmatpush3.xpose.msk.msra.mxu1 %vm193_vm1, %v749_v32  ;;  %v792_v32 = vld [vmem:[#allocation3 + $0x2c0] sm:$0xff]  ;;  %v791_v34 = vld [vmem:[#allocation3 + $0x2b8] sm:$0xff] }
 0x28e   :  { %3606 = vmatpush3.xpose.msk.msra.mxu0 %vm193_vm1, %v766_v33  ;;  %3574 = vmatprep.subr.mxu1 %v4193_v35  ;;  %v774_v33 = vld [vmem:[#allocation3 + $0x230] sm:$0xff]  ;;  %v773_v36 = vld [vmem:[#allocation3 + $0x228] sm:$0xff] }
 0x28f   :  { %3607 = vmatprep.subr.mxu0 %v4193_v35 }
 0x290   :  { %v577_v39 = vpop.permute.xlu1 %576  ;;  %v627_v40 = vpop.permute.xlu0 %626  ;;  %v752_v13 = vld [vmem:[#allocation3 + $0x180] sm:$0xff] }
 0x291   :  { %580 = vst.msk [vmem:[#allocation3 + $0x200] sm:$0xff] %vm193_vm1, %v577_v39  ;;  %630 = vst.msk [vmem:[#allocation2 + $0x30] sm:$0xff] %vm193_vm1, %v627_v40  ;;  %3575 = vmatpush3.xpose.msk.msra.mxu1 %vm193_vm1, %v748_v37  ;;  %v790_v37 = vld [vmem:[#allocation3 + $0x2b0] sm:$0xff]  ;;  %v789_v39 = vld [vmem:[#allocation3 + $0x2a8] sm:$0xff] }
 0x292   :  { %3608 = vmatpush3.xpose.msk.msra.mxu0 %vm193_vm1, %v765_v38  ;;  %3576 = vmatprep.subr.mxu1 %v4193_v35  ;;  %v772_v38 = vld [vmem:[#allocation3 + $0x220] sm:$0xff]  ;;  %v771_v40 = vld [vmem:[#allocation3 + $0x218] sm:$0xff] }
 0x293   :  { %3609 = vmatprep.subr.mxu0 %v4193_v35 }
 0x294   :  { %v592_v43 = vpop.permute.xlu1 %591  ;;  %v699_v16 = vld [vmem:[#allocation2 + $0x18] sm:$0xff]  ;;  %v499_v29 = vpop.permute.xlu0 %498 }
 0x295   :  { %595 = vst.msk [vmem:[#allocation2 + $0x28] sm:$0xff] %vm193_vm1, %v592_v43  ;;  %3577 = vmatpush3.xpose.msk.msra.mxu1 %vm193_vm1, %v747_v41  ;;  %v788_v41 = vld [vmem:[#allocation3 + $0x2a0] sm:$0xff]  ;;  %v787_v43 = vld [vmem:[#allocation3 + $0x298] sm:$0xff] }
 0x296   :  { %3610 = vmatpush3.xpose.msk.msra.mxu0 %vm193_vm1, %v764_v42  ;;  %3578 = vmatprep.subr.mxu1 %v4193_v35  ;;  %501 = vst.msk [vmem:[#allocation4 + $0x88] sm:$0x1] %vm462_vm2, %v499_v29  ;;  %v770_v42 = vld [vmem:[#allocation3 + $0x210] sm:$0xff]  ;;  %v1896_v29 = vld [vmem:[#allocation4 + $0x68] sm:$0xff] }
 0x297   :  { %3611 = vmatprep.subr.mxu0 %v4193_v35 }
 0x298   :  { %v683_v46 = vpop.permute.xlu1 %682 }
 0x299   :  { %685 = vst.msk [vmem:[#allocation3 + $0x388] sm:$0x1] %vm462_vm2, %v683_v46  ;;  %3579 = vmatpush3.xpose.msk.msra.mxu1 %vm193_vm1, %v746_v44  ;;  %v769_v44 = vld [vmem:[#allocation3 + $0x208] sm:$0xff] }
 0x29a   :  { %3612 = vmatpush3.xpose.msk.msra.mxu0 %vm193_vm1, %v763_v45  ;;  %3580 = vmatprep.subr.mxu1 %v4193_v35  ;;  %v786_v45 = vld [vmem:[#allocation3 + $0x290] sm:$0xff]  ;;  %v785_v46 = vld [vmem:[#allocation3 + $0x288] sm:$0xff] }
 0x29b   :  { %3613 = vmatprep.subr.mxu0 %v4193_v35 }
 0x29c   :  { %v667_v49 = vpop.permute.xlu1 %666 }
 0x29d   :  { %670 = vst.msk [vmem:[#allocation3 + $0x380] sm:$0xff] %vm193_vm1, %v667_v49  ;;  %3581 = vmatpush3.xpose.msk.msra.mxu1 %vm193_vm1, %v745_v47  ;;  %v768_v47 = vld [vmem:[#allocation3 + $0x200] sm:$0xff] }
 0x29e   :  { %3614 = vmatpush3.xpose.msk.msra.mxu0 %vm193_vm1, %v762_v48  ;;  %3582 = vmatprep.subr.mxu1 %v4193_v35  ;;  %v815_v48 = vld [vmem:[#allocation3 + $0x378] sm:$0xff]  ;;  %v700_v49 = vld [vmem:[#allocation2 + $0x20] sm:$0xff] }
 0x29f   :  { %3615 = vmatprep.subr.mxu0 %v4193_v35 }
 0x2a0   :  { %v662_v52 = vpop.permute.xlu1 %661 }
 0x2a1   :  { %665 = vst.msk [vmem:[#allocation2 + $0x38] sm:$0xff] %vm193_vm1, %v662_v52  ;;  %3583 = vmatpush3.xpose.msk.msra.mxu1 %vm193_vm1, %v744_v50  ;;  %v784_v50 = vld [vmem:[#allocation3 + $0x280] sm:$0xff]  ;;  %v831_v52 = vld [vmem:[#allocation3 + $0x3f8] sm:$0xff] }
 0x2a2   :  { %3616 = vmatpush3.xpose.msk.msra.mxu0 %vm193_vm1, %v761_v51  ;;  %3584 = vmatprep.subr.mxu1 %v4193_v35  ;;  %v814_v51 = vld [vmem:[#allocation3 + $0x370] sm:$0xff] }
 0x2a3   :  { %3617 = vmatprep.subr.mxu0 %v4193_v35 }
 0x2a4   :  { %v458_v55 = vpop.permute.xlu1 %457 }
 0x2a5   :  { %460 = vst.msk [vmem:[#allocation4] sm:$0xff] %vm193_vm1, %v458_v55  ;;  %3585 = vmatpush3.xpose.msk.msra.mxu1 %vm193_vm1, %v743_v53  ;;  %v701_v53 = vld [vmem:[#allocation2 + $0x28] sm:$0xff]  ;;  %v830_v55 = vld [vmem:[#allocation3 + $0x3f0] sm:$0xff] }
 0x2a6   :  { %3618 = vmatpush3.xpose.msk.msra.mxu0 %vm193_vm1, %v760_v54  ;;  %3586 = vmatprep.subr.mxu1 %v4193_v35  ;;  %v813_v54 = vld [vmem:[#allocation3 + $0x368] sm:$0xff] }
 0x2a7   :  { %3619 = vmatprep.subr.mxu0 %v4193_v35 }
 0x2a8   :  { %v478_v58 = vpop.permute.xlu1 %477 }
 0x2a9   :  { %481 = vst.msk [vmem:[#allocation4 + $0x80] sm:$0xff] %vm193_vm1, %v478_v58  ;;  %3587 = vmatpush3.xpose.msk.msra.mxu1 %vm193_vm1, %v742_v56  ;;  %v812_v56 = vld [vmem:[#allocation3 + $0x360] sm:$0xff]  ;;  %v811_v58 = vld [vmem:[#allocation3 + $0x358] sm:$0xff] }
 0x2aa   :  { %3620 = vmatpush3.xpose.msk.msra.mxu0 %vm193_vm1, %v759_v57  ;;  %3588 = vmatprep.subr.mxu1 %v4193_v35  ;;  %v829_v57 = vld [vmem:[#allocation3 + $0x3e8] sm:$0xff] }
 0x2ab   :  { %3621 = vmatprep.subr.mxu0 %v4193_v35 }
 0x2ac   :  { %v569_v61 = vpop.permute.xlu1 %568 }
 0x2ad   :  { %571 = vst.msk [vmem:[#allocation4 + $0x188] sm:$0x1] %vm462_vm2, %v569_v61  ;;  %3589 = vmatpush3.xpose.msk.msra.mxu1 %vm193_vm1, %v741_v59  ;;  %v828_v59 = vld [vmem:[#allocation3 + $0x3e0] sm:$0xff]  ;;  %v827_v61 = vld [vmem:[#allocation3 + $0x3d8] sm:$0xff] }
 0x2ae   :  { %3622 = vmatpush3.xpose.msk.msra.mxu0 %vm193_vm1, %v758_v60  ;;  %3590 = vmatprep.subr.mxu1 %v4193_v35  ;;  %v810_v60 = vld [vmem:[#allocation3 + $0x350] sm:$0xff] }
 0x2af   :  { %3623 = vmatprep.subr.mxu0 %v4193_v35 }
 0x2b0   :  { %v513_v0 = vpop.permute.xlu1 %512 }
 0x2b1   :  { %516 = vst.msk [vmem:[#allocation4 + $0x100] sm:$0xff] %vm193_vm1, %v513_v0  ;;  %3591 = vmatpush3.xpose.msk.msra.mxu1 %vm193_vm1, %v740_v62  ;;  %v809_v62 = vld [vmem:[#allocation3 + $0x348] sm:$0xff]  ;;  %v808_v0 = vld [vmem:[#allocation3 + $0x340] sm:$0xff] }
 0x2b2   :  { %3624 = vmatpush3.xpose.msk.msra.mxu0 %vm193_vm1, %v757_v63  ;;  %3592 = vmatprep.subr.mxu1 %v4193_v35  ;;  %v826_v63 = vld [vmem:[#allocation3 + $0x3d0] sm:$0xff] }
 0x2b3   :  { %3625 = vmatprep.subr.mxu0 %v4193_v35 }
 0x2b5   :  { %3593 = vmatpush3.xpose.msk.msra.mxu1 %vm193_vm1, %v739_v1  ;;  %v825_v1 = vld [vmem:[#allocation3 + $0x3c8] sm:$0xff] }
 0x2b6   :  { %3626 = vmatpush3.xpose.msk.msra.mxu0 %vm193_vm1, %v756_v2  ;;  %3594 = vmatprep.subr.mxu1 %v4193_v35  ;;  %v807_v2 = vld [vmem:[#allocation3 + $0x338] sm:$0xff] }
 0x2b7   :  { %3627 = vmatprep.subr.mxu0 %v4193_v35 }
 0x2b9   :  { %3595 = vmatpush3.xpose.msk.msra.mxu1 %vm193_vm1, %v738_v3  ;;  %v824_v3 = vld [vmem:[#allocation3 + $0x3c0] sm:$0xff] }
 0x2ba   :  { %3628 = vmatpush3.xpose.msk.msra.mxu0 %vm193_vm1, %v755_v4  ;;  %3596 = vmatprep.subr.mxu1 %v4193_v35  ;;  %v806_v4 = vld [vmem:[#allocation3 + $0x330] sm:$0xff] }
 0x2bb   :  { %3629 = vmatprep.subr.mxu0 %v4193_v35 }
 0x2bd   :  { %3597 = vmatpush3.xpose.msk.msra.mxu1 %vm193_vm1, %v737_v5  ;;  %v823_v5 = vld [vmem:[#allocation3 + $0x3b8] sm:$0xff] }
 0x2be   :  { %3630 = vmatpush3.xpose.msk.msra.mxu0 %vm193_vm1, %v754_v6  ;;  %3598 = vmatprep.subr.mxu1 %v4193_v35  ;;  %v805_v6 = vld [vmem:[#allocation3 + $0x328] sm:$0xff] }
 0x2bf   :  { %3631 = vmatprep.subr.mxu0 %v4193_v35 }
 0x2c1   :  { %3599 = vmatpush3.xpose.msk.msra.mxu1 %vm193_vm1, %v736_v10  ;;  %v804_v10 = vld [vmem:[#allocation3 + $0x320] sm:$0xff] }
 0x2c2   :  { %3632 = vmatpush3.xpose.msk.msra.mxu0 %vm193_vm1, %v753_v8  ;;  %3638 = vmatprep.subr.mxu1 %v4193_v35  ;;  %v822_v8 = vld [vmem:[#allocation3 + $0x3b0] sm:$0xff] }
 0x2c3   :  { %3633 = vmatprep.subr.mxu0 %v4193_v35 }
 0x2c4   :  { %3601 = vmatmul.mubr.msk.f32.vlgmr.msra.gmra.mxu1 %vm193_vm1, %v698_v12  ;;  %v803_v12 = vld [vmem:[#allocation3 + $0x318] sm:$0xff] }
 0x2c5   :  { %3639 = vmatpush3.xpose.msk.msra.mxu1 %vm193_vm1, %v783_v11  ;;  %3670 = vmatprep.mubr.msk.f32.mxu1 %vm4194_vm3, %v4193_v35  ;;  %v821_v11 = vld [vmem:[#allocation3 + $0x3a8] sm:$0xff] }
 0x2c6   :  { %3634 = vmatpush3.xpose.msk.msra.mxu0 %vm193_vm1, %v752_v13  ;;  %3640 = vmatprep.subr.mxu1 %v4193_v35  ;;  %v820_v13 = vld [vmem:[#allocation3 + $0x3a0] sm:$0xff] }
 0x2c7   :  { %3673 = vmatprep.subr.mxu0 %v4193_v35 }
 0x2c9   :  { %3636 = vmatmul.mubr.msk.f32.vlgmr.msra.gmra.mxu0 %vm193_vm1, %v699_v16  ;;  %3641 = vmatpush3.xpose.msk.msra.mxu1 %vm193_vm1, %v782_v14  ;;  %v802_v14 = vld [vmem:[#allocation3 + $0x310] sm:$0xff]  ;;  %v801_v16 = vld [vmem:[#allocation3 + $0x308] sm:$0xff] }
 0x2ca   :  { %3674 = vmatpush3.xpose.msk.msra.mxu0 %vm193_vm1, %v799_v15  ;;  %3642 = vmatprep.subr.mxu1 %v4193_v35  ;;  %v819_v15 = vld [vmem:[#allocation3 + $0x398] sm:$0xff] }
 0x2cb   :  { %3675 = vmatprep.subr.mxu0 %v4193_v35  ;;  %3705 = vmatprep.mubr.msk.f32.mxu0 %vm4194_vm3, %v4193_v35 }
 0x2cd   :  { %3643 = vmatpush3.xpose.msk.msra.mxu1 %vm193_vm1, %v781_v17  ;;  %v1800_v17 = vlaneseq }
 0x2ce   :  { %3676 = vmatpush3.xpose.msk.msra.mxu0 %vm193_vm1, %v798_v18  ;;  %3644 = vmatprep.subr.mxu1 %v4193_v35  ;;  %v818_v18 = vld [vmem:[#allocation3 + $0x390] sm:$0xff] }
 0x2cf   :  { %3677 = vmatprep.subr.mxu0 %v4193_v35 }
 0x2d1   :  { %3645 = vmatpush3.xpose.msk.msra.mxu1 %vm193_vm1, %v780_v19  ;;  %v5204_v19 = vand.u32 127, %v1800_v17 }
 0x2d2   :  { %3678 = vmatpush3.xpose.msk.msra.mxu0 %vm193_vm1, %v797_v20  ;;  %3646 = vmatprep.subr.mxu1 %v4193_v35  ;;  %v817_v20 = vld [vmem:[#allocation3 + $0x388] sm:$0xff] }
 0x2d3   :  { %3679 = vmatprep.subr.mxu0 %v4193_v35  ;;  %vm1802_vm4 = vcmp.lt.s32.totalorder %v5204_v19, 9 }
 0x2d5   :  { %3647 = vmatpush3.xpose.msk.msra.mxu1 %vm193_vm1, %v779_v21  ;;  %v800_v21 = vld [vmem:[#allocation3 + $0x300] sm:$0xff] }
 0x2d6   :  { %3680 = vmatpush3.xpose.msk.msra.mxu0 %vm193_vm1, %v796_v22  ;;  %3648 = vmatprep.subr.mxu1 %v4193_v35  ;;  %v1898_v22 = vld [vmem:[#allocation4 + $0x78] sm:$0xff] }
 0x2d7   :  { %3681 = vmatprep.subr.mxu0 %v4193_v35 }
 0x2d9   :  { %3649 = vmatpush3.xpose.msk.msra.mxu1 %vm193_vm1, %v778_v23  ;;  %v702_v23 = vld [vmem:[#allocation2 + $0x30] sm:$0xff] }
 0x2da   :  { %3682 = vmatpush3.xpose.msk.msra.mxu0 %vm193_vm1, %v795_v24  ;;  %3650 = vmatprep.subr.mxu1 %v4193_v35 }
 0x2db   :  { %3683 = vmatprep.subr.mxu0 %v4193_v35 }
 0x2dd   :  { %3651 = vmatpush3.xpose.msk.msra.mxu1 %vm193_vm1, %v777_v25  ;;  %v816_v25 = vld [vmem:[#allocation3 + $0x380] sm:$0xff] }
 0x2de   :  { %3684 = vmatpush3.xpose.msk.msra.mxu0 %vm193_vm1, %v794_v27  ;;  %3652 = vmatprep.subr.mxu1 %v4193_v35  ;;  %v1897_v27 = vld [vmem:[#allocation4 + $0x70] sm:$0xff] }
 0x2df   :  { %3685 = vmatprep.subr.mxu0 %v4193_v35 }
 0x2e1   :  { %3653 = vmatpush3.xpose.msk.msra.mxu1 %vm193_vm1, %v776_v28 }
 0x2e2   :  { %3686 = vmatpush3.xpose.msk.msra.mxu0 %vm193_vm1, %v793_v30  ;;  %3654 = vmatprep.subr.mxu1 %v4193_v35  ;;  %v1914_v30 = vld [vmem:[#allocation4 + $0xf8] sm:$0xff] }
 0x2e3   :  { %3687 = vmatprep.subr.mxu0 %v4193_v35 }
 0x2e5   :  { %3655 = vmatpush3.xpose.msk.msra.mxu1 %vm193_vm1, %v775_v31  ;;  %v703_v31 = vld [vmem:[#allocation2 + $0x38] sm:$0xff] }
 0x2e6   :  { %3688 = vmatpush3.xpose.msk.msra.mxu0 %vm193_vm1, %v792_v32  ;;  %3656 = vmatprep.subr.mxu1 %v4193_v35 }
 0x2e7   :  { %3689 = vmatprep.subr.mxu0 %v4193_v35 }
 0x2e9   :  { %3657 = vmatpush3.xpose.msk.msra.mxu1 %vm193_vm1, %v774_v33  ;;  %v1895_v33 = vld [vmem:[#allocation4 + $0x60] sm:$0xff] }
 0x2ea   :  { %3690 = vmatpush3.xpose.msk.msra.mxu0 %vm193_vm1, %v791_v34  ;;  %3658 = vmatprep.subr.mxu1 %v4193_v35 }
 0x2eb   :  { %3691 = vmatprep.subr.mxu0 %v4193_v35 }
 0x2ed   :  { %3659 = vmatpush3.xpose.msk.msra.mxu1 %vm193_vm1, %v773_v36  ;;  %v1913_v36 = vld [vmem:[#allocation4 + $0xf0] sm:$0xff] }
 0x2ee   :  { %3692 = vmatpush3.xpose.msk.msra.mxu0 %vm193_vm1, %v790_v37  ;;  %3660 = vmatprep.subr.mxu1 %v4193_v35 }
 0x2ef   :  { %3693 = vmatprep.subr.mxu0 %v4193_v35 }
 0x2f1   :  { %3661 = vmatpush3.xpose.msk.msra.mxu1 %vm193_vm1, %v772_v38  ;;  %v1894_v38 = vld [vmem:[#allocation4 + $0x58] sm:$0xff] }
 0x2f2   :  { %3694 = vmatpush3.xpose.msk.msra.mxu0 %vm193_vm1, %v789_v39  ;;  %3662 = vmatprep.subr.mxu1 %v4193_v35  ;;  %v534_v39 = vpop.permute.xlu0 %533 }
 0x2f3   :  { %3695 = vmatprep.subr.mxu0 %v4193_v35  ;;  %536 = vst.msk [vmem:[#allocation4 + $0x108] sm:$0x1] %vm462_vm2, %v534_v39 }
 0x2f5   :  { %3663 = vmatpush3.xpose.msk.msra.mxu1 %vm193_vm1, %v771_v40  ;;  %v1912_v40 = vld [vmem:[#allocation4 + $0xe8] sm:$0xff] }
 0x2f6   :  { %3696 = vmatpush3.xpose.msk.msra.mxu0 %vm193_vm1, %v788_v41  ;;  %3664 = vmatprep.subr.mxu1 %v4193_v35  ;;  %v1893_v41 = vld [vmem:[#allocation4 + $0x50] sm:$0xff] }
 0x2f7   :  { %3697 = vmatprep.subr.mxu0 %v4193_v35 }
 0x2f9   :  { %3665 = vmatpush3.xpose.msk.msra.mxu1 %vm193_vm1, %v770_v42  ;;  %v1911_v42 = vld [vmem:[#allocation4 + $0xe0] sm:$0xff] }
 0x2fa   :  { %3698 = vmatpush3.xpose.msk.msra.mxu0 %vm193_vm1, %v787_v43  ;;  %3666 = vmatprep.subr.mxu1 %v4193_v35  ;;  %v1892_v43 = vld [vmem:[#allocation4 + $0x48] sm:$0xff] }
 0x2fb   :  { %3699 = vmatprep.subr.mxu0 %v4193_v35 }
 0x2fd   :  { %3667 = vmatpush3.xpose.msk.msra.mxu1 %vm193_vm1, %v769_v44  ;;  %v1910_v44 = vld [vmem:[#allocation4 + $0xd8] sm:$0xff] }
 0x2fe   :  { %3700 = vmatpush3.xpose.msk.msra.mxu0 %vm193_vm1, %v786_v45  ;;  %3668 = vmatprep.subr.mxu1 %v4193_v35  ;;  %v1891_v45 = vld [vmem:[#allocation4 + $0x40] sm:$0xff] }
 0x2ff   :  { %3701 = vmatprep.subr.mxu0 %v4193_v35 }
 0x301   :  { %3669 = vmatpush3.xpose.msk.msra.mxu1 %vm193_vm1, %v768_v47  ;;  %v1890_v47 = vld [vmem:[#allocation4 + $0x38] sm:$0xff] }
 0x302   :  { %3702 = vmatpush3.xpose.msk.msra.mxu0 %vm193_vm1, %v785_v46  ;;  %3708 = vmatprep.subr.mxu1 %v4193_v35  ;;  %v1909_v46 = vld [vmem:[#allocation4 + $0xd0] sm:$0xff] }
 0x303   :  { %3703 = vmatprep.subr.mxu0 %v4193_v35 }
 0x304   :  { %3671 = vmatmul.mubr.msk.f32.vlgmr.msra.gmra.mxu1 %vm193_vm1, %v700_v49  ;;  %v1889_v49 = vld [vmem:[#allocation4 + $0x30] sm:$0xff] }
 0x305   :  { %3709 = vmatpush3.xpose.msk.msra.mxu1 %vm193_vm1, %v815_v48  ;;  %3740 = vmatprep.mubr.msk.f32.mxu1 %vm4194_vm3, %v4193_v35  ;;  %v1908_v48 = vld [vmem:[#allocation4 + $0xc8] sm:$0xff] }
 0x306   :  { %3704 = vmatpush3.xpose.msk.msra.mxu0 %vm193_vm1, %v784_v50  ;;  %3710 = vmatprep.subr.mxu1 %v4193_v35  ;;  %v1907_v50 = vld [vmem:[#allocation4 + $0xc0] sm:$0xff] }
 0x307   :  { %3743 = vmatprep.subr.mxu0 %v4193_v35 }
 0x309   :  { %3706 = vmatmul.mubr.msk.f32.vlgmr.msra.gmra.mxu0 %vm193_vm1, %v701_v53  ;;  %3711 = vmatpush3.xpose.msk.msra.mxu1 %vm193_vm1, %v814_v51  ;;  %v1888_v51 = vld [vmem:[#allocation4 + $0x28] sm:$0xff]  ;;  %v1887_v53 = vld [vmem:[#allocation4 + $0x20] sm:$0xff] }
 0x30a   :  { %3744 = vmatpush3.xpose.msk.msra.mxu0 %vm193_vm1, %v831_v52  ;;  %3712 = vmatprep.subr.mxu1 %v4193_v35  ;;  %v1906_v52 = vld [vmem:[#allocation4 + $0xb8] sm:$0xff] }
 0x30b   :  { %3745 = vmatprep.subr.mxu0 %v4193_v35  ;;  %3775 = vmatprep.mubr.msk.f32.mxu0 %vm4194_vm3, %v4193_v35 }
 0x30d   :  { %3713 = vmatpush3.xpose.msk.msra.mxu1 %vm193_vm1, %v813_v54  ;;  %v1905_v54 = vld [vmem:[#allocation4 + $0xb0] sm:$0xff] }
 0x30e   :  { %3746 = vmatpush3.xpose.msk.msra.mxu0 %vm193_vm1, %v830_v55  ;;  %3714 = vmatprep.subr.mxu1 %v4193_v35  ;;  %v1886_v55 = vld [vmem:[#allocation4 + $0x18] sm:$0xff] }
 0x30f   :  { %3747 = vmatprep.subr.mxu0 %v4193_v35 }
 0x311   :  { %3715 = vmatpush3.xpose.msk.msra.mxu1 %vm193_vm1, %v812_v56  ;;  %v1904_v56 = vld [vmem:[#allocation4 + $0xa8] sm:$0xff] }
 0x312   :  { %3748 = vmatpush3.xpose.msk.msra.mxu0 %vm193_vm1, %v829_v57  ;;  %3716 = vmatprep.subr.mxu1 %v4193_v35  ;;  %v1885_v57 = vld [vmem:[#allocation4 + $0x10] sm:$0xff] }
 0x313   :  { %3749 = vmatprep.subr.mxu0 %v4193_v35 }
 0x315   :  { %3717 = vmatpush3.xpose.msk.msra.mxu1 %vm193_vm1, %v811_v58  ;;  %v1903_v58 = vld [vmem:[#allocation4 + $0xa0] sm:$0xff] }
 0x316   :  { %3750 = vmatpush3.xpose.msk.msra.mxu0 %vm193_vm1, %v828_v59  ;;  %3718 = vmatprep.subr.mxu1 %v4193_v35  ;;  %v1884_v59 = vld [vmem:[#allocation4 + $0x8] sm:$0xff] }
 0x317   :  { %3751 = vmatprep.subr.mxu0 %v4193_v35 }
 0x319   :  { %3719 = vmatpush3.xpose.msk.msra.mxu1 %vm193_vm1, %v810_v60  ;;  %v1902_v60 = vld [vmem:[#allocation4 + $0x98] sm:$0xff] }
 0x31a   :  { %3752 = vmatpush3.xpose.msk.msra.mxu0 %vm193_vm1, %v827_v61  ;;  %3720 = vmatprep.subr.mxu1 %v4193_v35  ;;  %v1901_v61 = vld [vmem:[#allocation4 + $0x90] sm:$0xff] }
 0x31b   :  { %3753 = vmatprep.subr.mxu0 %v4193_v35 }
 0x31d   :  { %3721 = vmatpush3.xpose.msk.msra.mxu1 %vm193_vm1, %v809_v62  ;;  %v1883_v62 = vld [vmem:[#allocation4] sm:$0xff] }
 0x31e   :  { %3754 = vmatpush3.xpose.msk.msra.mxu0 %vm193_vm1, %v826_v63  ;;  %3722 = vmatprep.subr.mxu1 %v4193_v35  ;;  %v1900_v63 = vld [vmem:[#allocation4 + $0x88] sm:$0xff] }
 0x31f   :  { %3755 = vmatprep.subr.mxu0 %v4193_v35 }
 0x321   :  { %3723 = vmatpush3.xpose.msk.msra.mxu1 %vm193_vm1, %v808_v0  ;;  %v1899_v0 = vld [vmem:[#allocation4 + $0x80] sm:$0xff] }
 0x322   :  { %3756 = vmatpush3.xpose.msk.msra.mxu0 %vm193_vm1, %v825_v1  ;;  %3724 = vmatprep.subr.mxu1 %v4193_v35 }
 0x323   :  { %3757 = vmatprep.subr.mxu0 %v4193_v35 }
 0x325   :  { %3725 = vmatpush3.xpose.msk.msra.mxu1 %vm193_vm1, %v807_v2 }
 0x326   :  { %3758 = vmatpush3.xpose.msk.msra.mxu0 %vm193_vm1, %v824_v3  ;;  %3726 = vmatprep.subr.mxu1 %v4193_v35 }
 0x327   :  { %3759 = vmatprep.subr.mxu0 %v4193_v35 }
 0x329   :  { %3727 = vmatpush3.xpose.msk.msra.mxu1 %vm193_vm1, %v806_v4 }
 0x32a   :  { %3760 = vmatpush3.xpose.msk.msra.mxu0 %vm193_vm1, %v823_v5  ;;  %3728 = vmatprep.subr.mxu1 %v4193_v35 }
 0x32b   :  { %3761 = vmatprep.subr.mxu0 %v4193_v35 }
 0x32d   :  { %3729 = vmatpush3.xpose.msk.msra.mxu1 %vm193_vm1, %v805_v6 }
 0x32e   :  { %3762 = vmatpush3.xpose.msk.msra.mxu0 %vm193_vm1, %v822_v8  ;;  %3730 = vmatprep.subr.mxu1 %v4193_v35 }
 0x32f   :  { %3763 = vmatprep.subr.mxu0 %v4193_v35 }
 0x331   :  { %3731 = vmatpush3.xpose.msk.msra.mxu1 %vm193_vm1, %v804_v10 }
 0x332   :  { %3764 = vmatpush3.xpose.msk.msra.mxu0 %vm193_vm1, %v821_v11  ;;  %3732 = vmatprep.subr.mxu1 %v4193_v35 }
 0x333   :  { %3765 = vmatprep.subr.mxu0 %v4193_v35 }
 0x335   :  { %3733 = vmatpush3.xpose.msk.msra.mxu1 %vm193_vm1, %v803_v12 }
 0x336   :  { %3766 = vmatpush3.xpose.msk.msra.mxu0 %vm193_vm1, %v820_v13  ;;  %3734 = vmatprep.subr.mxu1 %v4193_v35 }
 0x337   :  { %3767 = vmatprep.subr.mxu0 %v4193_v35 }
 0x339   :  { %3735 = vmatpush3.xpose.msk.msra.mxu1 %vm193_vm1, %v802_v14 }
 0x33a   :  { %3768 = vmatpush3.xpose.msk.msra.mxu0 %vm193_vm1, %v819_v15  ;;  %3736 = vmatprep.subr.mxu1 %v4193_v35 }
 0x33b   :  { %3769 = vmatprep.subr.mxu0 %v4193_v35 }
 0x33d   :  { %3737 = vmatpush3.xpose.msk.msra.mxu1 %vm193_vm1, %v801_v16 }
 0x33e   :  { %3770 = vmatpush3.xpose.msk.msra.mxu0 %vm193_vm1, %v818_v18  ;;  %3738 = vmatprep.subr.mxu1 %v4193_v35 }
 0x33f   :  { %3771 = vmatprep.subr.mxu0 %v4193_v35 }
 0x341   :  { %3739 = vmatpush3.xpose.msk.msra.mxu1 %vm193_vm1, %v800_v21 }
 0x342   :  { %3772 = vmatpush3.xpose.msk.msra.mxu0 %vm193_vm1, %v817_v20  ;;  %3778 = vmatprep.subr.mxu1 %v4193_v35 }
 0x343   :  { %3773 = vmatprep.subr.mxu0 %v4193_v35 }
 0x344   :  { %v949_v24 = vpop.f32.mrf.mxu1  ;;  %3741 = vmatmul.mubr.msk.f32.vlgmr.msra.gmra.mxu1 %vm193_vm1, %v702_v23 }
 0x345   :  { %3779 = vmatpush3.msra.mxu1 %v1898_v22  ;;  %v5215_v26 = vsel %vm1802_vm4, %v949_v24, -1e+30  ;;  %3810 = vmatprep.mubr.msk.f32.mxu1 %vm4194_vm3, %v4193_v35 }
 0x346   :  { %3774 = vmatpush3.xpose.msk.msra.mxu0 %vm193_vm1, %v816_v25  ;;  %1811 = vmax.xlane.f32.xlu0 %v5215_v26  ;;  %v3532_v28 = vpop.f32.mrf.mxu1 }
 0x347   :  { %3780 = vmatprep.subr.mxu1 %v4193_v35  ;;  %3813 = vmatprep.subr.mxu0 %v4193_v35 }
 0x348   :  { %3781 = vmatpush3.msra.mxu1 %v1897_v27 }
 0x349   :  { %3776 = vmatmul.mubr.msk.f32.vlgmr.msra.gmra.mxu0 %vm193_vm1, %v703_v31  ;;  %3782 = vmatprep.subr.mxu1 %v4193_v35  ;;  %v1070_v32 = vpop.f32.mrf.mxu0 }
 0x34a   :  { %3783 = vmatpush3.msra.mxu1 %v1896_v29  ;;  %3814 = vmatpush3.msra.mxu0 %v1914_v30  ;;  %v5227_v34 = vsel %vm1802_vm4, %v1070_v32, -1e+30  ;;  %v4166_v32 = vld [vmem:[%s5560_s6] ss:$0 sm:$0xff] }
 0x34b   :  { %3784 = vmatprep.subr.mxu1 %v4193_v35  ;;  %3815 = vmatprep.subr.mxu0 %v4193_v35  ;;  %v3567_v37 = vpop.f32.mrf.mxu0 }
 0x34c   :  { %1813 = vmax.xlane.f32.xlu1 %v5227_v34  ;;  %3785 = vmatpush3.msra.mxu1 %v1895_v33 }
 0x34d   :  { %3816 = vmatpush3.msra.mxu0 %v1913_v36  ;;  %3786 = vmatprep.subr.mxu1 %v4193_v35 }
 0x34e   :  { %3817 = vmatprep.subr.mxu0 %v4193_v35  ;;  %3787 = vmatpush3.msra.mxu1 %v1894_v38 }
 0x34f   :  { %3818 = vmatpush3.msra.mxu0 %v1912_v40  ;;  %3788 = vmatprep.subr.mxu1 %v4193_v35 }
 0x350   :  { %3819 = vmatprep.subr.mxu0 %v4193_v35  ;;  %3789 = vmatpush3.msra.mxu1 %v1893_v41 }
 0x351   :  { %3820 = vmatpush3.msra.mxu0 %v1911_v42  ;;  %3790 = vmatprep.subr.mxu1 %v4193_v35 }
 0x352   :  { %3821 = vmatprep.subr.mxu0 %v4193_v35  ;;  %3791 = vmatpush3.msra.mxu1 %v1892_v43 }
 0x353   :  { %3822 = vmatpush3.msra.mxu0 %v1910_v44  ;;  %3792 = vmatprep.subr.mxu1 %v4193_v35 }
 0x354   :  { %3823 = vmatprep.subr.mxu0 %v4193_v35  ;;  %3793 = vmatpush3.msra.mxu1 %v1891_v45 }
 0x355   :  { %3824 = vmatpush3.msra.mxu0 %v1909_v46  ;;  %3794 = vmatprep.subr.mxu1 %v4193_v35 }
 0x356   :  { %3825 = vmatprep.subr.mxu0 %v4193_v35  ;;  %3795 = vmatpush3.msra.mxu1 %v1890_v47 }
 0x357   :  { %3826 = vmatpush3.msra.mxu0 %v1908_v48  ;;  %3796 = vmatprep.subr.mxu1 %v4193_v35 }
 0x358   :  { %3827 = vmatprep.subr.mxu0 %v4193_v35  ;;  %3797 = vmatpush3.msra.mxu1 %v1889_v49 }
 0x359   :  { %3828 = vmatpush3.msra.mxu0 %v1907_v50  ;;  %3798 = vmatprep.subr.mxu1 %v4193_v35 }
 0x35a   :  { %3829 = vmatprep.subr.mxu0 %v4193_v35  ;;  %3799 = vmatpush3.msra.mxu1 %v1888_v51 }
 0x35b   :  { %3830 = vmatpush3.msra.mxu0 %v1906_v52  ;;  %3800 = vmatprep.subr.mxu1 %v4193_v35  ;;  %v1930_v52 = vld [vmem:[#allocation4 + $0x178] sm:$0xff] }
 0x35c   :  { %3831 = vmatprep.subr.mxu0 %v4193_v35  ;;  %3801 = vmatpush3.msra.mxu1 %v1887_v53  ;;  %v1929_v53 = vld [vmem:[#allocation4 + $0x170] sm:$0xff] }
 0x35d   :  { %3832 = vmatpush3.msra.mxu0 %v1905_v54  ;;  %3802 = vmatprep.subr.mxu1 %v4193_v35  ;;  %v1928_v54 = vld [vmem:[#allocation4 + $0x168] sm:$0xff] }
 0x35e   :  { %3833 = vmatprep.subr.mxu0 %v4193_v35  ;;  %3803 = vmatpush3.msra.mxu1 %v1886_v55 }
 0x35f   :  { %3834 = vmatpush3.msra.mxu0 %v1904_v56  ;;  %3804 = vmatprep.subr.mxu1 %v4193_v35 }
 0x360   :  { %3835 = vmatprep.subr.mxu0 %v4193_v35  ;;  %3805 = vmatpush3.msra.mxu1 %v1885_v57  ;;  %v1946_v57 = vld [vmem:[#allocation4 + $0x1f8] sm:$0xff] }
 0x361   :  { %3836 = vmatpush3.msra.mxu0 %v1903_v58  ;;  %3806 = vmatprep.subr.mxu1 %v4193_v35  ;;  %v1927_v58 = vld [vmem:[#allocation4 + $0x160] sm:$0xff] }
 0x362   :  { %3837 = vmatprep.subr.mxu0 %v4193_v35  ;;  %3807 = vmatpush3.msra.mxu1 %v1884_v59  ;;  %v588_v59 = vld [vmem:[%s5560_s6] sm:$0x1]  ;;  %s4204_s6 = smov 8  }
 0x363   :  { %3838 = vmatpush3.msra.mxu0 %v1902_v60  ;;  %3808 = vmatprep.subr.mxu1 %v4193_v35  ;;  %589 = vst.msk [vmem:[#allocation4 + $0x208] sm:$0x1] %vm462_vm2, %v588_v59 }
 0x364   :  { %3839 = vmatprep.subr.mxu0 %v4193_v35  ;;  %3809 = vmatpush3.msra.mxu1 %v1883_v62  ;;  %v1926_v62 = vld [vmem:[#allocation4 + $0x158] sm:$0xff] }
 0x365   :  { %3840 = vmatpush3.msra.mxu0 %v1901_v61  ;;  %3848 = vmatprep.subr.mxu1 %v4193_v35  ;;  %v1945_v61 = vld [vmem:[#allocation4 + $0x1f0] sm:$0xff] }
 0x366   :  { %3841 = vmatprep.subr.mxu0 %v4193_v35  ;;  %3845 = vmatprep.mubr.msk.f32.mxu0 %vm4194_vm3, %v4193_v35 }
 0x367   :  { %3842 = vmatpush3.msra.mxu0 %v1900_v63  ;;  %v1944_v63 = vld [vmem:[#allocation4 + $0x1e8] sm:$0xff] }
 0x368   :  { %3843 = vmatprep.subr.mxu0 %v4193_v35 }
 0x369   :  { %3844 = vmatpush3.msra.mxu0 %v1899_v0  ;;  %v1925_v0 = vld [vmem:[#allocation4 + $0x150] sm:$0xff] }
 0x36a   :  { %3883 = vmatprep.subr.mxu0 %v4193_v35 }
 0x384   :  { %v1191_v1 = vpop.f32.mrf.mxu1 }
 0x385   :  { %v1805_v2 = vsel %vm1802_vm4, %v1191_v1, -1e+30  ;;  %v1943_v1 = vld [vmem:[#allocation4 + $0x1e0] sm:$0xff] }
 0x386   :  { %1815 = vmax.xlane.f32.xlu0 %v1805_v2  ;;  %v3602_v3 = vpop.f32.mrf.mxu1 }
 0x387   :  { %v1942_v3 = vld [vmem:[#allocation4 + $0x1d8] sm:$0xff] }
 0x389   :  { %v1312_v4 = vpop.f32.mrf.mxu0 }
 0x38a   :  { %v1806_v5 = vsel %vm1802_vm4, %v1312_v4, -1e+30  ;;  %v1923_v4 = vld [vmem:[#allocation4 + $0x140] sm:$0xff] }
 0x38b   :  { %v3637_v6 = vpop.f32.mrf.mxu0  ;;  %1817 = vmax.xlane.f32.xlu0 %v1806_v5 }
 0x38c   :  { %v1922_v6 = vld [vmem:[#allocation4 + $0x138] sm:$0xff] }
 0x3a1   :  { %547 = vrot.lane.b32.xlu0 %v4923_v9, %s4203_s28 }
 0x3c4   :  { %v1433_v8 = vpop.f32.mrf.mxu1 }
 0x3c5   :  { %v1807_v10 = vsel %vm1802_vm4, %v1433_v8, -1e+30  ;;  %v1940_v8 = vld [vmem:[#allocation4 + $0x1c8] sm:$0xff] }
 0x3c6   :  { %1819 = vmax.xlane.f32.xlu0 %v1807_v10  ;;  %v3672_v11 = vpop.f32.mrf.mxu1 }
 0x3c7   :  { %v1939_v11 = vld [vmem:[#allocation4 + $0x1c0] sm:$0xff] }
 0x3c9   :  { %v1554_v12 = vpop.f32.mrf.mxu0 }
 0x3ca   :  { %v1808_v13 = vsel %vm1802_vm4, %v1554_v12, -1e+30  ;;  %v1920_v12 = vld [vmem:[#allocation4 + $0x128] sm:$0xff] }
 0x3cb   :  { %1821 = vmax.xlane.f32.xlu1 %v1808_v13  ;;  %v3707_v14 = vpop.f32.mrf.mxu0 }
 0x3cf   :  { %v1812_v15 = vpop.xlane.xlu0 %1811 }
 0x3d0   :  { %v1827_v16 = vsub.f32 %v5215_v26, %v1812_v15  ;;  %v1938_v15 = vld [vmem:[#allocation4 + $0x1b8] sm:$0xff] }
 0x3d2   :  { %v1835_v17 = vmul.f32 1.442695, %v1827_v16  ;;  %v1919_v16 = vld [vmem:[#allocation4 + $0x120] sm:$0xff] }
 0x3d4   :  { %4122 = vpow2.f32 %v1835_v17 }
 0x3d5   :  { %v1814_v18 = vpop.xlane.xlu1 %1813 }
 0x3d6   :  { %v1828_v9 = vsub.f32 %v5227_v34, %v1814_v18  ;;  %v1937_v18 = vld [vmem:[#allocation4 + $0x1b0] sm:$0xff] }
 0x3d8   :  { %v1837_v20 = vmul.f32 1.442695, %v1828_v9  ;;  %v1918_v9 = vld [vmem:[#allocation4 + $0x118] sm:$0xff] }
 0x3da   :  { %4124 = vpow2.f32 %v1837_v20 }
 0x3e1   :  { %v4123_v21 = vpop.eup %4122 }
 0x3e2   :  { %1851 = vadd.xlane.f32.xlu0 %v4123_v21 }
 0x3e7   :  { %v4125_v22 = vpop.eup %4124 }
 0x3e8   :  { %1853 = vadd.xlane.f32.xlu1 %v4125_v22 }
 0x3f9   :  { %581 = vrot.lane.b32.xlu1 %v4916_v7, %s4200_s18 }
 0x404   :  { %v1675_v23 = vpop.f32.mrf.mxu1 }
 0x405   :  { %v5279_v24 = vsel %vm1802_vm4, %v1675_v23, -1e+30  ;;  %v1935_v23 = vld [vmem:[#allocation4 + $0x1a0] sm:$0xff] }
 0x406   :  { %v3742_v25 = vpop.f32.mrf.mxu1  ;;  %1823 = vmax.xlane.f32.xlu0 %v5279_v24 }
 0x407   :  { %v1934_v25 = vld [vmem:[#allocation4 + $0x198] sm:$0xff] }
 0x409   :  { %v1796_v26 = vpop.f32.mrf.mxu0 }
 0x40a   :  { %v5285_v31 = vsel %vm1802_vm4, %v1796_v26, -1e+30  ;;  %v1915_v26 = vld [vmem:[#allocation4 + $0x100] sm:$0xff] }
 0x40b   :  { %v3777_v27 = vpop.f32.mrf.mxu0 }
 0x40c   :  { %v1933_v27 = vld [vmem:[#allocation4 + $0x190] sm:$0xff] }
 0x40f   :  { %v1816_v28 = vpop.xlane.xlu0 %1815 }
 0x410   :  { %v1829_v19 = vsub.f32 %v1805_v2, %v1816_v28  ;;  %v1924_v2 = vld [vmem:[#allocation4 + $0x148] sm:$0xff] }
 0x411   :  { %v1932_v28 = vld [vmem:[#allocation4 + $0x188] sm:$0xff] }
 0x412   :  { %v1839_v37 = vmul.f32 1.442695, %v1829_v19 }
 0x414   :  { %v1818_v29 = vpop.xlane.xlu0 %1817 }
 0x415   :  { %v1830_v33 = vsub.f32 %v1806_v5, %v1818_v29  ;;  %v1941_v5 = vld [vmem:[#allocation4 + $0x1d0] sm:$0xff] }
 0x417   :  { %v1841_v34 = vmul.f32 1.442695, %v1830_v33 }
 0x418   :  { %v548_v30 = vpop.permute.xlu0 %547 }
 0x419   :  { %551 = vst.msk [vmem:[#allocation4 + $0x180] sm:$0xff] %vm193_vm1, %v548_v30  ;;  %4126 = vpow2.f32 %v1841_v34 }
 0x41a   :  { %4128 = vpow2.f32 %v1839_v37 }
 0x41c   :  { %622 = vrot.lane.b32.xlu0 %v4166_v32, %s4191_s21 }
 0x41d   :  { %1825 = vmax.xlane.f32.xlu1 %v5285_v31 }
 0x420   :  { %v1931_v29 = vld [vmem:[#allocation4 + $0x180] sm:$0xff] }
 0x426   :  { %v5294_v36 = vpop.eup %4126 }
 0x427   :  { %v5297_v40 = vpop.eup %4128 }
 0x42e   :  { %601 = vrot.lane.b32.xlu1 %v4916_v7, %s4201_s19 }
 0x43b   :  { %1857 = vadd.xlane.f32.xlu0 %v5294_v36 }
 0x44f   :  { %v1820_v38 = vpop.xlane.xlu0 %1819 }
 0x450   :  { %v1831_v39 = vsub.f32 %v1807_v10, %v1820_v38  ;;  %v1921_v10 = vld [vmem:[#allocation4 + $0x130] sm:$0xff] }
 0x452   :  { %v1843_v41 = vmul.f32 1.442695, %v1831_v39  ;;  %1855 = vadd.xlane.f32.xlu1 %v5297_v40 }
 0x454   :  { %4130 = vpow2.f32 %v1843_v41  ;;  %v1822_v42 = vpop.xlane.xlu1 %1821  ;;  %v1978_v41 = vld [vmem:[#allocation4 + $0x2f8] sm:$0xff] }
 0x455   :  { %v1832_v43 = vsub.f32 %v1808_v13, %v1822_v42  ;;  %v1977_v42 = vld [vmem:[#allocation4 + $0x2f0] sm:$0xff] }
 0x457   :  { %v1845_v44 = vmul.f32 1.442695, %v1832_v43  ;;  %v1976_v43 = vld [vmem:[#allocation4 + $0x2e8] sm:$0xff] }
 0x459   :  { %4132 = vpow2.f32 %v1845_v44  ;;  %v1975_v44 = vld [vmem:[#allocation4 + $0x2e0] sm:$0xff] }
 0x461   :  { %v5300_v45 = vpop.eup %4130 }
 0x462   :  { %1859 = vadd.xlane.f32.xlu1 %v5300_v45 }
 0x466   :  { %v5303_v46 = vpop.eup %4132 }
 0x467   :  { %1861 = vadd.xlane.f32.xlu0 %v5303_v46 }
 0x46b   :  { %v1852_v47 = vpop.xlane.xlu0 %1851 }
 0x46c   :  { %4134 = vrcp.f32 %v1852_v47 }
 0x471   :  { %v1854_v48 = vpop.xlane.xlu1 %1853 }
 0x472   :  { %4136 = vrcp.f32 %v1854_v48  ;;  %v1972_v48 = vld [vmem:[#allocation4 + $0x2c8] sm:$0xff] }
 0x473   :  { %692 = vrot.lane.b32.xlu1 %v4166_v32, %s4198_s0  ;;  %s4206_s0 = smov 24  }
 0x475   :  { %v582_v49 = vpop.permute.xlu1 %581 }
 0x476   :  { %585 = vst.msk [vmem:[#allocation4 + $0x200] sm:$0xff] %vm193_vm1, %v582_v49  ;;  %v1971_v49 = vld [vmem:[#allocation4 + $0x2c0] sm:$0xff] }
 0x479   :  { %v4135_v50 = vpop.eup %4134 }
 0x47a   :  { %v1875_v51 = vmul.f32 %v4135_v50, %v4123_v21  ;;  %v1936_v21 = vld [vmem:[#allocation4 + $0x1a8] sm:$0xff]  ;;  %v1970_v50 = vld [vmem:[#allocation4 + $0x2b8] sm:$0xff] }
 0x47c   :  { %3811 = vmatmul.mubr.f32.vlgmr.msra.gmra.mxu1 %v1875_v51 }
 0x47d   :  { %3849 = vmatpush3.msra.mxu1 %v1930_v52  ;;  %657 = vrot.lane.b32.xlu0 %v4166_v32, %s4192_s26  ;;  %v1968_v52 = vld [vmem:[#allocation4 + $0x2a8] sm:$0xff]  ;;  %s4205_s26 = smov 16  }
 0x47e   :  { %3850 = vmatprep.subr.mxu1 %v4193_v35  ;;  %3880 = vmatprep.mubr.msk.f32.mxu1 %vm4194_vm3, %v4193_v35 }
 0x47f   :  { %v4137_v55 = vpop.eup %4136  ;;  %3851 = vmatpush3.msra.mxu1 %v1929_v53 }
 0x480   :  { %3852 = vmatprep.subr.mxu1 %v4193_v35  ;;  %v1876_v56 = vmul.f32 %v4137_v55, %v4125_v22  ;;  %v1917_v22 = vld [vmem:[#allocation4 + $0x110] sm:$0xff] }
 0x481   :  { %3853 = vmatpush3.msra.mxu1 %v1928_v54  ;;  %v1967_v54 = vld [vmem:[#allocation4 + $0x2a0] sm:$0xff] }
 0x482   :  { %3846 = vmatmul.mubr.f32.vlgmr.msra.gmra.mxu0 %v1876_v56  ;;  %v5317_v60 = vadd.f32 %v1876_v56, %v1875_v51  ;;  %3854 = vmatprep.subr.mxu1 %v4193_v35  ;;  %v1969_v51 = vld [vmem:[#allocation4 + $0x2b0] sm:$0xff]  ;;  %v1962_v56 = vld [vmem:[#allocation4 + $0x278] sm:$0xff] }
 0x483   :  { %3884 = vmatpush3.msra.mxu0 %v1946_v57  ;;  %3855 = vmatpush3.msra.mxu1 %v1927_v58  ;;  %v1966_v58 = vld [vmem:[#allocation4 + $0x298] sm:$0xff] }
 0x484   :  { %3885 = vmatprep.subr.mxu0 %v4193_v35  ;;  %3856 = vmatprep.subr.mxu1 %v4193_v35 }
 0x485   :  { %3886 = vmatpush3.msra.mxu0 %v1945_v61  ;;  %3857 = vmatpush3.msra.mxu1 %v1926_v62  ;;  %v1961_v61 = vld [vmem:[#allocation4 + $0x270] sm:$0xff] }
 0x486   :  { %3887 = vmatprep.subr.mxu0 %v4193_v35  ;;  %3858 = vmatprep.subr.mxu1 %v4193_v35  ;;  %v1965_v62 = vld [vmem:[#allocation4 + $0x290] sm:$0xff] }
 0x487   :  { %3888 = vmatpush3.msra.mxu0 %v1944_v63  ;;  %3859 = vmatpush3.msra.mxu1 %v1925_v0  ;;  %v1960_v63 = vld [vmem:[#allocation4 + $0x268] sm:$0xff] }
 0x488   :  { %3889 = vmatprep.subr.mxu0 %v4193_v35  ;;  %3860 = vmatprep.subr.mxu1 %v4193_v35 }
 0x489   :  { %3890 = vmatpush3.msra.mxu0 %v1943_v1  ;;  %3861 = vmatpush3.msra.mxu1 %v1924_v2  ;;  %v1959_v1 = vld [vmem:[#allocation4 + $0x260] sm:$0xff] }
 0x48a   :  { %3891 = vmatprep.subr.mxu0 %v4193_v35  ;;  %3862 = vmatprep.subr.mxu1 %v4193_v35 }
 0x48b   :  { %3892 = vmatpush3.msra.mxu0 %v1942_v3  ;;  %3863 = vmatpush3.msra.mxu1 %v1923_v4  ;;  %v1958_v4 = vld [vmem:[#allocation4 + $0x258] sm:$0xff] }
 0x48c   :  { %3893 = vmatprep.subr.mxu0 %v4193_v35  ;;  %3864 = vmatprep.subr.mxu1 %v4193_v35 }
 0x48d   :  { %3894 = vmatpush3.msra.mxu0 %v1941_v5  ;;  %3865 = vmatpush3.msra.mxu1 %v1922_v6  ;;  %v1957_v6 = vld [vmem:[#allocation4 + $0x250] sm:$0xff] }
 0x48e   :  { %3895 = vmatprep.subr.mxu0 %v4193_v35  ;;  %3866 = vmatprep.subr.mxu1 %v4193_v35 }
 0x48f   :  { %3896 = vmatpush3.msra.mxu0 %v1940_v8  ;;  %3867 = vmatpush3.msra.mxu1 %v1921_v10  ;;  %v1824_v13 = vpop.xlane.xlu0 %1823  ;;  %v1956_v10 = vld [vmem:[#allocation4 + $0x248] sm:$0xff] }
 0x490   :  { %3897 = vmatprep.subr.mxu0 %v4193_v35  ;;  %3868 = vmatprep.subr.mxu1 %v4193_v35  ;;  %v1833_v14 = vsub.f32 %v5279_v24, %v1824_v13  ;;  %v1916_v24 = vld [vmem:[#allocation4 + $0x108] sm:$0xff] }
 0x491   :  { %3898 = vmatpush3.msra.mxu0 %v1939_v11  ;;  %3869 = vmatpush3.msra.mxu1 %v1920_v12  ;;  %v1955_v11 = vld [vmem:[#allocation4 + $0x240] sm:$0xff]  ;;  %v1954_v12 = vld [vmem:[#allocation4 + $0x238] sm:$0xff] }
 0x492   :  { %v1847_v17 = vmul.f32 1.442695, %v1833_v14  ;;  %3899 = vmatprep.subr.mxu0 %v4193_v35  ;;  %3870 = vmatprep.subr.mxu1 %v4193_v35  ;;  %v1953_v14 = vld [vmem:[#allocation4 + $0x230] sm:$0xff] }
 0x493   :  { %3900 = vmatpush3.msra.mxu0 %v1938_v15  ;;  %3871 = vmatpush3.msra.mxu1 %v1919_v16  ;;  %v623_v20 = vpop.permute.xlu0 %622  ;;  %v1952_v16 = vld [vmem:[#allocation4 + $0x228] sm:$0xff] }
 0x494   :  { %4138 = vpow2.f32 %v1847_v17  ;;  %3901 = vmatprep.subr.mxu0 %v4193_v35  ;;  %3872 = vmatprep.subr.mxu1 %v4193_v35  ;;  %625 = vst.msk [vmem:[#allocation4 + $0x288] sm:$0x1] %vm462_vm2, %v623_v20  ;;  %v1951_v20 = vld [vmem:[#allocation4 + $0x220] sm:$0xff] }
 0x495   :  { %3902 = vmatpush3.msra.mxu0 %v1937_v18  ;;  %3873 = vmatpush3.msra.mxu1 %v1918_v9  ;;  %v2010_v18 = vld [vmem:[#allocation4 + $0x3f8] sm:$0xff] }
 0x496   :  { %3903 = vmatprep.subr.mxu0 %v4193_v35  ;;  %3874 = vmatprep.subr.mxu1 %v4193_v35 }
 0x497   :  { %3904 = vmatpush3.msra.mxu0 %v1936_v21  ;;  %3875 = vmatpush3.msra.mxu1 %v1917_v22  ;;  %v2009_v21 = vld [vmem:[#allocation4 + $0x3f0] sm:$0xff] }
 0x498   :  { %3905 = vmatprep.subr.mxu0 %v4193_v35  ;;  %3876 = vmatprep.subr.mxu1 %v4193_v35 }
 0x499   :  { %3906 = vmatpush3.msra.mxu0 %v1935_v23  ;;  %3877 = vmatpush3.msra.mxu1 %v1916_v24  ;;  %v1950_v23 = vld [vmem:[#allocation4 + $0x218] sm:$0xff]  ;;  %v2008_v24 = vld [vmem:[#allocation4 + $0x3e8] sm:$0xff] }
 0x49a   :  { %3907 = vmatprep.subr.mxu0 %v4193_v35  ;;  %3878 = vmatprep.subr.mxu1 %v4193_v35 }
 0x49b   :  { %3908 = vmatpush3.msra.mxu0 %v1934_v25  ;;  %3879 = vmatpush3.msra.mxu1 %v1915_v26  ;;  %v1964_v3 = vld [vmem:[#allocation4 + $0x288] sm:$0xff]  ;;  %v2006_v26 = vld [vmem:[#allocation4 + $0x3d8] sm:$0xff] }
 0x49c   :  { %3909 = vmatprep.subr.mxu0 %v4193_v35  ;;  %3915 = vmatprep.mubr.msk.f32.mxu0 %vm4194_vm3, %v4193_v35  ;;  %v1948_v25 = vld [vmem:[#allocation4 + $0x208] sm:$0xff] }
 0x49d   :  { %3910 = vmatpush3.msra.mxu0 %v1933_v27  ;;  %3918 = vmatprep.subr.mxu1 %v4193_v35  ;;  %v1947_v27 = vld [vmem:[#allocation4 + $0x200] sm:$0xff] }
 0x49e   :  { %3911 = vmatprep.subr.mxu0 %v4193_v35 }
 0x49f   :  { %3912 = vmatpush3.msra.mxu0 %v1932_v28  ;;  %v2005_v28 = vld [vmem:[#allocation4 + $0x3d0] sm:$0xff] }
 0x4a0   :  { %3913 = vmatprep.subr.mxu0 %v4193_v35 }
 0x4a1   :  { %v5352_v30 = vpop.eup %4138  ;;  %3914 = vmatpush3.msra.mxu0 %v1931_v29  ;;  %v1994_v29 = vld [vmem:[#allocation4 + $0x378] sm:$0xff] }
 0x4a2   :  { %1863 = vadd.xlane.f32.xlu0 %v5352_v30  ;;  %3953 = vmatprep.subr.mxu0 %v4193_v35 }
 0x4a6   :  { %v1826_v32 = vpop.xlane.xlu1 %1825 }
 0x4a7   :  { %v1834_v33 = vsub.f32 %v5285_v31, %v1826_v32  ;;  %v2004_v32 = vld [vmem:[#allocation4 + $0x3c8] sm:$0xff] }
 0x4a9   :  { %v1849_v34 = vmul.f32 1.442695, %v1834_v33  ;;  %v1993_v33 = vld [vmem:[#allocation4 + $0x370] sm:$0xff] }
 0x4aa   :  { %v602_v19 = vpop.permute.xlu1 %601 }
 0x4ab   :  { %4140 = vpow2.f32 %v1849_v34  ;;  %605 = vst.msk [vmem:[#allocation4 + $0x280] sm:$0xff] %vm193_vm1, %v602_v19  ;;  %v2003_v34 = vld [vmem:[#allocation4 + $0x3c0] sm:$0xff]  ;;  %v1992_v19 = vld [vmem:[#allocation4 + $0x368] sm:$0xff] }
 0x4b2   :  { %v1963_v5 = vld [vmem:[#allocation4 + $0x280] sm:$0xff] }
 0x4b8   :  { %v5358_v37 = vpop.eup %4140  ;;  %636 = vrot.lane.b32.xlu0 %v4916_v7, %s4202_s22 }
 0x4b9   :  { %1865 = vadd.xlane.f32.xlu1 %v5358_v37 }
 0x4c4   :  { %v1858_v38 = vpop.xlane.xlu0 %1857 }
 0x4c5   :  { %4142 = vrcp.f32 %v1858_v38  ;;  %v2002_v38 = vld [vmem:[#allocation4 + $0x3b8] sm:$0xff] }
 0x4ca   :  { %671 = vrot.lane.b32.xlu1 %v4916_v7, %s4203_s28  ;;  %v1974_v7 = vld [vmem:[#allocation4 + $0x2d8] sm:$0xff] }
 0x4d2   :  { %v4143_v39 = vpop.eup %4142 }
 0x4d3   :  { %v1878_v31 = vmul.f32 %v4143_v39, %v5294_v36  ;;  %v1973_v36 = vld [vmem:[#allocation4 + $0x2d0] sm:$0xff]  ;;  %v1991_v39 = vld [vmem:[#allocation4 + $0x360] sm:$0xff] }
 0x4d5   :  { %3916 = vmatmul.mubr.f32.vlgmr.msra.gmra.mxu0 %v1878_v31 }
 0x4d6   :  { %3954 = vmatpush3.msra.mxu0 %v1978_v41  ;;  %3985 = vmatprep.mubr.msk.f32.mxu0 %vm4194_vm3, %v4193_v35  ;;  %v1990_v41 = vld [vmem:[#allocation4 + $0x358] sm:$0xff] }
 0x4d7   :  { %3955 = vmatprep.subr.mxu0 %v4193_v35 }
 0x4d8   :  { %3956 = vmatpush3.msra.mxu0 %v1977_v42  ;;  %v2000_v42 = vld [vmem:[#allocation4 + $0x3a8] sm:$0xff] }
 0x4d9   :  { %3957 = vmatprep.subr.mxu0 %v4193_v35 }
 0x4da   :  { %3958 = vmatpush3.msra.mxu0 %v1976_v43  ;;  %v1989_v43 = vld [vmem:[#allocation4 + $0x350] sm:$0xff] }
 0x4db   :  { %v1856_v47 = vpop.xlane.xlu1 %1855  ;;  %3959 = vmatprep.subr.mxu0 %v4193_v35 }
 0x4dc   :  { %4144 = vrcp.f32 %v1856_v47  ;;  %3960 = vmatpush3.msra.mxu0 %v1975_v44  ;;  %v1999_v44 = vld [vmem:[#allocation4 + $0x3a0] sm:$0xff]  ;;  %v1988_v47 = vld [vmem:[#allocation4 + $0x348] sm:$0xff] }
 0x4dd   :  { %3961 = vmatprep.subr.mxu0 %v4193_v35 }
 0x4de   :  { %3962 = vmatpush3.msra.mxu0 %v1974_v7  ;;  %v1998_v7 = vld [vmem:[#allocation4 + $0x398] sm:$0xff] }
 0x4df   :  { %3963 = vmatprep.subr.mxu0 %v4193_v35 }
 0x4e0   :  { %3964 = vmatpush3.msra.mxu0 %v1973_v36  ;;  %v1987_v36 = vld [vmem:[#allocation4 + $0x340] sm:$0xff] }
 0x4e1   :  { %3965 = vmatprep.subr.mxu0 %v4193_v35 }
 0x4e2   :  { %3966 = vmatpush3.msra.mxu0 %v1972_v48  ;;  %v1997_v48 = vld [vmem:[#allocation4 + $0x390] sm:$0xff] }
 0x4e3   :  { %3967 = vmatprep.subr.mxu0 %v4193_v35 }
 0x4e4   :  { %3968 = vmatpush3.msra.mxu0 %v1971_v49  ;;  %v1986_v49 = vld [vmem:[#allocation4 + $0x338] sm:$0xff] }
 0x4e5   :  { %3969 = vmatprep.subr.mxu0 %v4193_v35 }
 0x4e6   :  { %3970 = vmatpush3.msra.mxu0 %v1970_v50  ;;  %v1985_v50 = vld [vmem:[#allocation4 + $0x330] sm:$0xff] }
 0x4e7   :  { %3971 = vmatprep.subr.mxu0 %v4193_v35 }
 0x4e8   :  { %3972 = vmatpush3.msra.mxu0 %v1969_v51 }
 0x4e9   :  { %v4145_v53 = vpop.eup %4144  ;;  %3973 = vmatprep.subr.mxu0 %v4193_v35 }
 0x4ea   :  { %3974 = vmatpush3.msra.mxu0 %v1968_v52  ;;  %v1877_v55 = vmul.f32 %v4145_v53, %v5297_v40  ;;  %v1984_v52 = vld [vmem:[#allocation4 + $0x328] sm:$0xff]  ;;  %v1983_v53 = vld [vmem:[#allocation4 + $0x320] sm:$0xff] }
 0x4eb   :  { %3975 = vmatprep.subr.mxu0 %v4193_v35  ;;  %v1860_v57 = vpop.xlane.xlu1 %1859 }
 0x4ec   :  { %3881 = vmatmul.mubr.f32.vlgmr.msra.gmra.mxu1 %v1877_v55  ;;  %v2572_v59 = vadd.f32 %v5317_v60, %v1877_v55  ;;  %3976 = vmatpush3.msra.mxu0 %v1967_v54  ;;  %4146 = vrcp.f32 %v1860_v57  ;;  %v1982_v54 = vld [vmem:[#allocation4 + $0x318] sm:$0xff]  ;;  %v1981_v55 = vld [vmem:[#allocation4 + $0x310] sm:$0xff] }
 0x4ed   :  { %3919 = vmatpush3.msra.mxu1 %v1962_v56  ;;  %3977 = vmatprep.subr.mxu0 %v4193_v35 }
 0x4ee   :  { %3920 = vmatprep.subr.mxu1 %v4193_v35  ;;  %3978 = vmatpush3.msra.mxu0 %v1966_v58  ;;  %v2573_v0 = vadd.f32 %v2572_v59, %v1878_v31  ;;  %v2001_v31 = vld [vmem:[#allocation4 + $0x3b0] sm:$0xff] }
 0x4ef   :  { %3921 = vmatpush3.msra.mxu1 %v1961_v61  ;;  %3979 = vmatprep.subr.mxu0 %v4193_v35  ;;  %v693_v40 = vpop.permute.xlu1 %692 }
 0x4f0   :  { %3922 = vmatprep.subr.mxu1 %v4193_v35  ;;  %3980 = vmatpush3.msra.mxu0 %v1965_v62  ;;  %v1862_v60 = vpop.xlane.xlu0 %1861  ;;  %695 = vst.msk [vmem:[#allocation4 + $0x388] sm:$0x1] %vm462_vm2, %v693_v40  ;;  %v2577_v2 = vmul.f32 0.25, %v2573_v0 }
 0x4f1   :  { %3923 = vmatpush3.msra.mxu1 %v1960_v63  ;;  %4148 = vrcp.f32 %v1862_v60  ;;  %3981 = vmatprep.subr.mxu0 %v4193_v35 }
 0x4f2   :  { %3924 = vmatprep.subr.mxu1 %v4193_v35  ;;  %3982 = vmatpush3.msra.mxu0 %v1964_v3  ;;  %2579 = vst [vmem:[#allocation6] sm:$0xff] %v2577_v2 }
 0x4f3   :  { %3925 = vmatpush3.msra.mxu1 %v1959_v1  ;;  %3983 = vmatprep.subr.mxu0 %v4193_v35 }
 0x4f4   :  { %3926 = vmatprep.subr.mxu1 %v4193_v35  ;;  %3984 = vmatpush3.msra.mxu0 %v1963_v5  ;;  %v658_v8 = vpop.permute.xlu0 %657 }
 0x4f5   :  { %3927 = vmatpush3.msra.mxu1 %v1958_v4  ;;  %4023 = vmatprep.subr.mxu0 %v4193_v35  ;;  %660 = vst.msk [vmem:[#allocation4 + $0x308] sm:$0x1] %vm462_vm2, %v658_v8 }
 0x4f6   :  { %3928 = vmatprep.subr.mxu1 %v4193_v35  ;;  %3950 = vmatprep.mubr.msk.f32.mxu1 %vm4194_vm3, %v4193_v35 }
 0x4f7   :  { %3929 = vmatpush3.msra.mxu1 %v1957_v6  ;;  %v1996_v51 = vld [vmem:[#allocation4 + $0x388] sm:$0xff] }
 0x4f8   :  { %3930 = vmatprep.subr.mxu1 %v4193_v35 }
 0x4f9   :  { %3931 = vmatpush3.msra.mxu1 %v1956_v10  ;;  %v4147_v13 = vpop.eup %4146 }
 0x4fa   :  { %3932 = vmatprep.subr.mxu1 %v4193_v35  ;;  %v1879_v9 = vmul.f32 %v4147_v13, %v5300_v45  ;;  %v1949_v45 = vld [vmem:[#allocation4 + $0x210] sm:$0xff] }
 0x4fb   :  { %3933 = vmatpush3.msra.mxu1 %v1955_v11 }
 0x4fc   :  { %3934 = vmatprep.subr.mxu1 %v4193_v35  ;;  %v1980_v56 = vld [vmem:[#allocation4 + $0x308] sm:$0xff] }
 0x4fd   :  { %3935 = vmatpush3.msra.mxu1 %v1954_v12 }
 0x4fe   :  { %v4149_v15 = vpop.eup %4148  ;;  %3936 = vmatprep.subr.mxu1 %v4193_v35 }
 0x4ff   :  { %3937 = vmatpush3.msra.mxu1 %v1953_v14  ;;  %v1880_v17 = vmul.f32 %v4149_v15, %v5303_v46  ;;  %v2007_v46 = vld [vmem:[#allocation4 + $0x3e0] sm:$0xff] }
 0x500   :  { %3938 = vmatprep.subr.mxu1 %v4193_v35 }
 0x501   :  { %3939 = vmatpush3.msra.mxu1 %v1952_v16  ;;  %3986 = vmatmul.mubr.f32.vlgmr.msra.gmra.mxu0 %v1880_v17  ;;  %v5402_v22 = vadd.f32 %v1880_v17, %v1879_v9 }
 0x502   :  { %3940 = vmatprep.subr.mxu1 %v4193_v35  ;;  %4024 = vmatpush3.msra.mxu0 %v2010_v18 }
 0x503   :  { %3941 = vmatpush3.msra.mxu1 %v1951_v20  ;;  %4025 = vmatprep.subr.mxu0 %v4193_v35  ;;  %v2620_v20 = vld [vmem:[%s5561_s7 + $0x10] sm:$0xff] }
 0x504   :  { %3942 = vmatprep.subr.mxu1 %v4193_v35  ;;  %4026 = vmatpush3.msra.mxu0 %v2009_v21  ;;  %v2619_v21 = vld [vmem:[%s5561_s7 + $0x8] sm:$0xff] }
 0x505   :  { %3943 = vmatpush3.msra.mxu1 %v1950_v23  ;;  %4027 = vmatprep.subr.mxu0 %v4193_v35 }
 0x506   :  { %3944 = vmatprep.subr.mxu1 %v4193_v35  ;;  %4028 = vmatpush3.msra.mxu0 %v2008_v24 }
 0x507   :  { %3945 = vmatpush3.msra.mxu1 %v1949_v45  ;;  %4029 = vmatprep.subr.mxu0 %v4193_v35 }
 0x508   :  { %3946 = vmatprep.subr.mxu1 %v4193_v35  ;;  %4030 = vmatpush3.msra.mxu0 %v2007_v46 }
 0x509   :  { %3947 = vmatpush3.msra.mxu1 %v1948_v25  ;;  %4031 = vmatprep.subr.mxu0 %v4193_v35 }
 0x50a   :  { %3948 = vmatprep.subr.mxu1 %v4193_v35  ;;  %4032 = vmatpush3.msra.mxu0 %v2006_v26 }
 0x50b   :  { %3949 = vmatpush3.msra.mxu1 %v1947_v27  ;;  %4033 = vmatprep.subr.mxu0 %v4193_v35 }
 0x50c   :  { %3951 = vmatmul.mubr.f32.vlgmr.msra.gmra.mxu1 %v1879_v9  ;;  %3988 = vmatprep.subr.mxu1 %v4193_v35  ;;  %v2621_v9 = vld [vmem:[%s5561_s7 + $0x18] sm:$0xff] }
 0x50d   :  { %4034 = vmatpush3.msra.mxu0 %v2005_v28  ;;  %3989 = vmatpush3.msra.mxu1 %v1994_v29 }
 0x50e   :  { %4035 = vmatprep.subr.mxu0 %v4193_v35  ;;  %3990 = vmatprep.subr.mxu1 %v4193_v35 }
 0x50f   :  { %4036 = vmatpush3.msra.mxu0 %v2004_v32  ;;  %3991 = vmatpush3.msra.mxu1 %v1993_v33  ;;  %v3176_v32 = vld [vmem:[%s5562_s8] ss:$0 sm:$0xff] }
 0x510   :  { %4037 = vmatprep.subr.mxu0 %v4193_v35  ;;  %3992 = vmatprep.subr.mxu1 %v4193_v35 }
 0x511   :  { %4038 = vmatpush3.msra.mxu0 %v2003_v34  ;;  %3993 = vmatpush3.msra.mxu1 %v1992_v19 }
 0x512   :  { %4039 = vmatprep.subr.mxu0 %v4193_v35  ;;  %3994 = vmatprep.subr.mxu1 %v4193_v35 }
 0x513   :  { %4040 = vmatpush3.msra.mxu0 %v2002_v38  ;;  %3995 = vmatpush3.msra.mxu1 %v1991_v39  ;;  %v4167_v38 = vld [vmem:[%s5573_s23 + $0x8] sm:$0xff] }
 0x514   :  { %4041 = vmatprep.subr.mxu0 %v4193_v35  ;;  %3996 = vmatprep.subr.mxu1 %v4193_v35 }
 0x515   :  { %4042 = vmatpush3.msra.mxu0 %v2001_v31  ;;  %3997 = vmatpush3.msra.mxu1 %v1990_v41  ;;  %v4168_v41 = vld [vmem:[%s5573_s23] sm:$0xff] }
 0x516   :  { %4043 = vmatprep.subr.mxu0 %v4193_v35  ;;  %3998 = vmatprep.subr.mxu1 %v4193_v35 }
 0x517   :  { %4044 = vmatpush3.msra.mxu0 %v2000_v42  ;;  %3999 = vmatpush3.msra.mxu1 %v1989_v43 }
 0x518   :  { %4045 = vmatprep.subr.mxu0 %v4193_v35  ;;  %4000 = vmatprep.subr.mxu1 %v4193_v35 }
 0x519   :  { %4046 = vmatpush3.msra.mxu0 %v1999_v44  ;;  %4001 = vmatpush3.msra.mxu1 %v1988_v47 }
 0x51a   :  { %4047 = vmatprep.subr.mxu0 %v4193_v35  ;;  %4002 = vmatprep.subr.mxu1 %v4193_v35 }
 0x51b   :  { %4048 = vmatpush3.msra.mxu0 %v1998_v7  ;;  %4003 = vmatpush3.msra.mxu1 %v1987_v36 }
 0x51c   :  { %4049 = vmatprep.subr.mxu0 %v4193_v35  ;;  %4004 = vmatprep.subr.mxu1 %v4193_v35 }
 0x51d   :  { %4050 = vmatpush3.msra.mxu0 %v1997_v48  ;;  %4005 = vmatpush3.msra.mxu1 %v1986_v49 }
 0x51e   :  { %4051 = vmatprep.subr.mxu0 %v4193_v35  ;;  %4006 = vmatprep.subr.mxu1 %v4193_v35 }
 0x51f   :  { %4052 = vmatpush3.msra.mxu0 %v1996_v51  ;;  %4007 = vmatpush3.msra.mxu1 %v1985_v50 }
 0x520   :  { %4008 = vmatprep.subr.mxu1 %v4193_v35  ;;  %4020 = vmatprep.mubr.msk.f32.mxu1 %vm4194_vm3, %v4193_v35 }
 0x521   :  { %4009 = vmatpush3.msra.mxu1 %v1984_v52  ;;  %4053 = vmatprep.subr.mxu0 %v4193_v35 }
 0x522   :  { %4010 = vmatprep.subr.mxu1 %v4193_v35  ;;  %4055 = vmatprep.mubr.msk.f32.mxu0 %vm4194_vm3, %v4193_v35 }
 0x523   :  { %4011 = vmatpush3.msra.mxu1 %v1983_v53 }
 0x524   :  { %4012 = vmatprep.subr.mxu1 %v4193_v35 }
 0x525   :  { %4013 = vmatpush3.msra.mxu1 %v1982_v54 }
 0x526   :  { %4014 = vmatprep.subr.mxu1 %v4193_v35 }
 0x527   :  { %4015 = vmatpush3.msra.mxu1 %v1981_v55  ;;  %v2759_v55 = vld [vmem:[%s5565_s11 + $0x18] sm:$0xff] }
 0x528   :  { %4016 = vmatprep.subr.mxu1 %v4193_v35 }
 0x529   :  { %4017 = vmatpush3.msra.mxu1 %v1980_v56  ;;  %v2758_v56 = vld [vmem:[%s5565_s11 + $0x10] sm:$0xff] }
 0x52a   :  { %4018 = vmatprep.subr.mxu1 %v4193_v35 }
 0x52b   :  { %v1864_v57 = vpop.xlane.xlu0 %1863 }
 0x52c   :  { %4150 = vrcp.f32 %v1864_v57  ;;  %v2757_v57 = vld [vmem:[%s5565_s11 + $0x8] sm:$0xff] }
 0x52f   :  { %v637_v58 = vpop.permute.xlu0 %636 }
 0x530   :  { %640 = vst.msk [vmem:[#allocation4 + $0x300] sm:$0xff] %vm193_vm1, %v637_v58  ;;  %v2756_v58 = vld [vmem:[%s5565_s11] sm:$0xff] }
 0x537   :  { %v1979_v59 = vld [vmem:[#allocation4 + $0x300] sm:$0xff] }
 0x538   :  { %4019 = vmatpush3.msra.mxu1 %v1979_v59 }
 0x539   :  { %v4151_v61 = vpop.eup %4150  ;;  %4058 = vmatprep.subr.mxu1 %v2621_v9 }
 0x53a   :  { %v1881_v62 = vmul.f32 %v4151_v61, %v5352_v30 }
 0x53c   :  { %v2077_v63 = vpop.f32.mrf.mxu1  ;;  %4021 = vmatmul.mubr.f32.vlgmr.msra.gmra.mxu1 %v1881_v62  ;;  %v2575_v30 = vadd.f32 %v5402_v22, %v1881_v62  ;;  %v2618_v22 = vld [vmem:[%s5561_s7] sm:$0xff] }
 0x53d   :  { %2581 = vst.msk [vmem:[#allocation5] sm:$0xff] %vm193_vm1, %v2077_v63  ;;  %4059 = vmatpush3.msra.mxu1 %v2621_v9 }
 0x53e   :  { %v3812_v0 = vpop.f32.mrf.mxu1  ;;  %4060 = vmatprep.subr.mxu1 %v2620_v20 }
 0x53f   :  { %4061 = vmatpush3.msra.mxu1 %v2620_v20 }
 0x540   :  { %4062 = vmatprep.subr.mxu1 %v2619_v21 }
 0x541   :  { %4063 = vmatpush3.msra.mxu1 %v2619_v21 }
 0x542   :  { %v2147_v40 = vpop.f32.mrf.mxu0  ;;  %v1866_v60 = vpop.xlane.xlu1 %1865  ;;  %4064 = vmatprep.subr.mxu1 %v2618_v22 }
 0x543   :  { %4152 = vrcp.f32 %v1866_v60  ;;  %2583 = vrot.lane.b32.xlu0 %v2147_v40, %s4204_s6  ;;  %4065 = vmatpush3.msra.mxu1 %v2618_v22 }
 0x544   :  { %v3847_v35 = vpop.f32.mrf.mxu0 }
 0x545   :  { %v3179_v35 = vld [vmem:[%s5563_s9] ss:$0 sm:$0xff] }
 0x546   :  { %v672_v1 = vpop.permute.xlu1 %671 }
 0x547   :  { %675 = vst.msk [vmem:[#allocation4 + $0x380] sm:$0xff] %vm193_vm1, %v672_v1 }
 0x54e   :  { %v1995_v2 = vld [vmem:[#allocation4 + $0x380] sm:$0xff] }
 0x54f   :  { %4054 = vmatpush3.msra.mxu0 %v1995_v2  ;;  %v3180_v2 = vld [vmem:[%s5564_s10] ss:$0 sm:$0xff] }
 0x550   :  { %v4153_v3 = vpop.eup %4152  ;;  %4069 = vmatprep.subr.mxu0 %v2759_v55 }
 0x551   :  { %v1882_v4 = vmul.f32 %v4153_v3, %v5358_v37 }
 0x553   :  { %4056 = vmatmul.mubr.f32.vlgmr.msra.gmra.mxu0 %v1882_v4  ;;  %v2576_v5 = vadd.f32 %v2575_v30, %v1882_v4 }
 0x554   :  { %4070 = vmatpush3.msra.mxu0 %v2759_v55 }
 0x555   :  { %v2578_v6 = vmul.f32 0.25, %v2576_v5  ;;  %4071 = vmatprep.subr.mxu0 %v2758_v56 }
 0x556   :  { %4072 = vmatpush3.msra.mxu0 %v2758_v56 }
 0x557   :  { %2580 = vst [vmem:[#allocation6 + $0x8] sm:$0xff] %v2578_v6  ;;  %4073 = vmatprep.subr.mxu0 %v2757_v57 }
 0x558   :  { %4074 = vmatpush3.msra.mxu0 %v2757_v57 }
 0x559   :  { %4075 = vmatprep.subr.mxu0 %v2756_v58 }
 0x55a   :  { %4076 = vmatpush3.msra.mxu0 %v2756_v58 }
 0x595   :  { %v2287_v8 = vpop.f32.mrf.mxu0 }
 0x597   :  { %v3917_v10 = vpop.f32.mrf.mxu0 }
 0x598   :  { %v2909_v10 = vld [vmem:[%s5567_s13 + $0x38] sm:$0xff] }
 0x599   :  { %4080 = vmatprep.subr.mxu1 %v2909_v10 }
 0x5ac   :  { %v2217_v11 = vpop.f32.mrf.mxu1 }
 0x5ad   :  { %2589 = vrot.lane.b32.xlu1 %v2217_v11, %s4205_s26  ;;  %v2908_v11 = vld [vmem:[%s5567_s13 + $0x30] sm:$0xff] }
 0x5ae   :  { %v3882_v12 = vpop.f32.mrf.mxu1 }
 0x5af   :  { %v2907_v12 = vld [vmem:[%s5567_s13 + $0x28] sm:$0xff] }
 0x5b1   :  { %2595 = vrot.lane.b32.xlu1 %v2287_v8, %s4206_s0 }
 0x5b5   :  { %v2584_v13 = vpop.permute.xlu0 %2583 }
 0x5b6   :  { %2587 = vst.msk [vmem:[#allocation5] sm:$0xff] %vm2586_vm5, %v2584_v13  ;;  %v2906_v13 = vld [vmem:[%s5567_s13 + $0x20] sm:$0xff] }
 0x5c1   :  { %v2427_v14 = vpop.f32.mrf.mxu0 }
 0x5c2   :  { %2602 = vrot.lane.b32.xlu0 %v2427_v14, %s4204_s6  ;;  %v2905_v14 = vld [vmem:[%s5567_s13 + $0x18] sm:$0xff] }
 0x5c3   :  { %v3987_v37 = vpop.f32.mrf.mxu0 }
 0x5c4   :  { %v2904_v37 = vld [vmem:[%s5567_s13 + $0x10] sm:$0xff] }
 0x5cc   :  { %v2357_v15 = vpop.f32.mrf.mxu1 }
 0x5cd   :  { %2600 = vst.msk [vmem:[#allocation5 + $0x8] sm:$0xff] %vm193_vm1, %v2357_v15  ;;  %v2903_v15 = vld [vmem:[%s5567_s13 + $0x8] sm:$0xff] }
 0x5ce   :  { %v3952_v16 = vpop.f32.mrf.mxu1 }
 0x5cf   :  { %v2902_v16 = vld [vmem:[%s5567_s13] sm:$0xff] }
 0x5fc   :  { %v2497_v17 = vpop.f32.mrf.mxu1 }
 0x5fd   :  { %2607 = vrot.lane.b32.xlu0 %v2497_v17, %s4205_s26  ;;  %v3181_v17 = vld [vmem:[%s5566_s12] ss:$0 sm:$0xff]  ;;  %s4208_s12 = smov [#allocation6]  }
 0x5fe   :  { %v4022_v18 = vpop.f32.mrf.mxu1  ;;  %s3010_s13 = sshll.u32 %s4208_s12, 4  ;;  %s3011_s13 = int_to_ptr.vmem [resolvable:$true] %s3010_s13 }
 0x5ff   :  { %s4169_s30 = scalar_lea.vmem %s3011_s13, 256  ;;  %p4174_p1 = scmp.lt.s32.totalorder %s3011_s13, %s3011_s13 }
 0x600   :  { %p4170_p0 = scmp.ne.s32.totalorder %s3011_s13, %s4169_s30  ;;  %p4175_p2 = scmp.lt.s32.totalorder %s4169_s30, %s4169_s30 }
 0x602   :  { %p4176_p3 = por %p4175_p2, %p4174_p1 }
 0x604   :  { %p4177_p4 = pnand %p4176_p3, %p4170_p0 }
 0x613   :  { %v2567_v23 = vpop.f32.mrf.mxu0 }
 0x614   :  { %2612 = vrot.lane.b32.xlu1 %v2567_v23, %s4206_s0 }
 0x615   :  { %v4057_v24 = vpop.f32.mrf.mxu0 }
 0x61f   :  { %v2590_v45 = vpop.permute.xlu1 %2589 }
 0x620   :  { %2593 = vst.msk [vmem:[#allocation5] sm:$0xff] %vm2592_vm6, %v2590_v45 }
 0x623   :  { %v2596_v46 = vpop.permute.xlu1 %2595 }
 0x624   :  { %2599 = vst.msk [vmem:[#allocation5] sm:$0xff] %vm2598_vm7, %v2596_v46 }
 0x62b   :  { %v2616_v25 = vld [vmem:[#allocation5] sm:$0xff] }
 0x62c   :  { %4066 = vmatprep.mubr.msk.f32.mxu1 %vm57_vm0, %v2616_v25 }
 0x634   :  { %v2603_v26 = vpop.permute.xlu0 %2602 }
 0x635   :  { %2605 = vst.msk [vmem:[#allocation5 + $0x8] sm:$0xff] %vm2586_vm5, %v2603_v26 }
 0x66f   :  { %v2608_v27 = vpop.permute.xlu0 %2607 }
 0x670   :  { %2610 = vst.msk [vmem:[#allocation5 + $0x8] sm:$0xff] %vm2592_vm6, %v2608_v27 }
 0x686   :  { %v2613_v28 = vpop.permute.xlu1 %2612 }
 0x687   :  { %2615 = vst.msk [vmem:[#allocation5 + $0x8] sm:$0xff] %vm2598_vm7, %v2613_v28 }
 0x68e   :  { %v2617_v29 = vld [vmem:[#allocation5 + $0x8] sm:$0xff] }
 0x68f   :  { %4067 = vmatmul.mubr.msk.f32.vlgmr.msra.gmra.mxu1 %vm57_vm0, %v2617_v29 }
 0x690   :  { %4081 = vmatpush3.msra.mxu1 %v2909_v10 }
 0x691   :  { %4082 = vmatprep.subr.mxu1 %v2908_v11 }
 0x692   :  { %4083 = vmatpush3.msra.mxu1 %v2908_v11 }
 0x693   :  { %4084 = vmatprep.subr.mxu1 %v2907_v12 }
 0x694   :  { %4085 = vmatpush3.msra.mxu1 %v2907_v12 }
 0x695   :  { %4086 = vmatprep.subr.mxu1 %v2906_v13 }
 0x696   :  { %4087 = vmatpush3.msra.mxu1 %v2906_v13 }
 0x697   :  { %4088 = vmatprep.subr.mxu1 %v2905_v14 }
 0x698   :  { %4089 = vmatpush3.msra.mxu1 %v2905_v14 }
 0x699   :  { %4090 = vmatprep.subr.mxu1 %v2904_v37 }
 0x69a   :  { %4091 = vmatpush3.msra.mxu1 %v2904_v37 }
 0x69b   :  { %4092 = vmatprep.subr.mxu1 %v2903_v15 }
 0x69c   :  { %4093 = vmatpush3.msra.mxu1 %v2903_v15 }
 0x69d   :  { %4094 = vmatprep.subr.mxu1 %v2902_v16 }
 0x69e   :  { %4095 = vmatpush3.msra.mxu1 %v2902_v16 }
 0x74f   :  { %v4068_v33 = vpop.f32.mrf.mxu1 }
 0x750   :  { %v2707_v34 = vadd.f32 %v4068_v33, %v3176_v32 }
 0x751   :  { %v2701_v19 = vpop.f32.mrf.mxu1 }
 0x752   :  { %v5475_v39 = vadd.f32 %v4167_v38, %v2707_v34  ;;  %v2702_v31 = vadd.f32 %v3176_v32, %v2701_v19 }
 0x754   :  { %v5480_v42 = vadd.f32 %v4168_v41, %v2702_v31  ;;  %v2717_v43 = vsel %vm57_vm0, %v5475_v39, 0.0 }
 0x755   :  { %2718 = vadd.xlane.f32.xlu1 %v2717_v43 }
 0x756   :  { %v2714_v44 = vsel %vm57_vm0, %v5480_v42, 0.0 }
 0x757   :  { %2715 = vadd.xlane.f32.xlu0 %v2714_v44 }
 0x7de   :  { %v2719_v47 = vpop.xlane.xlu1 %2718 }
 0x7df   :  { %v2721_v7 = vmul.f32 0.03125, %v2719_v47 }
 0x7e0   :  { %v2716_v36 = vpop.xlane.xlu0 %2715 }
 0x7e1   :  { %v2720_v48 = vmul.f32 0.03125, %v2716_v36  ;;  %v2723_v49 = vsub.f32 %v5475_v39, %v2721_v7 }
 0x7e3   :  { %v2722_v50 = vsub.f32 %v5480_v42, %v2720_v48  ;;  %v2725_v53 = vmul.f32 %v2723_v49, %v2723_v49 }
 0x7e5   :  { %v2724_v51 = vmul.f32 %v2722_v50, %v2722_v50  ;;  %v2729_v54 = vsel %vm57_vm0, %v2725_v53, 0.0 }
 0x7e7   :  { %v2726_v52 = vsel %vm57_vm0, %v2724_v51, 0.0 }
 0x7e8   :  { %2727 = vadd.xlane.f32.xlu0 %v2726_v52 }
 0x7ec   :  { %2730 = vadd.xlane.f32.xlu0 %v2729_v54 }
 0x871   :  { %v2728_v59 = vpop.xlane.xlu0 %2727 }
 0x872   :  { %v2732_v61 = vmul.f32 0.03125, %v2728_v59 }
 0x874   :  { %v2734_v62 = vadd.f32 1e-05, %v2732_v61 }
 0x875   :  { %v2731_v63 = vpop.xlane.xlu0 %2730 }
 0x876   :  { %4154 = vrsqrt.f32 %v2734_v62  ;;  %v2733_v0 = vmul.f32 0.03125, %v2731_v63 }
 0x878   :  { %v2735_v40 = vadd.f32 1e-05, %v2733_v0 }
 0x87a   :  { %4156 = vrsqrt.f32 %v2735_v40  ;;  %v4207_v40 = vmov -1.0  }
 0x883   :  { %v4155_v60 = vpop.eup %4154 }
 0x884   :  { %v2738_v1 = vmul.f32 %v4155_v60, %v2722_v50 }
 0x886   :  { %v2746_v3 = vmul.f32 %v3179_v35, %v2738_v1 }
 0x887   :  { %v4157_v30 = vpop.eup %4156 }
 0x888   :  { %v2739_v4 = vmul.f32 %v4157_v30, %v2723_v49  ;;  %v2754_v5 = vadd.f32 %v3180_v2, %v2746_v3 }
 0x88a   :  { %v2747_v6 = vmul.f32 %v3179_v35, %v2739_v4  ;;  %4077 = vmatprep.mubr.msk.f32.mxu0 %vm57_vm0, %v2754_v5 }
 0x88c   :  { %v2755_v8 = vadd.f32 %v3180_v2, %v2747_v6 }
 0x88e   :  { %4078 = vmatmul.mubr.msk.f32.vlgmr.msra.gmra.mxu0 %vm57_vm0, %v2755_v8 }
 0x94e   :  { %v4079_v18 = vpop.f32.mrf.mxu0 }
 0x94f   :  { %v2845_v9 = vadd.f32 %v4079_v18, %v3181_v17 }
 0x950   :  { %v2839_v20 = vpop.f32.mrf.mxu0 }
 0x951   :  { %v2851_v21 = vmul.f32 0.70710677, %v2845_v9  ;;  %v2840_v22 = vadd.f32 %v3181_v17, %v2839_v20  ;;  %v2849_v8 = vmul.f32 0.5, %v2845_v9 }
 0x953   :  { %v2857_v23 = vand.u32 2147483647, %v2851_v21  ;;  %v2850_v24 = vmul.f32 0.70710677, %v2840_v22  ;;  %vm2853_vm8 = vcmp.ge.f32.partialorder %v2851_v21, 0.0  ;;  %v2848_v5 = vmul.f32 0.5, %v2840_v22 }
 0x954   :  { %v2855_v60 = vsel %vm2853_vm8, 1.0, %v4207_v40 }
 0x955   :  { %v2859_v45 = vmul.f32 0.3275911, %v2857_v23  ;;  %v2856_v46 = vand.u32 2147483647, %v2850_v24  ;;  %v2885_v28 = vsub.f32 0.0, %v2857_v23  ;;  %vm2852_vm9 = vcmp.ge.f32.partialorder %v2850_v24, 0.0 }
 0x956   :  { %v2854_v3 = vsel %vm2852_vm9, 1.0, %v4207_v40 }
 0x957   :  { %v2861_v25 = vadd.f32 1.0, %v2859_v45  ;;  %v2858_v26 = vmul.f32 0.3275911, %v2856_v46  ;;  %v2884_v29 = vsub.f32 0.0, %v2856_v46  ;;  %v2887_v32 = vmul.f32 %v2885_v28, %v2857_v23 }
 0x959   :  { %4158 = vrcp.f32 %v2861_v25  ;;  %v2860_v27 = vadd.f32 1.0, %v2858_v26  ;;  %v2886_v34 = vmul.f32 %v2884_v29, %v2856_v46  ;;  %v2890_v38 = vmul.f32 1.442695, %v2887_v32 }
 0x95b   :  { %4160 = vrcp.f32 %v2860_v27  ;;  %v2888_v44 = vmul.f32 1.442695, %v2886_v34 }
 0x95c   :  { %4162 = vpow2.f32 %v2890_v38 }
 0x95d   :  { %4164 = vpow2.f32 %v2888_v44 }
 0x966   :  { %v4159_v33 = vpop.eup %4158 }
 0x967   :  { %v2867_v19 = vmul.f32 1.0614054, %v4159_v33 }
 0x968   :  { %v4161_v31 = vpop.eup %4160 }
 0x969   :  { %v2869_v41 = vadd.f32 -1.4531521, %v2867_v19  ;;  %v2866_v43 = vmul.f32 1.0614054, %v4161_v31  ;;  %v4163_v58 = vpop.eup %4162 }
 0x96a   :  { %v4165_v63 = vpop.eup %4164 }
 0x96b   :  { %v2871_v47 = vmul.f32 %v4159_v33, %v2869_v41  ;;  %v2868_v7 = vadd.f32 -1.4531521, %v2866_v43 }
 0x96d   :  { %v2873_v36 = vadd.f32 1.4214138, %v2871_v47  ;;  %v2870_v48 = vmul.f32 %v4161_v31, %v2868_v7 }
 0x96f   :  { %v2875_v49 = vmul.f32 %v4159_v33, %v2873_v36  ;;  %v2872_v50 = vadd.f32 1.4214138, %v2870_v48 }
 0x971   :  { %v2877_v51 = vadd.f32 -0.28449672, %v2875_v49  ;;  %v2874_v52 = vmul.f32 %v4161_v31, %v2872_v50 }
 0x973   :  { %v2879_v53 = vmul.f32 %v4159_v33, %v2877_v51  ;;  %v2876_v54 = vadd.f32 -0.28449672, %v2874_v52 }
 0x975   :  { %v2881_v55 = vadd.f32 0.2548296, %v2879_v53  ;;  %v2878_v56 = vmul.f32 %v4161_v31, %v2876_v54 }
 0x977   :  { %v2883_v57 = vmul.f32 %v4159_v33, %v2881_v55  ;;  %v2880_v59 = vadd.f32 0.2548296, %v2878_v56 }
 0x979   :  { %v2893_v61 = vmul.f32 %v4163_v58, %v2883_v57  ;;  %v2882_v62 = vmul.f32 %v4161_v31, %v2880_v59 }
 0x97b   :  { %v2895_v0 = vsub.f32 1.0, %v2893_v61  ;;  %v2892_v35 = vmul.f32 %v4165_v63, %v2882_v62 }
 0x97d   :  { %v2897_v1 = vmul.f32 %v2895_v0, %v2855_v60  ;;  %v2894_v2 = vsub.f32 1.0, %v2892_v35 }
 0x97f   :  { %v2896_v30 = vmul.f32 %v2894_v2, %v2854_v3  ;;  %v2899_v4 = vadd.f32 1.0, %v2897_v1 }
 0x981   :  { %v2898_v6 = vadd.f32 1.0, %v2896_v30  ;;  %v2901_v11 = vmul.f32 %v2899_v4, %v2849_v8 }
 0x983   :  { %v2900_v10 = vmul.f32 %v2898_v6, %v2848_v5 }
 0x985   :  { %4096 = vmatprep.mubr.msk.f32.mxu1 %vm2917_vm10, %v2900_v10 }
 0x986   :  { %4097 = vmatmul.mubr.msk.f32.vlgmr.msra.gmra.mxu1 %vm2917_vm10, %v2901_v11 }
 0x987   :  { %4180 = shalt.err (!%p4177_p4)
}
 0x988   :  { %s4209_s26 = smov 128   ;;  %v3184_v12 = vld [vmem:[%s5568_s14] ss:$0 sm:$0xff] }
 0x989   :  { %3016 = dma.vmem_to_hbm [thread:$0]  %s3011_s13, 256, %s5570_s16, [#allocation7], %s4209_s26, %s4209_s26, %s4204_s6  }
 0xa46   :  { %v4098_v13 = vpop.f32.mrf.mxu1 }
 0xa47   :  { %v2996_v14 = vadd.f32 %v4098_v13, %v3184_v12 }
 0xa48   :  { %v2990_v37 = vpop.f32.mrf.mxu1 }
 0xa49   :  { %v3000_v15 = vadd.f32 %v2996_v14, %v5475_v39  ;;  %v2991_v16 = vadd.f32 %v3184_v12, %v2990_v37 }
 0xa4b   :  { %3002 = vst.msk [vmem:[%s5569_s15 + $0x8] sm:$0xff] %vm57_vm0, %v3000_v15  ;;  %v2999_v17 = vadd.f32 %v2991_v16, %v5480_v42 }
 0xa4d   :  { %3001 = vst.msk [vmem:[%s5569_s15] sm:$0xff] %vm57_vm0, %v2999_v17 }
 0xa4e   :  { %4189 = dma.done.wait [#allocation7], 256  }
 0xa4f   :  { %4190 = vsyncadd [#allocation7], 4294967040 }
 0xa50   :  { %3022 = vsyncpa [#allocation7], 1 }

</bundles_post_ra>
